<compile_context>
chip_gen: v5e
topology: v5e:2x2
jax: 0.10.0
libtpu: 0.0.40
codegen_flags: <defaults>
</compile_context>

<pallas_src>
import jax
import jax.numpy as jnp
from jax.experimental import pallas as pl
from jax.experimental.pallas import tpu as pltpu


# ------------------------------------------------------------------- kernel

def _cnn_fused_kernel(p1_ref, w1_ref, b1_ref, w2_ref, b2_ref,
                      wm1_ref, bm1_ref, wm2_ref, bm2_ref, wm3_ref, bm3_ref,
                      out_ref, p1buf, a2buf):
    # ---- conv1 (im2col matmul) + bias + ReLU --------------------------------
    a1 = jnp.dot(p1_ref[0], w1_ref[...], preferred_element_type=jnp.float32)
    a1 = jnp.maximum(a1 + b1_ref[...], 0.0)                       # (576, 10)

    # ---- maxpool1: rows are ordered (dh, dw, h', w') -> max of 4 parity blocks
    pool1 = jnp.maximum(jnp.maximum(a1[0:144], a1[144:288]),
                        jnp.maximum(a1[288:432], a1[432:576]))    # (144, 10)

    # stash pool1 (12x12 raster, channels on lanes) for windowed reads
    p1buf[0:144, :] = pool1
    p1buf[144:200, :] = jnp.zeros((56, 10), jnp.float32)

    # ---- conv2 as 25 shifted matmuls over the 12x12 raster -------------------
    acc2 = jnp.broadcast_to(b2_ref[...], (144, 20))
    for ki in range(5):
        for kj in range(5):
            shift = ki * 12 + kj
            acc2 = acc2 + jnp.dot(p1buf[shift:shift + 144, :],
                                  w2_ref[ki * 5 + kj],
                                  preferred_element_type=jnp.float32)
    a2buf[0:144, :] = jnp.maximum(acc2, 0.0)                      # relu(conv2)
    a2buf[144:160, :] = jnp.zeros((16, 20), jnp.float32)

    # ---- maxpool2 (2x2, stride 2) on the valid 8x8 sub-raster ----------------
    m = jnp.maximum(jnp.maximum(a2buf[0:144, :], a2buf[1:145, :]),
                    jnp.maximum(a2buf[12:156, :], a2buf[13:157, :]))  # (144, 20)

    # ---- flatten + mlp1 fused: 16 pooled positions ---------------------------
    h1 = bm1_ref[...]                                             # (1, 128)
    for p in range(16):
        ip, jp = divmod(p, 4)
        row = 24 * ip + 2 * jp
        h1 = h1 + jnp.dot(m[row:row + 1, :], wm1_ref[p],
                          preferred_element_type=jnp.float32)
    h1 = jnp.maximum(h1, 0.0)                                     # (1, 128)

    # ---- mlp2 / mlp3 / softmax (padded to 128 lanes) -------------------------
    h2 = jnp.dot(h1, wm2_ref[...],
                 preferred_element_type=jnp.float32) + bm2_ref[...]
    h2 = jnp.maximum(h2, 0.0)
    logits = jnp.dot(h2, wm3_ref[...],
                     preferred_element_type=jnp.float32) + bm3_ref[...]

    lane = jax.lax.broadcasted_iota(jnp.int32, (1, 128), 1)
    logits = jnp.where(lane < 10, logits, -jnp.inf)
    zmax = jnp.max(logits, axis=-1, keepdims=True)
    e = jnp.exp(logits - zmax)
    out_ref[0] = e / jnp.sum(e, axis=-1, keepdims=True)


# ------------------------------------------------------------------ wrappers

def _conv1_patches(x):
    """x: (B, 1, 28, 28) NCHW -> (B, 576, 25) patches.

    Row ordering is (dh, dw, h', w') with (h, w) = (2h'+dh, 2w'+dw) so that
    maxpool1 inside the kernel is a max over four contiguous 144-row blocks.
    Column ordering is ki*5+kj (matches the torch weight reshape).
    """
    B = x.shape[0]
    img = x[:, 0]                                        # (B, 28, 28)
    cols = [img[:, ki:ki + 24, kj:kj + 24]
            for ki in range(5) for kj in range(5)]
    p = jnp.stack(cols, axis=-1)                         # (B, 24, 24, 25)
    p = p.reshape(B, 12, 2, 12, 2, 25)                   # (B, h', dh, w', dw, k)
    p = p.transpose(0, 2, 4, 1, 3, 5)                    # (B, dh, dw, h', w', k)
    return p.reshape(B, 576, 25)


def _prepare_weights(p):
    """One-time reshape/permute/pad of the PyTorch-layout parameters."""
    w1m = p["conv1_w"].reshape(10, 25).T                       # (25, 10)
    b1 = p["conv1_b"].reshape(1, 10)
    # conv2 weight keyed by (ki, kj): (25, Cin=10, Cout=20)
    w2r = p["conv2_w"].transpose(2, 3, 1, 0).reshape(25, 10, 20)
    b2 = p["conv2_b"].reshape(1, 20)
    # mlp1 weight permuted to (position=16, channel=20, out) to absorb the
    # NCHW flatten order, then zero-padded to 128 output lanes.
    wm1r = p["mlp1_w"].reshape(50, 20, 16).transpose(2, 1, 0)   # (16, 20, 50)
    wm1r = jnp.pad(wm1r, ((0, 0), (0, 0), (0, 78)))             # (16, 20, 128)
    bm1 = jnp.pad(p["mlp1_b"], (0, 78)).reshape(1, 128)
    wm2 = jnp.pad(p["mlp2_w"].T, ((0, 78), (0, 68)))            # (128, 128)
    bm2 = jnp.pad(p["mlp2_b"], (0, 68)).reshape(1, 128)
    wm3 = jnp.pad(p["mlp3_w"].T, ((0, 68), (0, 118)))           # (128, 128)
    bm3 = jnp.pad(p["mlp3_b"], (0, 118)).reshape(1, 128)
    return w1m, b1, w2r, b2, wm1r, bm1, wm2, bm2, wm3, bm3


@jax.jit
def cnn_forward(params, x):
    """x: (B, 1, 28, 28) NCHW float32 -> (B, 10) softmax probabilities."""
    B = x.shape[0]
    patches = _conv1_patches(x)                                  # (B, 576, 25)
    (w1m, b1, w2r, b2,
     wm1r, bm1, wm2, bm2, wm3, bm3) = _prepare_weights(params)

    out = pl.pallas_call(
        _cnn_fused_kernel,
        out_shape=jax.ShapeDtypeStruct((B, 1, 128), jnp.float32),
        grid=(B,),
        in_specs=[
            pl.BlockSpec((1, 576, 25), lambda b: (b, 0, 0)),     # patches
            pl.BlockSpec((25, 10), lambda b: (0, 0)),            # conv1 w
            pl.BlockSpec((1, 10), lambda b: (0, 0)),             # conv1 b
            pl.BlockSpec((25, 10, 20), lambda b: (0, 0, 0)),     # conv2 w
            pl.BlockSpec((1, 20), lambda b: (0, 0)),             # conv2 b
            pl.BlockSpec((16, 20, 128), lambda b: (0, 0, 0)),    # mlp1 w
            pl.BlockSpec((1, 128), lambda b: (0, 0)),            # mlp1 b
            pl.BlockSpec((128, 128), lambda b: (0, 0)),          # mlp2 w
            pl.BlockSpec((1, 128), lambda b: (0, 0)),            # mlp2 b
            pl.BlockSpec((128, 128), lambda b: (0, 0)),          # mlp3 w
            pl.BlockSpec((1, 128), lambda b: (0, 0)),            # mlp3 b
        ],
        out_specs=pl.BlockSpec((1, 1, 128), lambda b: (b, 0, 0)),
        scratch_shapes=[
            pltpu.VMEM((200, 10), jnp.float32),   # pool1 raster (+ window pad)
            pltpu.VMEM((160, 20), jnp.float32),   # conv2 raster (+ window pad)
        ],
        compiler_params=pltpu.CompilerParams(
            dimension_semantics=("parallel",)),
    )(patches, w1m, b1, w2r, b2, wm1r, bm1, wm2, bm2, wm3, bm3)

    return out[:, 0, :10]


# -------------------------------------------------------------------- params

def init_params(key):
    """Deterministic params in PyTorch layouts, uniform(-1/sqrt(fan_in), +)."""
    ks = jax.random.split(key, 10)

    def u(k, shape, fan_in):
        bound = 1.0 / float(fan_in) ** 0.5
        return jax.random.uniform(k, shape, jnp.float32, -bound, bound)

    return {
        "conv1_w": u(ks[0], (10, 1, 5, 5), 1 * 5 * 5),
        "conv1_b": u(ks[1], (10,), 1 * 5 * 5),
        "conv2_w": u(ks[2], (20, 10, 5, 5), 10 * 5 * 5),
        "conv2_b": u(ks[3], (20,), 10 * 5 * 5),
        "mlp1_w": u(ks[4], (50, 20 * 4 * 4), 20 * 4 * 4),
        "mlp1_b": u(ks[5], (50,), 20 * 4 * 4),
        "mlp2_w": u(ks[6], (60, 50), 50),
        "mlp2_b": u(ks[7], (60,), 50),
        "mlp3_w": u(ks[8], (10, 60), 60),
        "mlp3_b": u(ks[9], (10,), 60),
    }


if __name__ == "__main__":
    key = jax.random.PRNGKey(0)
    pkey, xkey = jax.random.split(key)
    params = init_params(pkey)
    # mlp1 expects 20*4*4 features, which forces a 28x28 spatial input.
    x = jax.random.normal(xkey, (2, 1, 28, 28), jnp.float32)
    out = cnn_forward(params, x)
    out = jax.block_until_ready(out)
    assert out.shape == (2, 10)
    print("KERNEL_OK")
</pallas_src>

<mosaic_0001>
module attributes {stable_mosaic.version = 11 : i64} {
  func.func @_cnn_fused_kernel(%arg0: i32, %arg1: memref<1x576x25xf32, #tpu.memory_space<vmem>>, %arg2: memref<25x10xf32, #tpu.memory_space<vmem>>, %arg3: memref<1x10xf32, #tpu.memory_space<vmem>>, %arg4: memref<25x10x20xf32, #tpu.memory_space<vmem>>, %arg5: memref<1x20xf32, #tpu.memory_space<vmem>>, %arg6: memref<16x20x128xf32, #tpu.memory_space<vmem>>, %arg7: memref<1x128xf32, #tpu.memory_space<vmem>>, %arg8: memref<128x128xf32, #tpu.memory_space<vmem>>, %arg9: memref<1x128xf32, #tpu.memory_space<vmem>>, %arg10: memref<128x128xf32, #tpu.memory_space<vmem>>, %arg11: memref<1x128xf32, #tpu.memory_space<vmem>>, %arg12: memref<1x1x128xf32, #tpu.memory_space<vmem>>, %arg13: memref<200x10xf32, #tpu.memory_space<vmem>>, %arg14: memref<160x20xf32, #tpu.memory_space<vmem>>) attributes {dimension_semantics = [#tpu.dimension_semantics<parallel>], iteration_bounds = array<i64: 2>, scalar_prefetch = 0 : i64, scratch_operands = 2 : i64, tpu.core_type = #tpu.core_type<tc>, window_params = [{transform_indices = @transform_0, window_bounds = array<i64: 1, 576, 25>}, {pipeline_mode = #tpu.pipeline_mode<synchronous>, transform_indices = @transform_1, window_bounds = array<i64: 25, 10>}, {pipeline_mode = #tpu.pipeline_mode<synchronous>, transform_indices = @transform_2, window_bounds = array<i64: 1, 10>}, {pipeline_mode = #tpu.pipeline_mode<synchronous>, transform_indices = @transform_3, window_bounds = array<i64: 25, 10, 20>}, {pipeline_mode = #tpu.pipeline_mode<synchronous>, transform_indices = @transform_4, window_bounds = array<i64: 1, 20>}, {pipeline_mode = #tpu.pipeline_mode<synchronous>, transform_indices = @transform_5, window_bounds = array<i64: 16, 20, 128>}, {pipeline_mode = #tpu.pipeline_mode<synchronous>, transform_indices = @transform_6, window_bounds = array<i64: 1, 128>}, {pipeline_mode = #tpu.pipeline_mode<synchronous>, transform_indices = @transform_7, window_bounds = array<i64: 128, 128>}, {pipeline_mode = #tpu.pipeline_mode<synchronous>, transform_indices = @transform_8, window_bounds = array<i64: 1, 128>}, {pipeline_mode = #tpu.pipeline_mode<synchronous>, transform_indices = @transform_9, window_bounds = array<i64: 128, 128>}, {pipeline_mode = #tpu.pipeline_mode<synchronous>, transform_indices = @transform_10, window_bounds = array<i64: 1, 128>}, {transform_indices = @transform_11, window_bounds = array<i64: 1, 1, 128>}]} {
    %c0 = arith.constant 0 : index
    %c0_0 = arith.constant 0 : index
    %c0_1 = arith.constant 0 : index
    %0 = vector.load %arg1[%c0, %c0_0, %c0_1] : memref<1x576x25xf32, #tpu.memory_space<vmem>>, vector<1x576x25xf32>
    %1 = vector.shape_cast %0 : vector<1x576x25xf32> to vector<576x25xf32>
    %c0_2 = arith.constant 0 : index
    %c0_3 = arith.constant 0 : index
    %2 = vector.load %arg2[%c0_2, %c0_3] : memref<25x10xf32, #tpu.memory_space<vmem>>, vector<25x10xf32>
    %cst = arith.constant dense<0.000000e+00> : vector<576x10xf32>
    %3 = tpu.matmul %1, %2, %cst {dimension_numbers = #tpu.dot_dimension_numbers<[1], [0], [0], [1], [0, 0, 1, 1], [], []>} : vector<576x25xf32>, vector<25x10xf32>, vector<576x10xf32> -> vector<576x10xf32>
    %c0_4 = arith.constant 0 : index
    %c0_5 = arith.constant 0 : index
    %4 = vector.load %arg3[%c0_4, %c0_5] : memref<1x10xf32, #tpu.memory_space<vmem>>, vector<1x10xf32>
    %5 = vector.broadcast %4 : vector<1x10xf32> to vector<576x10xf32>
    %6 = arith.addf %3, %5 : vector<576x10xf32>
    %cst_6 = arith.constant 0.000000e+00 : f32
    %7 = vector.broadcast %cst_6 : f32 to vector<576x10xf32>
    %8 = arith.maximumf %6, %7 : vector<576x10xf32>
    %9 = vector.extract_strided_slice %8 {offsets = [0, 0], sizes = [144, 10], strides = [1, 1]} : vector<576x10xf32> to vector<144x10xf32>
    %10 = vector.extract_strided_slice %8 {offsets = [144, 0], sizes = [144, 10], strides = [1, 1]} : vector<576x10xf32> to vector<144x10xf32>
    %11 = arith.maximumf %9, %10 : vector<144x10xf32>
    %12 = vector.extract_strided_slice %8 {offsets = [288, 0], sizes = [144, 10], strides = [1, 1]} : vector<576x10xf32> to vector<144x10xf32>
    %13 = vector.extract_strided_slice %8 {offsets = [432, 0], sizes = [144, 10], strides = [1, 1]} : vector<576x10xf32> to vector<144x10xf32>
    %14 = arith.maximumf %12, %13 : vector<144x10xf32>
    %15 = arith.maximumf %11, %14 : vector<144x10xf32>
    %c0_7 = arith.constant 0 : index
    %c0_8 = arith.constant 0 : index
    %16 = vector.load %arg13[%c0_7, %c0_8] : memref<200x10xf32, #tpu.memory_space<vmem>>, vector<144x10xf32>
    tpu.vector_store %arg13[%c0_7, %c0_8], %15 {strides = array<i32>} : memref<200x10xf32, #tpu.memory_space<vmem>>, vector<144x10xf32>,
    %cst_9 = arith.constant 0.000000e+00 : f32
    %17 = vector.broadcast %cst_9 : f32 to vector<56x10xf32>
    %c144 = arith.constant 144 : index
    %c0_10 = arith.constant 0 : index
    %18 = vector.load %arg13[%c144, %c0_10] : memref<200x10xf32, #tpu.memory_space<vmem>>, vector<56x10xf32>
    tpu.vector_store %arg13[%c144, %c0_10], %17 {strides = array<i32>} : memref<200x10xf32, #tpu.memory_space<vmem>>, vector<56x10xf32>,
    %c0_11 = arith.constant 0 : index
    %c0_12 = arith.constant 0 : index
    %19 = vector.load %arg5[%c0_11, %c0_12] : memref<1x20xf32, #tpu.memory_space<vmem>>, vector<1x20xf32>
    %20 = vector.shape_cast %19 : vector<1x20xf32> to vector<1x20xf32>
    %21 = vector.broadcast %20 : vector<1x20xf32> to vector<144x20xf32>
    %c0_13 = arith.constant 0 : index
    %c0_14 = arith.constant 0 : index
    %22 = vector.load %arg13[%c0_13, %c0_14] : memref<200x10xf32, #tpu.memory_space<vmem>>, vector<144x10xf32>
    %c0_15 = arith.constant 0 : index
    %c0_16 = arith.constant 0 : index
    %c0_17 = arith.constant 0 : index
    %23 = vector.load %arg4[%c0_15, %c0_16, %c0_17] : memref<25x10x20xf32, #tpu.memory_space<vmem>>, vector<1x10x20xf32>
    %24 = vector.shape_cast %23 : vector<1x10x20xf32> to vector<10x20xf32>
    %cst_18 = arith.constant dense<0.000000e+00> : vector<144x20xf32>
    %25 = tpu.matmul %22, %24, %cst_18 {dimension_numbers = #tpu.dot_dimension_numbers<[1], [0], [0], [1], [0, 0, 1, 1], [], []>} : vector<144x10xf32>, vector<10x20xf32>, vector<144x20xf32> -> vector<144x20xf32>
    %26 = arith.addf %21, %25 : vector<144x20xf32>
    %c1 = arith.constant 1 : index
    %c0_19 = arith.constant 0 : index
    %27 = vector.load %arg13[%c1, %c0_19] : memref<200x10xf32, #tpu.memory_space<vmem>>, vector<144x10xf32>
    %c1_20 = arith.constant 1 : index
    %c0_21 = arith.constant 0 : index
    %c0_22 = arith.constant 0 : index
    %28 = vector.load %arg4[%c1_20, %c0_21, %c0_22] : memref<25x10x20xf32, #tpu.memory_space<vmem>>, vector<1x10x20xf32>
    %29 = vector.shape_cast %28 : vector<1x10x20xf32> to vector<10x20xf32>
    %cst_23 = arith.constant dense<0.000000e+00> : vector<144x20xf32>
    %30 = tpu.matmul %27, %29, %cst_23 {dimension_numbers = #tpu.dot_dimension_numbers<[1], [0], [0], [1], [0, 0, 1, 1], [], []>} : vector<144x10xf32>, vector<10x20xf32>, vector<144x20xf32> -> vector<144x20xf32>
    %31 = arith.addf %26, %30 : vector<144x20xf32>
    %c2 = arith.constant 2 : index
    %c0_24 = arith.constant 0 : index
    %32 = vector.load %arg13[%c2, %c0_24] : memref<200x10xf32, #tpu.memory_space<vmem>>, vector<144x10xf32>
    %c2_25 = arith.constant 2 : index
    %c0_26 = arith.constant 0 : index
    %c0_27 = arith.constant 0 : index
    %33 = vector.load %arg4[%c2_25, %c0_26, %c0_27] : memref<25x10x20xf32, #tpu.memory_space<vmem>>, vector<1x10x20xf32>
    %34 = vector.shape_cast %33 : vector<1x10x20xf32> to vector<10x20xf32>
    %cst_28 = arith.constant dense<0.000000e+00> : vector<144x20xf32>
    %35 = tpu.matmul %32, %34, %cst_28 {dimension_numbers = #tpu.dot_dimension_numbers<[1], [0], [0], [1], [0, 0, 1, 1], [], []>} : vector<144x10xf32>, vector<10x20xf32>, vector<144x20xf32> -> vector<144x20xf32>
    %36 = arith.addf %31, %35 : vector<144x20xf32>
    %c3 = arith.constant 3 : index
    %c0_29 = arith.constant 0 : index
    %37 = vector.load %arg13[%c3, %c0_29] : memref<200x10xf32, #tpu.memory_space<vmem>>, vector<144x10xf32>
    %c3_30 = arith.constant 3 : index
    %c0_31 = arith.constant 0 : index
    %c0_32 = arith.constant 0 : index
    %38 = vector.load %arg4[%c3_30, %c0_31, %c0_32] : memref<25x10x20xf32, #tpu.memory_space<vmem>>, vector<1x10x20xf32>
    %39 = vector.shape_cast %38 : vector<1x10x20xf32> to vector<10x20xf32>
    %cst_33 = arith.constant dense<0.000000e+00> : vector<144x20xf32>
    %40 = tpu.matmul %37, %39, %cst_33 {dimension_numbers = #tpu.dot_dimension_numbers<[1], [0], [0], [1], [0, 0, 1, 1], [], []>} : vector<144x10xf32>, vector<10x20xf32>, vector<144x20xf32> -> vector<144x20xf32>
    %41 = arith.addf %36, %40 : vector<144x20xf32>
    %c4 = arith.constant 4 : index
    %c0_34 = arith.constant 0 : index
    %42 = vector.load %arg13[%c4, %c0_34] : memref<200x10xf32, #tpu.memory_space<vmem>>, vector<144x10xf32>
    %c4_35 = arith.constant 4 : index
    %c0_36 = arith.constant 0 : index
    %c0_37 = arith.constant 0 : index
    %43 = vector.load %arg4[%c4_35, %c0_36, %c0_37] : memref<25x10x20xf32, #tpu.memory_space<vmem>>, vector<1x10x20xf32>
    %44 = vector.shape_cast %43 : vector<1x10x20xf32> to vector<10x20xf32>
    %cst_38 = arith.constant dense<0.000000e+00> : vector<144x20xf32>
    %45 = tpu.matmul %42, %44, %cst_38 {dimension_numbers = #tpu.dot_dimension_numbers<[1], [0], [0], [1], [0, 0, 1, 1], [], []>} : vector<144x10xf32>, vector<10x20xf32>, vector<144x20xf32> -> vector<144x20xf32>
    %46 = arith.addf %41, %45 : vector<144x20xf32>
    %c12 = arith.constant 12 : index
    %c0_39 = arith.constant 0 : index
    %47 = vector.load %arg13[%c12, %c0_39] : memref<200x10xf32, #tpu.memory_space<vmem>>, vector<144x10xf32>
    %c5 = arith.constant 5 : index
    %c0_40 = arith.constant 0 : index
    %c0_41 = arith.constant 0 : index
    %48 = vector.load %arg4[%c5, %c0_40, %c0_41] : memref<25x10x20xf32, #tpu.memory_space<vmem>>, vector<1x10x20xf32>
    %49 = vector.shape_cast %48 : vector<1x10x20xf32> to vector<10x20xf32>
    %cst_42 = arith.constant dense<0.000000e+00> : vector<144x20xf32>
    %50 = tpu.matmul %47, %49, %cst_42 {dimension_numbers = #tpu.dot_dimension_numbers<[1], [0], [0], [1], [0, 0, 1, 1], [], []>} : vector<144x10xf32>, vector<10x20xf32>, vector<144x20xf32> -> vector<144x20xf32>
    %51 = arith.addf %46, %50 : vector<144x20xf32>
    %c13 = arith.constant 13 : index
    %c0_43 = arith.constant 0 : index
    %52 = vector.load %arg13[%c13, %c0_43] : memref<200x10xf32, #tpu.memory_space<vmem>>, vector<144x10xf32>
    %c6 = arith.constant 6 : index
    %c0_44 = arith.constant 0 : index
    %c0_45 = arith.constant 0 : index
    %53 = vector.load %arg4[%c6, %c0_44, %c0_45] : memref<25x10x20xf32, #tpu.memory_space<vmem>>, vector<1x10x20xf32>
    %54 = vector.shape_cast %53 : vector<1x10x20xf32> to vector<10x20xf32>
    %cst_46 = arith.constant dense<0.000000e+00> : vector<144x20xf32>
    %55 = tpu.matmul %52, %54, %cst_46 {dimension_numbers = #tpu.dot_dimension_numbers<[1], [0], [0], [1], [0, 0, 1, 1], [], []>} : vector<144x10xf32>, vector<10x20xf32>, vector<144x20xf32> -> vector<144x20xf32>
    %56 = arith.addf %51, %55 : vector<144x20xf32>
    %c14 = arith.constant 14 : index
    %c0_47 = arith.constant 0 : index
    %57 = vector.load %arg13[%c14, %c0_47] : memref<200x10xf32, #tpu.memory_space<vmem>>, vector<144x10xf32>
    %c7 = arith.constant 7 : index
    %c0_48 = arith.constant 0 : index
    %c0_49 = arith.constant 0 : index
    %58 = vector.load %arg4[%c7, %c0_48, %c0_49] : memref<25x10x20xf32, #tpu.memory_space<vmem>>, vector<1x10x20xf32>
    %59 = vector.shape_cast %58 : vector<1x10x20xf32> to vector<10x20xf32>
    %cst_50 = arith.constant dense<0.000000e+00> : vector<144x20xf32>
    %60 = tpu.matmul %57, %59, %cst_50 {dimension_numbers = #tpu.dot_dimension_numbers<[1], [0], [0], [1], [0, 0, 1, 1], [], []>} : vector<144x10xf32>, vector<10x20xf32>, vector<144x20xf32> -> vector<144x20xf32>
    %61 = arith.addf %56, %60 : vector<144x20xf32>
    %c15 = arith.constant 15 : index
    %c0_51 = arith.constant 0 : index
    %62 = vector.load %arg13[%c15, %c0_51] : memref<200x10xf32, #tpu.memory_space<vmem>>, vector<144x10xf32>
    %c8 = arith.constant 8 : index
    %c0_52 = arith.constant 0 : index
    %c0_53 = arith.constant 0 : index
    %63 = vector.load %arg4[%c8, %c0_52, %c0_53] : memref<25x10x20xf32, #tpu.memory_space<vmem>>, vector<1x10x20xf32>
    %64 = vector.shape_cast %63 : vector<1x10x20xf32> to vector<10x20xf32>
    %cst_54 = arith.constant dense<0.000000e+00> : vector<144x20xf32>
    %65 = tpu.matmul %62, %64, %cst_54 {dimension_numbers = #tpu.dot_dimension_numbers<[1], [0], [0], [1], [0, 0, 1, 1], [], []>} : vector<144x10xf32>, vector<10x20xf32>, vector<144x20xf32> -> vector<144x20xf32>
    %66 = arith.addf %61, %65 : vector<144x20xf32>
    %c16 = arith.constant 16 : index
    %c0_55 = arith.constant 0 : index
    %67 = vector.load %arg13[%c16, %c0_55] : memref<200x10xf32, #tpu.memory_space<vmem>>, vector<144x10xf32>
    %c9 = arith.constant 9 : index
    %c0_56 = arith.constant 0 : index
    %c0_57 = arith.constant 0 : index
    %68 = vector.load %arg4[%c9, %c0_56, %c0_57] : memref<25x10x20xf32, #tpu.memory_space<vmem>>, vector<1x10x20xf32>
    %69 = vector.shape_cast %68 : vector<1x10x20xf32> to vector<10x20xf32>
    %cst_58 = arith.constant dense<0.000000e+00> : vector<144x20xf32>
    %70 = tpu.matmul %67, %69, %cst_58 {dimension_numbers = #tpu.dot_dimension_numbers<[1], [0], [0], [1], [0, 0, 1, 1], [], []>} : vector<144x10xf32>, vector<10x20xf32>, vector<144x20xf32> -> vector<144x20xf32>
    %71 = arith.addf %66, %70 : vector<144x20xf32>
    %c24 = arith.constant 24 : index
    %c0_59 = arith.constant 0 : index
    %72 = vector.load %arg13[%c24, %c0_59] : memref<200x10xf32, #tpu.memory_space<vmem>>, vector<144x10xf32>
    %c10 = arith.constant 10 : index
    %c0_60 = arith.constant 0 : index
    %c0_61 = arith.constant 0 : index
    %73 = vector.load %arg4[%c10, %c0_60, %c0_61] : memref<25x10x20xf32, #tpu.memory_space<vmem>>, vector<1x10x20xf32>
    %74 = vector.shape_cast %73 : vector<1x10x20xf32> to vector<10x20xf32>
    %cst_62 = arith.constant dense<0.000000e+00> : vector<144x20xf32>
    %75 = tpu.matmul %72, %74, %cst_62 {dimension_numbers = #tpu.dot_dimension_numbers<[1], [0], [0], [1], [0, 0, 1, 1], [], []>} : vector<144x10xf32>, vector<10x20xf32>, vector<144x20xf32> -> vector<144x20xf32>
    %76 = arith.addf %71, %75 : vector<144x20xf32>
    %c25 = arith.constant 25 : index
    %c0_63 = arith.constant 0 : index
    %77 = vector.load %arg13[%c25, %c0_63] : memref<200x10xf32, #tpu.memory_space<vmem>>, vector<144x10xf32>
    %c11 = arith.constant 11 : index
    %c0_64 = arith.constant 0 : index
    %c0_65 = arith.constant 0 : index
    %78 = vector.load %arg4[%c11, %c0_64, %c0_65] : memref<25x10x20xf32, #tpu.memory_space<vmem>>, vector<1x10x20xf32>
    %79 = vector.shape_cast %78 : vector<1x10x20xf32> to vector<10x20xf32>
    %cst_66 = arith.constant dense<0.000000e+00> : vector<144x20xf32>
    %80 = tpu.matmul %77, %79, %cst_66 {dimension_numbers = #tpu.dot_dimension_numbers<[1], [0], [0], [1], [0, 0, 1, 1], [], []>} : vector<144x10xf32>, vector<10x20xf32>, vector<144x20xf32> -> vector<144x20xf32>
    %81 = arith.addf %76, %80 : vector<144x20xf32>
    %c26 = arith.constant 26 : index
    %c0_67 = arith.constant 0 : index
    %82 = vector.load %arg13[%c26, %c0_67] : memref<200x10xf32, #tpu.memory_space<vmem>>, vector<144x10xf32>
    %c12_68 = arith.constant 12 : index
    %c0_69 = arith.constant 0 : index
    %c0_70 = arith.constant 0 : index
    %83 = vector.load %arg4[%c12_68, %c0_69, %c0_70] : memref<25x10x20xf32, #tpu.memory_space<vmem>>, vector<1x10x20xf32>
    %84 = vector.shape_cast %83 : vector<1x10x20xf32> to vector<10x20xf32>
    %cst_71 = arith.constant dense<0.000000e+00> : vector<144x20xf32>
    %85 = tpu.matmul %82, %84, %cst_71 {dimension_numbers = #tpu.dot_dimension_numbers<[1], [0], [0], [1], [0, 0, 1, 1], [], []>} : vector<144x10xf32>, vector<10x20xf32>, vector<144x20xf32> -> vector<144x20xf32>
    %86 = arith.addf %81, %85 : vector<144x20xf32>
    %c27 = arith.constant 27 : index
    %c0_72 = arith.constant 0 : index
    %87 = vector.load %arg13[%c27, %c0_72] : memref<200x10xf32, #tpu.memory_space<vmem>>, vector<144x10xf32>
    %c13_73 = arith.constant 13 : index
    %c0_74 = arith.constant 0 : index
    %c0_75 = arith.constant 0 : index
    %88 = vector.load %arg4[%c13_73, %c0_74, %c0_75] : memref<25x10x20xf32, #tpu.memory_space<vmem>>, vector<1x10x20xf32>
    %89 = vector.shape_cast %88 : vector<1x10x20xf32> to vector<10x20xf32>
    %cst_76 = arith.constant dense<0.000000e+00> : vector<144x20xf32>
    %90 = tpu.matmul %87, %89, %cst_76 {dimension_numbers = #tpu.dot_dimension_numbers<[1], [0], [0], [1], [0, 0, 1, 1], [], []>} : vector<144x10xf32>, vector<10x20xf32>, vector<144x20xf32> -> vector<144x20xf32>
    %91 = arith.addf %86, %90 : vector<144x20xf32>
    %c28 = arith.constant 28 : index
    %c0_77 = arith.constant 0 : index
    %92 = vector.load %arg13[%c28, %c0_77] : memref<200x10xf32, #tpu.memory_space<vmem>>, vector<144x10xf32>
    %c14_78 = arith.constant 14 : index
    %c0_79 = arith.constant 0 : index
    %c0_80 = arith.constant 0 : index
    %93 = vector.load %arg4[%c14_78, %c0_79, %c0_80] : memref<25x10x20xf32, #tpu.memory_space<vmem>>, vector<1x10x20xf32>
    %94 = vector.shape_cast %93 : vector<1x10x20xf32> to vector<10x20xf32>
    %cst_81 = arith.constant dense<0.000000e+00> : vector<144x20xf32>
    %95 = tpu.matmul %92, %94, %cst_81 {dimension_numbers = #tpu.dot_dimension_numbers<[1], [0], [0], [1], [0, 0, 1, 1], [], []>} : vector<144x10xf32>, vector<10x20xf32>, vector<144x20xf32> -> vector<144x20xf32>
    %96 = arith.addf %91, %95 : vector<144x20xf32>
    %c36 = arith.constant 36 : index
    %c0_82 = arith.constant 0 : index
    %97 = vector.load %arg13[%c36, %c0_82] : memref<200x10xf32, #tpu.memory_space<vmem>>, vector<144x10xf32>
    %c15_83 = arith.constant 15 : index
    %c0_84 = arith.constant 0 : index
    %c0_85 = arith.constant 0 : index
    %98 = vector.load %arg4[%c15_83, %c0_84, %c0_85] : memref<25x10x20xf32, #tpu.memory_space<vmem>>, vector<1x10x20xf32>
    %99 = vector.shape_cast %98 : vector<1x10x20xf32> to vector<10x20xf32>
    %cst_86 = arith.constant dense<0.000000e+00> : vector<144x20xf32>
    %100 = tpu.matmul %97, %99, %cst_86 {dimension_numbers = #tpu.dot_dimension_numbers<[1], [0], [0], [1], [0, 0, 1, 1], [], []>} : vector<144x10xf32>, vector<10x20xf32>, vector<144x20xf32> -> vector<144x20xf32>
    %101 = arith.addf %96, %100 : vector<144x20xf32>
    %c37 = arith.constant 37 : index
    %c0_87 = arith.constant 0 : index
    %102 = vector.load %arg13[%c37, %c0_87] : memref<200x10xf32, #tpu.memory_space<vmem>>, vector<144x10xf32>
    %c16_88 = arith.constant 16 : index
    %c0_89 = arith.constant 0 : index
    %c0_90 = arith.constant 0 : index
    %103 = vector.load %arg4[%c16_88, %c0_89, %c0_90] : memref<25x10x20xf32, #tpu.memory_space<vmem>>, vector<1x10x20xf32>
    %104 = vector.shape_cast %103 : vector<1x10x20xf32> to vector<10x20xf32>
    %cst_91 = arith.constant dense<0.000000e+00> : vector<144x20xf32>
    %105 = tpu.matmul %102, %104, %cst_91 {dimension_numbers = #tpu.dot_dimension_numbers<[1], [0], [0], [1], [0, 0, 1, 1], [], []>} : vector<144x10xf32>, vector<10x20xf32>, vector<144x20xf32> -> vector<144x20xf32>
    %106 = arith.addf %101, %105 : vector<144x20xf32>
    %c38 = arith.constant 38 : index
    %c0_92 = arith.constant 0 : index
    %107 = vector.load %arg13[%c38, %c0_92] : memref<200x10xf32, #tpu.memory_space<vmem>>, vector<144x10xf32>
    %c17 = arith.constant 17 : index
    %c0_93 = arith.constant 0 : index
    %c0_94 = arith.constant 0 : index
    %108 = vector.load %arg4[%c17, %c0_93, %c0_94] : memref<25x10x20xf32, #tpu.memory_space<vmem>>, vector<1x10x20xf32>
    %109 = vector.shape_cast %108 : vector<1x10x20xf32> to vector<10x20xf32>
    %cst_95 = arith.constant dense<0.000000e+00> : vector<144x20xf32>
    %110 = tpu.matmul %107, %109, %cst_95 {dimension_numbers = #tpu.dot_dimension_numbers<[1], [0], [0], [1], [0, 0, 1, 1], [], []>} : vector<144x10xf32>, vector<10x20xf32>, vector<144x20xf32> -> vector<144x20xf32>
    %111 = arith.addf %106, %110 : vector<144x20xf32>
    %c39 = arith.constant 39 : index
    %c0_96 = arith.constant 0 : index
    %112 = vector.load %arg13[%c39, %c0_96] : memref<200x10xf32, #tpu.memory_space<vmem>>, vector<144x10xf32>
    %c18 = arith.constant 18 : index
    %c0_97 = arith.constant 0 : index
    %c0_98 = arith.constant 0 : index
    %113 = vector.load %arg4[%c18, %c0_97, %c0_98] : memref<25x10x20xf32, #tpu.memory_space<vmem>>, vector<1x10x20xf32>
    %114 = vector.shape_cast %113 : vector<1x10x20xf32> to vector<10x20xf32>
    %cst_99 = arith.constant dense<0.000000e+00> : vector<144x20xf32>
    %115 = tpu.matmul %112, %114, %cst_99 {dimension_numbers = #tpu.dot_dimension_numbers<[1], [0], [0], [1], [0, 0, 1, 1], [], []>} : vector<144x10xf32>, vector<10x20xf32>, vector<144x20xf32> -> vector<144x20xf32>
    %116 = arith.addf %111, %115 : vector<144x20xf32>
    %c40 = arith.constant 40 : index
    %c0_100 = arith.constant 0 : index
    %117 = vector.load %arg13[%c40, %c0_100] : memref<200x10xf32, #tpu.memory_space<vmem>>, vector<144x10xf32>
    %c19 = arith.constant 19 : index
    %c0_101 = arith.constant 0 : index
    %c0_102 = arith.constant 0 : index
    %118 = vector.load %arg4[%c19, %c0_101, %c0_102] : memref<25x10x20xf32, #tpu.memory_space<vmem>>, vector<1x10x20xf32>
    %119 = vector.shape_cast %118 : vector<1x10x20xf32> to vector<10x20xf32>
    %cst_103 = arith.constant dense<0.000000e+00> : vector<144x20xf32>
    %120 = tpu.matmul %117, %119, %cst_103 {dimension_numbers = #tpu.dot_dimension_numbers<[1], [0], [0], [1], [0, 0, 1, 1], [], []>} : vector<144x10xf32>, vector<10x20xf32>, vector<144x20xf32> -> vector<144x20xf32>
    %121 = arith.addf %116, %120 : vector<144x20xf32>
    %c48 = arith.constant 48 : index
    %c0_104 = arith.constant 0 : index
    %122 = vector.load %arg13[%c48, %c0_104] : memref<200x10xf32, #tpu.memory_space<vmem>>, vector<144x10xf32>
    %c20 = arith.constant 20 : index
    %c0_105 = arith.constant 0 : index
    %c0_106 = arith.constant 0 : index
    %123 = vector.load %arg4[%c20, %c0_105, %c0_106] : memref<25x10x20xf32, #tpu.memory_space<vmem>>, vector<1x10x20xf32>
    %124 = vector.shape_cast %123 : vector<1x10x20xf32> to vector<10x20xf32>
    %cst_107 = arith.constant dense<0.000000e+00> : vector<144x20xf32>
    %125 = tpu.matmul %122, %124, %cst_107 {dimension_numbers = #tpu.dot_dimension_numbers<[1], [0], [0], [1], [0, 0, 1, 1], [], []>} : vector<144x10xf32>, vector<10x20xf32>, vector<144x20xf32> -> vector<144x20xf32>
    %126 = arith.addf %121, %125 : vector<144x20xf32>
    %c49 = arith.constant 49 : index
    %c0_108 = arith.constant 0 : index
    %127 = vector.load %arg13[%c49, %c0_108] : memref<200x10xf32, #tpu.memory_space<vmem>>, vector<144x10xf32>
    %c21 = arith.constant 21 : index
    %c0_109 = arith.constant 0 : index
    %c0_110 = arith.constant 0 : index
    %128 = vector.load %arg4[%c21, %c0_109, %c0_110] : memref<25x10x20xf32, #tpu.memory_space<vmem>>, vector<1x10x20xf32>
    %129 = vector.shape_cast %128 : vector<1x10x20xf32> to vector<10x20xf32>
    %cst_111 = arith.constant dense<0.000000e+00> : vector<144x20xf32>
    %130 = tpu.matmul %127, %129, %cst_111 {dimension_numbers = #tpu.dot_dimension_numbers<[1], [0], [0], [1], [0, 0, 1, 1], [], []>} : vector<144x10xf32>, vector<10x20xf32>, vector<144x20xf32> -> vector<144x20xf32>
    %131 = arith.addf %126, %130 : vector<144x20xf32>
    %c50 = arith.constant 50 : index
    %c0_112 = arith.constant 0 : index
    %132 = vector.load %arg13[%c50, %c0_112] : memref<200x10xf32, #tpu.memory_space<vmem>>, vector<144x10xf32>
    %c22 = arith.constant 22 : index
    %c0_113 = arith.constant 0 : index
    %c0_114 = arith.constant 0 : index
    %133 = vector.load %arg4[%c22, %c0_113, %c0_114] : memref<25x10x20xf32, #tpu.memory_space<vmem>>, vector<1x10x20xf32>
    %134 = vector.shape_cast %133 : vector<1x10x20xf32> to vector<10x20xf32>
    %cst_115 = arith.constant dense<0.000000e+00> : vector<144x20xf32>
    %135 = tpu.matmul %132, %134, %cst_115 {dimension_numbers = #tpu.dot_dimension_numbers<[1], [0], [0], [1], [0, 0, 1, 1], [], []>} : vector<144x10xf32>, vector<10x20xf32>, vector<144x20xf32> -> vector<144x20xf32>
    %136 = arith.addf %131, %135 : vector<144x20xf32>
    %c51 = arith.constant 51 : index
    %c0_116 = arith.constant 0 : index
    %137 = vector.load %arg13[%c51, %c0_116] : memref<200x10xf32, #tpu.memory_space<vmem>>, vector<144x10xf32>
    %c23 = arith.constant 23 : index
    %c0_117 = arith.constant 0 : index
    %c0_118 = arith.constant 0 : index
    %138 = vector.load %arg4[%c23, %c0_117, %c0_118] : memref<25x10x20xf32, #tpu.memory_space<vmem>>, vector<1x10x20xf32>
    %139 = vector.shape_cast %138 : vector<1x10x20xf32> to vector<10x20xf32>
    %cst_119 = arith.constant dense<0.000000e+00> : vector<144x20xf32>
    %140 = tpu.matmul %137, %139, %cst_119 {dimension_numbers = #tpu.dot_dimension_numbers<[1], [0], [0], [1], [0, 0, 1, 1], [], []>} : vector<144x10xf32>, vector<10x20xf32>, vector<144x20xf32> -> vector<144x20xf32>
    %141 = arith.addf %136, %140 : vector<144x20xf32>
    %c52 = arith.constant 52 : index
    %c0_120 = arith.constant 0 : index
    %142 = vector.load %arg13[%c52, %c0_120] : memref<200x10xf32, #tpu.memory_space<vmem>>, vector<144x10xf32>
    %c24_121 = arith.constant 24 : index
    %c0_122 = arith.constant 0 : index
    %c0_123 = arith.constant 0 : index
    %143 = vector.load %arg4[%c24_121, %c0_122, %c0_123] : memref<25x10x20xf32, #tpu.memory_space<vmem>>, vector<1x10x20xf32>
    %144 = vector.shape_cast %143 : vector<1x10x20xf32> to vector<10x20xf32>
    %cst_124 = arith.constant dense<0.000000e+00> : vector<144x20xf32>
    %145 = tpu.matmul %142, %144, %cst_124 {dimension_numbers = #tpu.dot_dimension_numbers<[1], [0], [0], [1], [0, 0, 1, 1], [], []>} : vector<144x10xf32>, vector<10x20xf32>, vector<144x20xf32> -> vector<144x20xf32>
    %146 = arith.addf %141, %145 : vector<144x20xf32>
    %cst_125 = arith.constant 0.000000e+00 : f32
    %147 = vector.broadcast %cst_125 : f32 to vector<144x20xf32>
    %148 = arith.maximumf %146, %147 : vector<144x20xf32>
    %c0_126 = arith.constant 0 : index
    %c0_127 = arith.constant 0 : index
    %149 = vector.load %arg14[%c0_126, %c0_127] : memref<160x20xf32, #tpu.memory_space<vmem>>, vector<144x20xf32>
    tpu.vector_store %arg14[%c0_126, %c0_127], %148 {strides = array<i32>} : memref<160x20xf32, #tpu.memory_space<vmem>>, vector<144x20xf32>,
    %cst_128 = arith.constant 0.000000e+00 : f32
    %150 = vector.broadcast %cst_128 : f32 to vector<16x20xf32>
    %c144_129 = arith.constant 144 : index
    %c0_130 = arith.constant 0 : index
    %151 = vector.load %arg14[%c144_129, %c0_130] : memref<160x20xf32, #tpu.memory_space<vmem>>, vector<16x20xf32>
    tpu.vector_store %arg14[%c144_129, %c0_130], %150 {strides = array<i32>} : memref<160x20xf32, #tpu.memory_space<vmem>>, vector<16x20xf32>,
    %c0_131 = arith.constant 0 : index
    %c0_132 = arith.constant 0 : index
    %152 = vector.load %arg14[%c0_131, %c0_132] : memref<160x20xf32, #tpu.memory_space<vmem>>, vector<144x20xf32>
    %c1_133 = arith.constant 1 : index
    %c0_134 = arith.constant 0 : index
    %153 = vector.load %arg14[%c1_133, %c0_134] : memref<160x20xf32, #tpu.memory_space<vmem>>, vector<144x20xf32>
    %154 = arith.maximumf %152, %153 : vector<144x20xf32>
    %c12_135 = arith.constant 12 : index
    %c0_136 = arith.constant 0 : index
    %155 = vector.load %arg14[%c12_135, %c0_136] : memref<160x20xf32, #tpu.memory_space<vmem>>, vector<144x20xf32>
    %c13_137 = arith.constant 13 : index
    %c0_138 = arith.constant 0 : index
    %156 = vector.load %arg14[%c13_137, %c0_138] : memref<160x20xf32, #tpu.memory_space<vmem>>, vector<144x20xf32>
    %157 = arith.maximumf %155, %156 : vector<144x20xf32>
    %158 = arith.maximumf %154, %157 : vector<144x20xf32>
    %c0_139 = arith.constant 0 : index
    %c0_140 = arith.constant 0 : index
    %159 = vector.load %arg7[%c0_139, %c0_140] : memref<1x128xf32, #tpu.memory_space<vmem>>, vector<1x128xf32>
    %160 = vector.extract_strided_slice %158 {offsets = [0, 0], sizes = [1, 20], strides = [1, 1]} : vector<144x20xf32> to vector<1x20xf32>
    %c0_141 = arith.constant 0 : index
    %c0_142 = arith.constant 0 : index
    %c0_143 = arith.constant 0 : index
    %161 = vector.load %arg6[%c0_141, %c0_142, %c0_143] : memref<16x20x128xf32, #tpu.memory_space<vmem>>, vector<1x20x128xf32>
    %162 = vector.shape_cast %161 : vector<1x20x128xf32> to vector<20x128xf32>
    %cst_144 = arith.constant dense<0.000000e+00> : vector<1x128xf32>
    %163 = tpu.matmul %160, %162, %cst_144 {dimension_numbers = #tpu.dot_dimension_numbers<[1], [0], [0], [1], [0, 0, 1, 1], [], []>} : vector<1x20xf32>, vector<20x128xf32>, vector<1x128xf32> -> vector<1x128xf32>
    %164 = arith.addf %159, %163 : vector<1x128xf32>
    %165 = vector.extract_strided_slice %158 {offsets = [2, 0], sizes = [1, 20], strides = [1, 1]} : vector<144x20xf32> to vector<1x20xf32>
    %c1_145 = arith.constant 1 : index
    %c0_146 = arith.constant 0 : index
    %c0_147 = arith.constant 0 : index
    %166 = vector.load %arg6[%c1_145, %c0_146, %c0_147] : memref<16x20x128xf32, #tpu.memory_space<vmem>>, vector<1x20x128xf32>
    %167 = vector.shape_cast %166 : vector<1x20x128xf32> to vector<20x128xf32>
    %cst_148 = arith.constant dense<0.000000e+00> : vector<1x128xf32>
    %168 = tpu.matmul %165, %167, %cst_148 {dimension_numbers = #tpu.dot_dimension_numbers<[1], [0], [0], [1], [0, 0, 1, 1], [], []>} : vector<1x20xf32>, vector<20x128xf32>, vector<1x128xf32> -> vector<1x128xf32>
    %169 = arith.addf %164, %168 : vector<1x128xf32>
    %170 = vector.extract_strided_slice %158 {offsets = [4, 0], sizes = [1, 20], strides = [1, 1]} : vector<144x20xf32> to vector<1x20xf32>
    %c2_149 = arith.constant 2 : index
    %c0_150 = arith.constant 0 : index
    %c0_151 = arith.constant 0 : index
    %171 = vector.load %arg6[%c2_149, %c0_150, %c0_151] : memref<16x20x128xf32, #tpu.memory_space<vmem>>, vector<1x20x128xf32>
    %172 = vector.shape_cast %171 : vector<1x20x128xf32> to vector<20x128xf32>
    %cst_152 = arith.constant dense<0.000000e+00> : vector<1x128xf32>
    %173 = tpu.matmul %170, %172, %cst_152 {dimension_numbers = #tpu.dot_dimension_numbers<[1], [0], [0], [1], [0, 0, 1, 1], [], []>} : vector<1x20xf32>, vector<20x128xf32>, vector<1x128xf32> -> vector<1x128xf32>
    %174 = arith.addf %169, %173 : vector<1x128xf32>
    %175 = vector.extract_strided_slice %158 {offsets = [6, 0], sizes = [1, 20], strides = [1, 1]} : vector<144x20xf32> to vector<1x20xf32>
    %c3_153 = arith.constant 3 : index
    %c0_154 = arith.constant 0 : index
    %c0_155 = arith.constant 0 : index
    %176 = vector.load %arg6[%c3_153, %c0_154, %c0_155] : memref<16x20x128xf32, #tpu.memory_space<vmem>>, vector<1x20x128xf32>
    %177 = vector.shape_cast %176 : vector<1x20x128xf32> to vector<20x128xf32>
    %cst_156 = arith.constant dense<0.000000e+00> : vector<1x128xf32>
    %178 = tpu.matmul %175, %177, %cst_156 {dimension_numbers = #tpu.dot_dimension_numbers<[1], [0], [0], [1], [0, 0, 1, 1], [], []>} : vector<1x20xf32>, vector<20x128xf32>, vector<1x128xf32> -> vector<1x128xf32>
    %179 = arith.addf %174, %178 : vector<1x128xf32>
    %180 = vector.extract_strided_slice %158 {offsets = [24, 0], sizes = [1, 20], strides = [1, 1]} : vector<144x20xf32> to vector<1x20xf32>
    %c4_157 = arith.constant 4 : index
    %c0_158 = arith.constant 0 : index
    %c0_159 = arith.constant 0 : index
    %181 = vector.load %arg6[%c4_157, %c0_158, %c0_159] : memref<16x20x128xf32, #tpu.memory_space<vmem>>, vector<1x20x128xf32>
    %182 = vector.shape_cast %181 : vector<1x20x128xf32> to vector<20x128xf32>
    %cst_160 = arith.constant dense<0.000000e+00> : vector<1x128xf32>
    %183 = tpu.matmul %180, %182, %cst_160 {dimension_numbers = #tpu.dot_dimension_numbers<[1], [0], [0], [1], [0, 0, 1, 1], [], []>} : vector<1x20xf32>, vector<20x128xf32>, vector<1x128xf32> -> vector<1x128xf32>
    %184 = arith.addf %179, %183 : vector<1x128xf32>
    %185 = vector.extract_strided_slice %158 {offsets = [26, 0], sizes = [1, 20], strides = [1, 1]} : vector<144x20xf32> to vector<1x20xf32>
    %c5_161 = arith.constant 5 : index
    %c0_162 = arith.constant 0 : index
    %c0_163 = arith.constant 0 : index
    %186 = vector.load %arg6[%c5_161, %c0_162, %c0_163] : memref<16x20x128xf32, #tpu.memory_space<vmem>>, vector<1x20x128xf32>
    %187 = vector.shape_cast %186 : vector<1x20x128xf32> to vector<20x128xf32>
    %cst_164 = arith.constant dense<0.000000e+00> : vector<1x128xf32>
    %188 = tpu.matmul %185, %187, %cst_164 {dimension_numbers = #tpu.dot_dimension_numbers<[1], [0], [0], [1], [0, 0, 1, 1], [], []>} : vector<1x20xf32>, vector<20x128xf32>, vector<1x128xf32> -> vector<1x128xf32>
    %189 = arith.addf %184, %188 : vector<1x128xf32>
    %190 = vector.extract_strided_slice %158 {offsets = [28, 0], sizes = [1, 20], strides = [1, 1]} : vector<144x20xf32> to vector<1x20xf32>
    %c6_165 = arith.constant 6 : index
    %c0_166 = arith.constant 0 : index
    %c0_167 = arith.constant 0 : index
    %191 = vector.load %arg6[%c6_165, %c0_166, %c0_167] : memref<16x20x128xf32, #tpu.memory_space<vmem>>, vector<1x20x128xf32>
    %192 = vector.shape_cast %191 : vector<1x20x128xf32> to vector<20x128xf32>
    %cst_168 = arith.constant dense<0.000000e+00> : vector<1x128xf32>
    %193 = tpu.matmul %190, %192, %cst_168 {dimension_numbers = #tpu.dot_dimension_numbers<[1], [0], [0], [1], [0, 0, 1, 1], [], []>} : vector<1x20xf32>, vector<20x128xf32>, vector<1x128xf32> -> vector<1x128xf32>
    %194 = arith.addf %189, %193 : vector<1x128xf32>
    %195 = vector.extract_strided_slice %158 {offsets = [30, 0], sizes = [1, 20], strides = [1, 1]} : vector<144x20xf32> to vector<1x20xf32>
    %c7_169 = arith.constant 7 : index
    %c0_170 = arith.constant 0 : index
    %c0_171 = arith.constant 0 : index
    %196 = vector.load %arg6[%c7_169, %c0_170, %c0_171] : memref<16x20x128xf32, #tpu.memory_space<vmem>>, vector<1x20x128xf32>
    %197 = vector.shape_cast %196 : vector<1x20x128xf32> to vector<20x128xf32>
    %cst_172 = arith.constant dense<0.000000e+00> : vector<1x128xf32>
    %198 = tpu.matmul %195, %197, %cst_172 {dimension_numbers = #tpu.dot_dimension_numbers<[1], [0], [0], [1], [0, 0, 1, 1], [], []>} : vector<1x20xf32>, vector<20x128xf32>, vector<1x128xf32> -> vector<1x128xf32>
    %199 = arith.addf %194, %198 : vector<1x128xf32>
    %200 = vector.extract_strided_slice %158 {offsets = [48, 0], sizes = [1, 20], strides = [1, 1]} : vector<144x20xf32> to vector<1x20xf32>
    %c8_173 = arith.constant 8 : index
    %c0_174 = arith.constant 0 : index
    %c0_175 = arith.constant 0 : index
    %201 = vector.load %arg6[%c8_173, %c0_174, %c0_175] : memref<16x20x128xf32, #tpu.memory_space<vmem>>, vector<1x20x128xf32>
    %202 = vector.shape_cast %201 : vector<1x20x128xf32> to vector<20x128xf32>
    %cst_176 = arith.constant dense<0.000000e+00> : vector<1x128xf32>
    %203 = tpu.matmul %200, %202, %cst_176 {dimension_numbers = #tpu.dot_dimension_numbers<[1], [0], [0], [1], [0, 0, 1, 1], [], []>} : vector<1x20xf32>, vector<20x128xf32>, vector<1x128xf32> -> vector<1x128xf32>
    %204 = arith.addf %199, %203 : vector<1x128xf32>
    %205 = vector.extract_strided_slice %158 {offsets = [50, 0], sizes = [1, 20], strides = [1, 1]} : vector<144x20xf32> to vector<1x20xf32>
    %c9_177 = arith.constant 9 : index
    %c0_178 = arith.constant 0 : index
    %c0_179 = arith.constant 0 : index
    %206 = vector.load %arg6[%c9_177, %c0_178, %c0_179] : memref<16x20x128xf32, #tpu.memory_space<vmem>>, vector<1x20x128xf32>
    %207 = vector.shape_cast %206 : vector<1x20x128xf32> to vector<20x128xf32>
    %cst_180 = arith.constant dense<0.000000e+00> : vector<1x128xf32>
    %208 = tpu.matmul %205, %207, %cst_180 {dimension_numbers = #tpu.dot_dimension_numbers<[1], [0], [0], [1], [0, 0, 1, 1], [], []>} : vector<1x20xf32>, vector<20x128xf32>, vector<1x128xf32> -> vector<1x128xf32>
    %209 = arith.addf %204, %208 : vector<1x128xf32>
    %210 = vector.extract_strided_slice %158 {offsets = [52, 0], sizes = [1, 20], strides = [1, 1]} : vector<144x20xf32> to vector<1x20xf32>
    %c10_181 = arith.constant 10 : index
    %c0_182 = arith.constant 0 : index
    %c0_183 = arith.constant 0 : index
    %211 = vector.load %arg6[%c10_181, %c0_182, %c0_183] : memref<16x20x128xf32, #tpu.memory_space<vmem>>, vector<1x20x128xf32>
    %212 = vector.shape_cast %211 : vector<1x20x128xf32> to vector<20x128xf32>
    %cst_184 = arith.constant dense<0.000000e+00> : vector<1x128xf32>
    %213 = tpu.matmul %210, %212, %cst_184 {dimension_numbers = #tpu.dot_dimension_numbers<[1], [0], [0], [1], [0, 0, 1, 1], [], []>} : vector<1x20xf32>, vector<20x128xf32>, vector<1x128xf32> -> vector<1x128xf32>
    %214 = arith.addf %209, %213 : vector<1x128xf32>
    %215 = vector.extract_strided_slice %158 {offsets = [54, 0], sizes = [1, 20], strides = [1, 1]} : vector<144x20xf32> to vector<1x20xf32>
    %c11_185 = arith.constant 11 : index
    %c0_186 = arith.constant 0 : index
    %c0_187 = arith.constant 0 : index
    %216 = vector.load %arg6[%c11_185, %c0_186, %c0_187] : memref<16x20x128xf32, #tpu.memory_space<vmem>>, vector<1x20x128xf32>
    %217 = vector.shape_cast %216 : vector<1x20x128xf32> to vector<20x128xf32>
    %cst_188 = arith.constant dense<0.000000e+00> : vector<1x128xf32>
    %218 = tpu.matmul %215, %217, %cst_188 {dimension_numbers = #tpu.dot_dimension_numbers<[1], [0], [0], [1], [0, 0, 1, 1], [], []>} : vector<1x20xf32>, vector<20x128xf32>, vector<1x128xf32> -> vector<1x128xf32>
    %219 = arith.addf %214, %218 : vector<1x128xf32>
    %220 = vector.extract_strided_slice %158 {offsets = [72, 0], sizes = [1, 20], strides = [1, 1]} : vector<144x20xf32> to vector<1x20xf32>
    %c12_189 = arith.constant 12 : index
    %c0_190 = arith.constant 0 : index
    %c0_191 = arith.constant 0 : index
    %221 = vector.load %arg6[%c12_189, %c0_190, %c0_191] : memref<16x20x128xf32, #tpu.memory_space<vmem>>, vector<1x20x128xf32>
    %222 = vector.shape_cast %221 : vector<1x20x128xf32> to vector<20x128xf32>
    %cst_192 = arith.constant dense<0.000000e+00> : vector<1x128xf32>
    %223 = tpu.matmul %220, %222, %cst_192 {dimension_numbers = #tpu.dot_dimension_numbers<[1], [0], [0], [1], [0, 0, 1, 1], [], []>} : vector<1x20xf32>, vector<20x128xf32>, vector<1x128xf32> -> vector<1x128xf32>
    %224 = arith.addf %219, %223 : vector<1x128xf32>
    %225 = vector.extract_strided_slice %158 {offsets = [74, 0], sizes = [1, 20], strides = [1, 1]} : vector<144x20xf32> to vector<1x20xf32>
    %c13_193 = arith.constant 13 : index
    %c0_194 = arith.constant 0 : index
    %c0_195 = arith.constant 0 : index
    %226 = vector.load %arg6[%c13_193, %c0_194, %c0_195] : memref<16x20x128xf32, #tpu.memory_space<vmem>>, vector<1x20x128xf32>
    %227 = vector.shape_cast %226 : vector<1x20x128xf32> to vector<20x128xf32>
    %cst_196 = arith.constant dense<0.000000e+00> : vector<1x128xf32>
    %228 = tpu.matmul %225, %227, %cst_196 {dimension_numbers = #tpu.dot_dimension_numbers<[1], [0], [0], [1], [0, 0, 1, 1], [], []>} : vector<1x20xf32>, vector<20x128xf32>, vector<1x128xf32> -> vector<1x128xf32>
    %229 = arith.addf %224, %228 : vector<1x128xf32>
    %230 = vector.extract_strided_slice %158 {offsets = [76, 0], sizes = [1, 20], strides = [1, 1]} : vector<144x20xf32> to vector<1x20xf32>
    %c14_197 = arith.constant 14 : index
    %c0_198 = arith.constant 0 : index
    %c0_199 = arith.constant 0 : index
    %231 = vector.load %arg6[%c14_197, %c0_198, %c0_199] : memref<16x20x128xf32, #tpu.memory_space<vmem>>, vector<1x20x128xf32>
    %232 = vector.shape_cast %231 : vector<1x20x128xf32> to vector<20x128xf32>
    %cst_200 = arith.constant dense<0.000000e+00> : vector<1x128xf32>
    %233 = tpu.matmul %230, %232, %cst_200 {dimension_numbers = #tpu.dot_dimension_numbers<[1], [0], [0], [1], [0, 0, 1, 1], [], []>} : vector<1x20xf32>, vector<20x128xf32>, vector<1x128xf32> -> vector<1x128xf32>
    %234 = arith.addf %229, %233 : vector<1x128xf32>
    %235 = vector.extract_strided_slice %158 {offsets = [78, 0], sizes = [1, 20], strides = [1, 1]} : vector<144x20xf32> to vector<1x20xf32>
    %c15_201 = arith.constant 15 : index
    %c0_202 = arith.constant 0 : index
    %c0_203 = arith.constant 0 : index
    %236 = vector.load %arg6[%c15_201, %c0_202, %c0_203] : memref<16x20x128xf32, #tpu.memory_space<vmem>>, vector<1x20x128xf32>
    %237 = vector.shape_cast %236 : vector<1x20x128xf32> to vector<20x128xf32>
    %cst_204 = arith.constant dense<0.000000e+00> : vector<1x128xf32>
    %238 = tpu.matmul %235, %237, %cst_204 {dimension_numbers = #tpu.dot_dimension_numbers<[1], [0], [0], [1], [0, 0, 1, 1], [], []>} : vector<1x20xf32>, vector<20x128xf32>, vector<1x128xf32> -> vector<1x128xf32>
    %239 = arith.addf %234, %238 : vector<1x128xf32>
    %cst_205 = arith.constant 0.000000e+00 : f32
    %240 = vector.broadcast %cst_205 : f32 to vector<1x128xf32>
    %241 = arith.maximumf %239, %240 : vector<1x128xf32>
    %c0_206 = arith.constant 0 : index
    %c0_207 = arith.constant 0 : index
    %242 = vector.load %arg8[%c0_206, %c0_207] : memref<128x128xf32, #tpu.memory_space<vmem>>, vector<128x128xf32>
    %cst_208 = arith.constant dense<0.000000e+00> : vector<1x128xf32>
    %243 = tpu.matmul %241, %242, %cst_208 {dimension_numbers = #tpu.dot_dimension_numbers<[1], [0], [0], [1], [0, 0, 1, 1], [], []>} : vector<1x128xf32>, vector<128x128xf32>, vector<1x128xf32> -> vector<1x128xf32>
    %c0_209 = arith.constant 0 : index
    %c0_210 = arith.constant 0 : index
    %244 = vector.load %arg9[%c0_209, %c0_210] : memref<1x128xf32, #tpu.memory_space<vmem>>, vector<1x128xf32>
    %245 = arith.addf %243, %244 : vector<1x128xf32>
    %cst_211 = arith.constant 0.000000e+00 : f32
    %246 = vector.broadcast %cst_211 : f32 to vector<1x128xf32>
    %247 = arith.maximumf %245, %246 : vector<1x128xf32>
    %c0_212 = arith.constant 0 : index
    %c0_213 = arith.constant 0 : index
    %248 = vector.load %arg10[%c0_212, %c0_213] : memref<128x128xf32, #tpu.memory_space<vmem>>, vector<128x128xf32>
    %cst_214 = arith.constant dense<0.000000e+00> : vector<1x128xf32>
    %249 = tpu.matmul %247, %248, %cst_214 {dimension_numbers = #tpu.dot_dimension_numbers<[1], [0], [0], [1], [0, 0, 1, 1], [], []>} : vector<1x128xf32>, vector<128x128xf32>, vector<1x128xf32> -> vector<1x128xf32>
    %c0_215 = arith.constant 0 : index
    %c0_216 = arith.constant 0 : index
    %250 = vector.load %arg11[%c0_215, %c0_216] : memref<1x128xf32, #tpu.memory_space<vmem>>, vector<1x128xf32>
    %251 = arith.addf %249, %250 : vector<1x128xf32>
    %252 = tpu.iota {dimensions = array<i32: 1>} : vector<1x128xi32>
    %c10_i32 = arith.constant 10 : i32
    %253 = vector.broadcast %c10_i32 : i32 to vector<1x128xi32>
    %254 = arith.cmpi slt, %252, %253 : vector<1x128xi32>
    %cst_217 = arith.constant 0xFF800000 : f32
    %255 = vector.broadcast %cst_217 : f32 to vector<1x128xf32>
    %256 = arith.select %254, %251, %255 : vector<1x128xi1>, vector<1x128xf32>
    %cst_218 = arith.constant dense<0xFF800000> : vector<1xf32>
    %257 = vector.multi_reduction <maximumf>, %256, %cst_218 [1] : vector<1x128xf32> to vector<1xf32>
    %258 = vector.shape_cast %257 : vector<1xf32> to vector<1x1xf32>
    %259 = vector.broadcast %258 : vector<1x1xf32> to vector<1x128xf32>
    %260 = arith.subf %256, %259 : vector<1x128xf32>
    %261 = math.exp %260 : vector<1x128xf32>
    %cst_219 = arith.constant dense<0.000000e+00> : vector<1xf32>
    %262 = vector.multi_reduction <add>, %261, %cst_219 [1] : vector<1x128xf32> to vector<1xf32>
    %263 = vector.shape_cast %262 : vector<1xf32> to vector<1x1xf32>
    %264 = vector.broadcast %263 : vector<1x1xf32> to vector<1x128xf32>
    %265 = arith.divf %261, %264 : vector<1x128xf32>
    %c0_220 = arith.constant 0 : index
    %c0_221 = arith.constant 0 : index
    %c0_222 = arith.constant 0 : index
    %266 = vector.load %arg12[%c0_220, %c0_221, %c0_222] : memref<1x1x128xf32, #tpu.memory_space<vmem>>, vector<1x1x128xf32>
    %267 = vector.shape_cast %266 : vector<1x1x128xf32> to vector<1x128xf32>
    %268 = vector.shape_cast %265 : vector<1x128xf32> to vector<1x1x128xf32>
    tpu.vector_store %arg12[%c0_220, %c0_221, %c0_222], %268 {strides = array<i32>} : memref<1x1x128xf32, #tpu.memory_space<vmem>>, vector<1x1x128xf32>,
    return
  }
  func.func @transform_0(%arg0: i32) -> (i32, i32, i32) {
    %c0_i32 = arith.constant 0 : i32
    %c0_i32_0 = arith.constant 0 : i32
    %c0_i32_1 = arith.constant 0 : i32
    return %arg0, %c0_i32, %c0_i32_0 : i32, i32, i32
  }
  func.func @transform_1(%arg0: i32) -> (i32, i32) {
    %c0_i32 = arith.constant 0 : i32
    %c0_i32_0 = arith.constant 0 : i32
    %c0_i32_1 = arith.constant 0 : i32
    return %c0_i32, %c0_i32_0 : i32, i32
  }
  func.func @transform_2(%arg0: i32) -> (i32, i32) {
    %c0_i32 = arith.constant 0 : i32
    %c0_i32_0 = arith.constant 0 : i32
    %c0_i32_1 = arith.constant 0 : i32
    return %c0_i32, %c0_i32_0 : i32, i32
  }
  func.func @transform_3(%arg0: i32) -> (i32, i32, i32) {
    %c0_i32 = arith.constant 0 : i32
    %c0_i32_0 = arith.constant 0 : i32
    %c0_i32_1 = arith.constant 0 : i32
    %c0_i32_2 = arith.constant 0 : i32
    return %c0_i32, %c0_i32_0, %c0_i32_1 : i32, i32, i32
  }
  func.func @transform_4(%arg0: i32) -> (i32, i32) {
    %c0_i32 = arith.constant 0 : i32
    %c0_i32_0 = arith.constant 0 : i32
    %c0_i32_1 = arith.constant 0 : i32
    return %c0_i32, %c0_i32_0 : i32, i32
  }
  func.func @transform_5(%arg0: i32) -> (i32, i32, i32) {
    %c0_i32 = arith.constant 0 : i32
    %c0_i32_0 = arith.constant 0 : i32
    %c0_i32_1 = arith.constant 0 : i32
    %c0_i32_2 = arith.constant 0 : i32
    return %c0_i32, %c0_i32_0, %c0_i32_1 : i32, i32, i32
  }
  func.func @transform_6(%arg0: i32) -> (i32, i32) {
    %c0_i32 = arith.constant 0 : i32
    %c0_i32_0 = arith.constant 0 : i32
    %c0_i32_1 = arith.constant 0 : i32
    return %c0_i32, %c0_i32_0 : i32, i32
  }
  func.func @transform_7(%arg0: i32) -> (i32, i32) {
    %c0_i32 = arith.constant 0 : i32
    %c0_i32_0 = arith.constant 0 : i32
    %c0_i32_1 = arith.constant 0 : i32
    return %c0_i32, %c0_i32_0 : i32, i32
  }
  func.func @transform_8(%arg0: i32) -> (i32, i32) {
    %c0_i32 = arith.constant 0 : i32
    %c0_i32_0 = arith.constant 0 : i32
    %c0_i32_1 = arith.constant 0 : i32
    return %c0_i32, %c0_i32_0 : i32, i32
  }
  func.func @transform_9(%arg0: i32) -> (i32, i32) {
    %c0_i32 = arith.constant 0 : i32
    %c0_i32_0 = arith.constant 0 : i32
    %c0_i32_1 = arith.constant 0 : i32
    return %c0_i32, %c0_i32_0 : i32, i32
  }
  func.func @transform_10(%arg0: i32) -> (i32, i32) {
    %c0_i32 = arith.constant 0 : i32
    %c0_i32_0 = arith.constant 0 : i32
    %c0_i32_1 = arith.constant 0 : i32
    return %c0_i32, %c0_i32_0 : i32, i32
  }
  func.func @transform_11(%arg0: i32) -> (i32, i32, i32) {
    %c0_i32 = arith.constant 0 : i32
    %c0_i32_0 = arith.constant 0 : i32
    %c0_i32_1 = arith.constant 0 : i32
    return %arg0, %c0_i32, %c0_i32_0 : i32, i32, i32
  }
}

</mosaic_0001>

<bundles_post_ra>
// kernel: cnn_forward.1
= control target key start
LH: loop header
LB: loop body
LE: loop exit
PB: predicated region body
PF: predicated region fallthrough
CT: control target
= control target key end

     0   :  { %s9155_s0 = inlined_call_operand.vmem [shape: f32[2,576,25], index: 0, kind: input, shape index: {}]   ;;  %s9156_s1 = inlined_call_operand.vmem [shape: f32[25,10], index: 1, kind: input, shape index: {}]   ;;  %s9157_s2 = inlined_call_operand.vmem [shape: f32[1,10], index: 2, kind: input, shape index: {}]   ;;  %s9158_s3 = inlined_call_operand.vmem [shape: f32[25,10,20], index: 3, kind: input, shape index: {}]   ;;  %s9159_s4 = inlined_call_operand.vmem [shape: f32[1,20], index: 4, kind: input, shape index: {}]   ;;  %s9160_s5 = inlined_call_operand.vmem [shape: f32[16,20,128], index: 5, kind: input, shape index: {}]   ;;  %s9161_s6 = inlined_call_operand.vmem [shape: f32[1,128], index: 6, kind: input, shape index: {}]   ;;  %s9162_s7 = inlined_call_operand.vmem [shape: f32[128,128], index: 7, kind: input, shape index: {}]   ;;  %s9163_s8 = inlined_call_operand.vmem [shape: f32[1,128], index: 8, kind: input, shape index: {}]   ;;  %s9164_s9 = inlined_call_operand.vmem [shape: f32[128,128], index: 9, kind: input, shape index: {}]   ;;  %s9165_s10 = inlined_call_operand.vmem [shape: f32[1,128], index: 10, kind: input, shape index: {}]   ;;  %s9166_s11 = inlined_call_operand.hbm [shape: f32[2,1,128], index: 11, kind: output, shape index: {}]  }
   0x1   :  { %9167 = sst [smem:[#allocation19_spill]] %s9155_s0 }
   0x2   :  { %16 = vsyncpa [#allocation5], 0 }
   0x3   :  { %18 = vsyncpa [#allocation5 + $0x1], 0  ;;  %s6842_s17 = smov 0   ;;  %s6844_s18 = smov 0  }
   0x4   :  { %s6846_s19 = smov 0   ;;  %s6848_s20 = smov 0  }
   0x5 LB: > { %s6863_s21 = sadd.s32 4294967295, %s6779_s20   ;;  %s5986_s22 = sadd.s32 4294967294, %s6779_s20   ;;  %s6779_s20 = sphi %s6848_s20, %s9206_s20   ;;  %s6775_s19 = sphi %s6846_s19, %s9205_s19   ;;  %s6771_s18 = sphi %s6844_s18, %s9204_s18   ;;  %s6767_s17 = sphi %s6842_s17, %s9203_s17  }
   0x6   : > { %s6867_s23 = sadd.s32 1, %s6779_s20   ;;  %s267_s24 = sadd.s32 1, %s6775_s19 }
   0x7   : > { %s264_s25 = ssub.s32 %s6779_s20, %s6867_s23  ;;  %p277_p0 = scmp.ne.s32.totalorder %s6775_s19, %s6771_s18 }
   0x8   : > { %p265_p1 = scmp.eq.s32.totalorder %s264_s25, 0  ;;  %p278_p2 = scmp.eq.s32.totalorder %s6863_s21, 1 }
   0x9   : > { %p283_p3 = scmp.ne.s32.totalorder %s6771_s18, %s6767_s17  ;;  %p284_p4 = scmp.eq.s32.totalorder %s5986_s22, 1 }
   0xa   : > { %s6878_s26 = scalar_select %p265_p1, %s6775_s19, %s267_s24  }
   0xb   : > { %p6880_p5 = por %p278_p2, %p277_p0  ;;  %p6884_p6 = por %p284_p4, %p283_p3 }
   0xc   : > { %p5989_p7 = scmp.ge.s32.totalorder %s6779_s20, 1  ;;  %p340_p8 = scmp.lt.s32.totalorder %s6779_s20, 3 }
   0xe   : > { %p341_p9 = pnand %p5989_p7, %p340_p8 }
  0x10   : > { %344 = sbr.rel (%p341_p9) target bundleno = 2529 (0x9e1), region = 64 }
  0x15   : > { %v459_v0 = vld [vmem:[%s9156_s1 + $0x18] sm:$0x1]  ;;  %vm681_vm0 = vcmask 1040384   ;;  %v458_v1 = vld [vmem:[%s9156_s1 + $0x10] sm:$0xff]  ;;  %p379_p10 = scmp.lt.s32.totalorder %s6863_s21, 1  ;;  %v457_v2 = vld [vmem:[%s9156_s1 + $0x8] sm:$0xff] }
  0x16   : > { %5991 = vmatpush.msk.msra.mxu0 %vm681_vm0, %v459_v0  ;;  %v456_v3 = vld [vmem:[%s9156_s1] sm:$0xff]  ;;  %vm464_vm1 = vcmask 203776   ;;  %s9170_s0 = sld [smem:[#allocation19_spill]]  ;;  %vm1148_vm2 = vcmask 1041408   ;;  %vm1044_vm3 = vcmask 80896   ;;  %vm5267_vm4 = vcmask 162816  }
  0x17   : > { %s380_s16 = scalar_select %p379_p10, %s6863_s21, 1  ;;  %vm5323_vm5 = vcmask 1043456  }
  0x18   : > { %698 = vmatpush.msra.mxu0 %v458_v1  ;;  %s377_s13 = sand.u32 1, %s6771_s18   ;;  %s6737_s15 = scalar_lea.hbm %s9166_s11, 2 }
  0x19   : > { %s6670_s25 = smul.u32 576, %s380_s16  ;;  %s5927_s16 = scalar_lea.hbm %s9166_s11, %s6863_s21 }
  0x1a   : > { %699 = vmatpush.msra.mxu0 %v457_v2  ;;  %s378_s22 = scalar_lea.vmem [#allocation4], %s377_s13  ;;  %s5919_s29 = scalar_lea.sflag [#allocation5], %s377_s13 }
  0x1b   : > { %s5929_s24 = sshll.u32 %s378_s22, 4  ;;  %s5930_s24 = int_to_ptr.vmem [resolvable:$true] %s5929_s24 }
  0x1c   : > { %s6908_s12 = scalar_lea.vmem %s9170_s0, %s6670_s25  ;;  %700 = vmatpush.msra.mxu0 %v456_v3  ;;  %s5931_s25 = sshll.u32 %s5927_s16, 4  ;;  %s5932_s25 = int_to_ptr.hbm [resolvable:$true] %s5931_s25 }
  0x1d   : > { %v384_v4 = vld [vmem:[%s6908_s12] sm:$0xff]  ;;  %v385_v5 = vld [vmem:[%s6908_s12 + $0x8] sm:$0xff]  ;;  %v386_v6 = vld [vmem:[%s6908_s12 + $0x10] sm:$0xff]  ;;  %s6731_s30 = sshra.s32 %s5932_s25, 4  ;;  %s6732_s30 = int_to_ptr.hbm [resolvable:$true] %s6731_s30 }
  0x1e   : > { %5992 = vmatmul.msk.f32.vlgmr.msra.gmra.mxu0 %vm464_vm1, %v384_v4  ;;  %v387_v7 = vld [vmem:[%s6908_s12 + $0x18] sm:$0xff]  ;;  %v388_v8 = vld [vmem:[%s6908_s12 + $0x20] sm:$0xff]  ;;  %v389_v9 = vld [vmem:[%s6908_s12 + $0x28] sm:$0xff]  ;;  %p6738_p0 = scmp.lt.s32.totalorder %s6732_s30, %s9166_s11 }
  0x1f   : > { %v390_v10 = vld [vmem:[%s6908_s12 + $0x30] sm:$0xff]  ;;  %v391_v11 = vld [vmem:[%s6908_s12 + $0x38] sm:$0xff]  ;;  %v392_v12 = vld [vmem:[%s6908_s12 + $0x40] sm:$0xff] }
  0x20   : > { %v393_v13 = vld [vmem:[%s6908_s12 + $0x48] sm:$0xff]  ;;  %v394_v14 = vld [vmem:[%s6908_s12 + $0x50] sm:$0xff]  ;;  %v395_v15 = vld [vmem:[%s6908_s12 + $0x58] sm:$0xff] }
  0x21   : > { %v396_v16 = vld [vmem:[%s6908_s12 + $0x60] sm:$0xff]  ;;  %v397_v17 = vld [vmem:[%s6908_s12 + $0x68] sm:$0xff]  ;;  %v398_v18 = vld [vmem:[%s6908_s12 + $0x70] sm:$0xff] }
  0x22   : > { %v399_v19 = vld [vmem:[%s6908_s12 + $0x78] sm:$0xff]  ;;  %v400_v21 = vld [vmem:[%s6908_s12 + $0x80] sm:$0xff]  ;;  %v401_v23 = vld [vmem:[%s6908_s12 + $0x88] sm:$0xff] }
  0x23   : > { %v402_v25 = vld [vmem:[%s6908_s12 + $0x90] sm:$0xff]  ;;  %v403_v27 = vld [vmem:[%s6908_s12 + $0x98] sm:$0xff]  ;;  %v404_v29 = vld [vmem:[%s6908_s12 + $0xa0] sm:$0xff] }
  0x24   : > { %v405_v31 = vld [vmem:[%s6908_s12 + $0xa8] sm:$0xff]  ;;  %v406_v33 = vld [vmem:[%s6908_s12 + $0xb0] sm:$0xff]  ;;  %v407_v35 = vld [vmem:[%s6908_s12 + $0xb8] sm:$0xff] }
  0x25   : > { %v408_v37 = vld [vmem:[%s6908_s12 + $0xc0] sm:$0xff]  ;;  %v409_v39 = vld [vmem:[%s6908_s12 + $0xc8] sm:$0xff]  ;;  %v410_v41 = vld [vmem:[%s6908_s12 + $0xd0] sm:$0xff] }
  0x26   : > { %5993 = vmatmul.msk.f32.gmra.mxu0 %vm464_vm1, %v385_v5  ;;  %v411_v43 = vld [vmem:[%s6908_s12 + $0xd8] sm:$0xff]  ;;  %v412_v45 = vld [vmem:[%s6908_s12 + $0xe0] sm:$0xff]  ;;  %v413_v47 = vld [vmem:[%s6908_s12 + $0xe8] sm:$0xff] }
  0x27   : > { %v414_v49 = vld [vmem:[%s6908_s12 + $0xf0] sm:$0xff]  ;;  %v415_v51 = vld [vmem:[%s6908_s12 + $0xf8] sm:$0xff]  ;;  %v416_v53 = vld [vmem:[%s6908_s12 + $0x100] sm:$0xff] }
  0x28   : > { %v417_v55 = vld [vmem:[%s6908_s12 + $0x108] sm:$0xff]  ;;  %v418_v57 = vld [vmem:[%s6908_s12 + $0x110] sm:$0xff]  ;;  %v419_v59 = vld [vmem:[%s6908_s12 + $0x118] sm:$0xff] }
  0x29   : > { %v420_v61 = vld [vmem:[%s6908_s12 + $0x120] sm:$0xff]  ;;  %v421_v63 = vld [vmem:[%s6908_s12 + $0x128] sm:$0xff]  ;;  %v422_v1 = vld [vmem:[%s6908_s12 + $0x130] sm:$0xff] }
  0x2a   : > { %v423_v3 = vld [vmem:[%s6908_s12 + $0x138] sm:$0xff]  ;;  %v424_v5 = vld [vmem:[%s6908_s12 + $0x140] sm:$0xff] }
  0x2e   : > { %5994 = vmatmul.msk.f32.gmra.mxu0 %vm464_vm1, %v386_v6 }
  0x36   : > { %5995 = vmatmul.msk.f32.gmra.mxu0 %vm464_vm1, %v387_v7  ;;  %v425_v7 = vld [vmem:[%s6908_s12 + $0x148] sm:$0xff] }
  0x3e   : > { %5996 = vmatmul.msk.f32.gmra.mxu0 %vm464_vm1, %v388_v8 }
  0x46   : > { %5997 = vmatmul.msk.f32.gmra.mxu0 %vm464_vm1, %v389_v9  ;;  %v426_v9 = vld [vmem:[%s6908_s12 + $0x150] sm:$0xff] }
  0x4e   : > { %5998 = vmatmul.msk.f32.gmra.mxu0 %vm464_vm1, %v390_v10 }
  0x56   : > { %5999 = vmatmul.msk.f32.gmra.mxu0 %vm464_vm1, %v391_v11  ;;  %v427_v11 = vld [vmem:[%s6908_s12 + $0x158] sm:$0xff] }
  0x5e   : > { %6000 = vmatmul.msk.f32.gmra.mxu0 %vm464_vm1, %v392_v12 }
  0x66   : > { %6001 = vmatmul.msk.f32.gmra.mxu0 %vm464_vm1, %v393_v13  ;;  %v428_v13 = vld [vmem:[%s6908_s12 + $0x160] sm:$0xff] }
  0x6e   : > { %6002 = vmatmul.msk.f32.gmra.mxu0 %vm464_vm1, %v394_v14 }
  0x76   : > { %6003 = vmatmul.msk.f32.gmra.mxu0 %vm464_vm1, %v395_v15  ;;  %v429_v15 = vld [vmem:[%s6908_s12 + $0x168] sm:$0xff] }
  0x7e   : > { %6004 = vmatmul.msk.f32.gmra.mxu0 %vm464_vm1, %v396_v16 }
  0x86   : > { %6005 = vmatmul.msk.f32.gmra.mxu0 %vm464_vm1, %v397_v17  ;;  %v430_v17 = vld [vmem:[%s6908_s12 + $0x170] sm:$0xff] }
  0x8e   : > { %6006 = vmatmul.msk.f32.gmra.mxu0 %vm464_vm1, %v398_v18 }
  0x96   : > { %6007 = vmatmul.msk.f32.gmra.mxu0 %vm464_vm1, %v399_v19  ;;  %v431_v19 = vld [vmem:[%s6908_s12 + $0x178] sm:$0xff] }
  0x9b   : > { %v6942_v20 = vpop.f32.mrf.mxu0 }
  0x9e   : > { %6008 = vmatmul.msk.f32.gmra.mxu0 %vm464_vm1, %v400_v21 }
  0xa3   : > { %v6946_v22 = vpop.f32.mrf.mxu0 }
  0xa6   : > { %6009 = vmatmul.msk.f32.gmra.mxu0 %vm464_vm1, %v401_v23  ;;  %v432_v23 = vld [vmem:[%s6908_s12 + $0x180] sm:$0xff] }
  0xab   : > { %v6950_v24 = vpop.f32.mrf.mxu0 }
  0xae   : > { %6010 = vmatmul.msk.f32.gmra.mxu0 %vm464_vm1, %v402_v25 }
  0xb3   : > { %v6954_v26 = vpop.f32.mrf.mxu0 }
  0xb6   : > { %6011 = vmatmul.msk.f32.gmra.mxu0 %vm464_vm1, %v403_v27  ;;  %v433_v27 = vld [vmem:[%s6908_s12 + $0x188] sm:$0xff] }
  0xbb   : > { %v6958_v28 = vpop.f32.mrf.mxu0 }
  0xbe   : > { %6012 = vmatmul.msk.f32.gmra.mxu0 %vm464_vm1, %v404_v29 }
  0xc3   : > { %v6962_v30 = vpop.f32.mrf.mxu0 }
  0xc6   : > { %6013 = vmatmul.msk.f32.gmra.mxu0 %vm464_vm1, %v405_v31  ;;  %v434_v31 = vld [vmem:[%s6908_s12 + $0x190] sm:$0xff] }
  0xcb   : > { %v6966_v32 = vpop.f32.mrf.mxu0 }
  0xce   : > { %6014 = vmatmul.msk.f32.gmra.mxu0 %vm464_vm1, %v406_v33 }
  0xd3   : > { %v6970_v34 = vpop.f32.mrf.mxu0 }
  0xd6   : > { %6015 = vmatmul.msk.f32.gmra.mxu0 %vm464_vm1, %v407_v35  ;;  %v435_v35 = vld [vmem:[%s6908_s12 + $0x198] sm:$0xff] }
  0xdb   : > { %v6974_v36 = vpop.f32.mrf.mxu0 }
  0xde   : > { %6016 = vmatmul.msk.f32.gmra.mxu0 %vm464_vm1, %v408_v37 }
  0xe3   : > { %v6978_v38 = vpop.f32.mrf.mxu0 }
  0xe6   : > { %6017 = vmatmul.msk.f32.gmra.mxu0 %vm464_vm1, %v409_v39  ;;  %v436_v39 = vld [vmem:[%s6908_s12 + $0x1a0] sm:$0xff] }
  0xeb   : > { %v6982_v40 = vpop.f32.mrf.mxu0 }
  0xee   : > { %6018 = vmatmul.msk.f32.gmra.mxu0 %vm464_vm1, %v410_v41 }
  0xf3   : > { %v6986_v42 = vpop.f32.mrf.mxu0 }
  0xf6   : > { %6019 = vmatmul.msk.f32.gmra.mxu0 %vm464_vm1, %v411_v43  ;;  %v437_v43 = vld [vmem:[%s6908_s12 + $0x1a8] sm:$0xff] }
  0xfb   : > { %v6990_v44 = vpop.f32.mrf.mxu0 }
  0xfe   : > { %6020 = vmatmul.msk.f32.gmra.mxu0 %vm464_vm1, %v412_v45 }
 0x103   : > { %v6994_v46 = vpop.f32.mrf.mxu0 }
 0x106   : > { %6021 = vmatmul.msk.f32.gmra.mxu0 %vm464_vm1, %v413_v47  ;;  %v438_v47 = vld [vmem:[%s6908_s12 + $0x1b0] sm:$0xff] }
 0x10b   : > { %v6998_v48 = vpop.f32.mrf.mxu0 }
 0x10e   : > { %6022 = vmatmul.msk.f32.gmra.mxu0 %vm464_vm1, %v414_v49 }
 0x113   : > { %v7002_v50 = vpop.f32.mrf.mxu0 }
 0x116   : > { %6023 = vmatmul.msk.f32.gmra.mxu0 %vm464_vm1, %v415_v51  ;;  %v439_v51 = vld [vmem:[%s6908_s12 + $0x1b8] sm:$0xff] }
 0x11b   : > { %v7006_v52 = vpop.f32.mrf.mxu0 }
 0x11e   : > { %6024 = vmatmul.msk.f32.gmra.mxu0 %vm464_vm1, %v416_v53 }
 0x123   : > { %v7010_v54 = vpop.f32.mrf.mxu0 }
 0x124   : > { %9171 = vst [vmem:[#allocation7_spill] sm:$0xff] %v7010_v54 }
 0x126   : > { %6025 = vmatmul.msk.f32.gmra.mxu0 %vm464_vm1, %v417_v55  ;;  %v440_v55 = vld [vmem:[%s6908_s12 + $0x1c0] sm:$0xff] }
 0x12b   : > { %v7014_v56 = vpop.f32.mrf.mxu0 }
 0x12e   : > { %6026 = vmatmul.msk.f32.gmra.mxu0 %vm464_vm1, %v418_v57 }
 0x133   : > { %v7018_v58 = vpop.f32.mrf.mxu0 }
 0x136   : > { %6027 = vmatmul.msk.f32.gmra.mxu0 %vm464_vm1, %v419_v59  ;;  %v441_v59 = vld [vmem:[%s6908_s12 + $0x1c8] sm:$0xff] }
 0x13b   : > { %v7022_v60 = vpop.f32.mrf.mxu0 }
 0x13e   : > { %6028 = vmatmul.msk.f32.gmra.mxu0 %vm464_vm1, %v420_v61 }
 0x143   : > { %v7026_v62 = vpop.f32.mrf.mxu0 }
 0x146   : > { %6029 = vmatmul.msk.f32.gmra.mxu0 %vm464_vm1, %v421_v63  ;;  %v442_v63 = vld [vmem:[%s6908_s12 + $0x1d0] sm:$0xff] }
 0x14b   : > { %v7030_v0 = vpop.f32.mrf.mxu0 }
 0x14e   : > { %6030 = vmatmul.msk.f32.gmra.mxu0 %vm464_vm1, %v422_v1 }
 0x153   : > { %v7034_v2 = vpop.f32.mrf.mxu0 }
 0x156   : > { %6031 = vmatmul.msk.f32.gmra.mxu0 %vm464_vm1, %v423_v3  ;;  %v443_v3 = vld [vmem:[%s6908_s12 + $0x1d8] sm:$0xff] }
 0x15b   : > { %v7038_v4 = vpop.f32.mrf.mxu0 }
 0x15e   : > { %6032 = vmatmul.msk.f32.gmra.mxu0 %vm464_vm1, %v424_v5 }
 0x163   : > { %v7042_v6 = vpop.f32.mrf.mxu0 }
 0x166   : > { %6033 = vmatmul.msk.f32.gmra.mxu0 %vm464_vm1, %v425_v7  ;;  %v444_v7 = vld [vmem:[%s6908_s12 + $0x1e0] sm:$0xff] }
 0x16b   : > { %v7046_v8 = vpop.f32.mrf.mxu0 }
 0x16e   : > { %6034 = vmatmul.msk.f32.gmra.mxu0 %vm464_vm1, %v426_v9 }
 0x173   : > { %v7050_v10 = vpop.f32.mrf.mxu0 }
 0x176   : > { %6035 = vmatmul.msk.f32.gmra.mxu0 %vm464_vm1, %v427_v11  ;;  %v445_v11 = vld [vmem:[%s6908_s12 + $0x1e8] sm:$0xff] }
 0x17b   : > { %v7054_v12 = vpop.f32.mrf.mxu0 }
 0x17e   : > { %6036 = vmatmul.msk.f32.gmra.mxu0 %vm464_vm1, %v428_v13 }
 0x183   : > { %v7058_v14 = vpop.f32.mrf.mxu0 }
 0x186   : > { %6037 = vmatmul.msk.f32.gmra.mxu0 %vm464_vm1, %v429_v15  ;;  %v446_v15 = vld [vmem:[%s6908_s12 + $0x1f0] sm:$0xff] }
 0x18b   : > { %v7062_v16 = vpop.f32.mrf.mxu0 }
 0x18e   : > { %6038 = vmatmul.msk.f32.gmra.mxu0 %vm464_vm1, %v430_v17 }
 0x193   : > { %v7066_v18 = vpop.f32.mrf.mxu0 }
 0x196   : > { %6039 = vmatmul.msk.f32.gmra.mxu0 %vm464_vm1, %v431_v19  ;;  %v447_v19 = vld [vmem:[%s6908_s12 + $0x1f8] sm:$0xff] }
 0x19b   : > { %v7070_v21 = vpop.f32.mrf.mxu0 }
 0x19e   : > { %6040 = vmatmul.msk.f32.gmra.mxu0 %vm464_vm1, %v432_v23 }
 0x1a3   : > { %v7074_v25 = vpop.f32.mrf.mxu0 }
 0x1a6   : > { %6041 = vmatmul.msk.f32.gmra.mxu0 %vm464_vm1, %v433_v27  ;;  %v448_v27 = vld [vmem:[%s6908_s12 + $0x200] sm:$0xff] }
 0x1ab   : > { %v7078_v29 = vpop.f32.mrf.mxu0 }
 0x1ae   : > { %6042 = vmatmul.msk.f32.gmra.mxu0 %vm464_vm1, %v434_v31 }
 0x1b3   : > { %v7082_v33 = vpop.f32.mrf.mxu0 }
 0x1b4   : > { %9172 = vst [vmem:[#allocation8_spill] sm:$0xff] %v7082_v33 }
 0x1b6   : > { %6043 = vmatmul.msk.f32.gmra.mxu0 %vm464_vm1, %v435_v35  ;;  %v449_v35 = vld [vmem:[%s6908_s12 + $0x208] sm:$0xff] }
 0x1bb   : > { %v7086_v37 = vpop.f32.mrf.mxu0 }
 0x1be   : > { %6044 = vmatmul.msk.f32.gmra.mxu0 %vm464_vm1, %v436_v39 }
 0x1c3   : > { %v7090_v41 = vpop.f32.mrf.mxu0 }
 0x1c6   : > { %6045 = vmatmul.msk.f32.gmra.mxu0 %vm464_vm1, %v437_v43  ;;  %v450_v43 = vld [vmem:[%s6908_s12 + $0x210] sm:$0xff] }
 0x1cb   : > { %v7094_v45 = vpop.f32.mrf.mxu0 }
 0x1ce   : > { %6046 = vmatmul.msk.f32.gmra.mxu0 %vm464_vm1, %v438_v47 }
 0x1d3   : > { %v7098_v49 = vpop.f32.mrf.mxu0 }
 0x1d6   : > { %6047 = vmatmul.msk.f32.gmra.mxu0 %vm464_vm1, %v439_v51  ;;  %v451_v51 = vld [vmem:[%s6908_s12 + $0x218] sm:$0xff] }
 0x1db   : > { %v7102_v53 = vpop.f32.mrf.mxu0 }
 0x1de   : > { %6048 = vmatmul.msk.f32.gmra.mxu0 %vm464_vm1, %v440_v55  ;;  %v1093_v55 = vld [vmem:[%s9158_s3 + $0x8] sm:$0x3] }
 0x1df   : > { %6064 = vmatpush.msk.msra.mxu1 %vm1148_vm2, %v1093_v55  ;;  %6666 = vmatpush.msk.msra.mxu2 %vm1148_vm2, %v1093_v55 }
 0x1e0   : > { %6667 = vmatpush.msk.msra.mxu3 %vm1148_vm2, %v1093_v55 }
 0x1e3   : > { %v7106_v57 = vpop.f32.mrf.mxu0 }
 0x1e6   : > { %6049 = vmatmul.msk.f32.gmra.mxu0 %vm464_vm1, %v441_v59  ;;  %v1092_v59 = vld [vmem:[%s9158_s3] sm:$0xff] }
 0x1e7   : > { %1167 = vmatpush.msra.mxu1 %v1092_v59  ;;  %6668 = vmatpush.msra.mxu2 %v1092_v59 }
 0x1e8   : > { %6669 = vmatpush.msra.mxu3 %v1092_v59 }
 0x1eb   : > { %v7110_v61 = vpop.f32.mrf.mxu0 }
 0x1ee   : > { %6050 = vmatmul.msk.f32.gmra.mxu0 %vm464_vm1, %v442_v63 }
 0x1f3   : > { %v7114_v1 = vpop.f32.mrf.mxu0 }
 0x1f6   : > { %6051 = vmatmul.msk.f32.gmra.mxu0 %vm464_vm1, %v443_v3  ;;  %v452_v3 = vld [vmem:[%s6908_s12 + $0x220] sm:$0xff] }
 0x1fb   : > { %v7118_v5 = vpop.f32.mrf.mxu0 }
 0x1fe   : > { %6052 = vmatmul.msk.f32.gmra.mxu0 %vm464_vm1, %v444_v7 }
 0x203   : > { %v7122_v9 = vpop.f32.mrf.mxu0 }
 0x206   : > { %6053 = vmatmul.msk.f32.gmra.mxu0 %vm464_vm1, %v445_v11  ;;  %v453_v11 = vld [vmem:[%s6908_s12 + $0x228] sm:$0xff] }
 0x20b   : > { %v7126_v13 = vpop.f32.mrf.mxu0 }
 0x20e   : > { %6054 = vmatmul.msk.f32.gmra.mxu0 %vm464_vm1, %v446_v15  ;;  %v7169_v15 = vld [vmem:[%s9157_s2] ss:$0 sm:$0xff] }
 0x213   : > { %v7130_v17 = vpop.f32.mrf.mxu0 }
 0x216   : > { %6055 = vmatmul.msk.f32.gmra.mxu0 %vm464_vm1, %v447_v19  ;;  %v757_v19 = vadd.f32 %v7169_v15, %v7014_v56  ;;  %v760_v56 = vadd.f32 %v7169_v15, %v7018_v58 }
 0x218   : > { %v936_v55 = vmax.f32 %v757_v19, 0.0 }
 0x21b   : > { %v7134_v23 = vpop.f32.mrf.mxu0 }
 0x21e   : > { %6056 = vmatmul.msk.f32.gmra.mxu0 %vm464_vm1, %v448_v27  ;;  %v703_v27 = vadd.f32 %v7169_v15, %v6942_v20  ;;  %v706_v20 = vadd.f32 %v7169_v15, %v6946_v22  ;;  %v763_v22 = vadd.f32 %v7169_v15, %v7022_v60 }
 0x223   : > { %v7138_v31 = vpop.f32.mrf.mxu0 }
 0x226   : > { %6057 = vmatmul.msk.f32.gmra.mxu0 %vm464_vm1, %v449_v35  ;;  %v811_v35 = vadd.f32 %v7169_v15, %v7086_v37  ;;  %v814_v37 = vadd.f32 %v7169_v15, %v7090_v41  ;;  %v817_v41 = vadd.f32 %v7169_v15, %v7094_v45  ;;  %v6378_v45 = vld [vmem:[%s9158_s3 + $0xf8] sm:$0x3] }
 0x227   : > { %6379 = vmatpush.msk.msrb.mxu0 %vm1148_vm2, %v6378_v45 }
 0x22b   : > { %v7142_v39 = vpop.f32.mrf.mxu0 }
 0x22e   : > { %6058 = vmatmul.msk.f32.gmra.mxu0 %vm464_vm1, %v450_v43 }
 0x233   : > { %v7146_v47 = vpop.f32.mrf.mxu0 }
 0x236   : > { %6059 = vmatmul.msk.f32.gmra.mxu0 %vm464_vm1, %v451_v51  ;;  %v454_v51 = vld [vmem:[%s6908_s12 + $0x230] sm:$0xff] }
 0x23b   : > { %v7159_v63 = vpop.f32.mrf.mxu0 }
 0x23c   : > { %9173 = vst [vmem:[#allocation9_spill] sm:$0xff] %v7159_v63 }
 0x23e   : > { %6060 = vmatmul.msk.f32.gmra.mxu0 %vm464_vm1, %v452_v3  ;;  %v918_v3 = vmax.f32 %v703_v27, 0.0  ;;  %v937_v27 = vmax.f32 %v760_v56, 0.0 }
 0x243   : > { %v7163_v7 = vpop.f32.mrf.mxu0 }
 0x244   : > { %9174 = vst [vmem:[#allocation10_spill] sm:$0xff] %v7163_v7  ;;  %v954_v7 = vmax.f32 %v811_v35, 0.0 }
 0x246   : > { %6061 = vmatmul.msk.f32.gmra.mxu0 %vm464_vm1, %v453_v11  ;;  %v990_v11 = vmax.f32 %v918_v3, %v936_v55  ;;  %v955_v55 = vmax.f32 %v814_v37, 0.0  ;;  %v956_v37 = vmax.f32 %v817_v41, 0.0 }
 0x24b   : > { %v864_v43 = vpop.f32.mrf.mxu0 }
 0x24c   : > { %v865_v59 = vadd.f32 %v7169_v15, %v864_v43  ;;  %v455_v43 = vld [vmem:[%s6908_s12 + $0x238] sm:$0xff]  ;;  %s6733_s12 = scalar_lea.hbm %s6732_s30, 1 }
 0x24d   : > { %p6734_p11 = scmp.ne.s32.totalorder %s6732_s30, %s6733_s12  ;;  %p6739_p1 = scmp.lt.s32.totalorder %s6737_s15, %s6733_s12 }
 0x24e   : > { %v972_v54 = vmax.f32 %v865_v59, 0.0  ;;  %6062 = vmatmul.msk.f32.gmra.mxu0 %vm464_vm1, %v454_v51  ;;  %v919_v51 = vmax.f32 %v706_v20, 0.0 }
 0x24f   : > { %p6735_p12 = pnand %p6734_p11, %p6880_p5  ;;  %p6740_p2 = por %p6739_p1, %p6738_p0 }
 0x250   : > { %v1008_v33 = vmax.f32 %v954_v7, %v972_v54  ;;  %v991_v54 = vmax.f32 %v919_v51, %v937_v27  ;;  %v712_v27 = vadd.f32 %v7169_v15, %v6954_v26 }
 0x251   : > { %p6736_p13 = pneg %p6735_p12 }
 0x252   : > { %v1026_v19 = vmax.f32 %v990_v11, %v1008_v33  ;;  %v709_v33 = vadd.f32 %v7169_v15, %v6950_v24  ;;  %v766_v24 = vadd.f32 %v7169_v15, %v7026_v62 }
 0x253   : > { %v867_v63 = vpop.f32.mrf.mxu0  ;;  %p6741_p3 = pnand %p6740_p2, %p6736_p13 }
 0x254   : > { %1045 = vst.msk [vmem:[#allocation2] sm:$0xff] %vm1044_vm3, %v1026_v19  ;;  %v868_v35 = vadd.f32 %v7169_v15, %v867_v63  ;;  %v938_v63 = vmax.f32 %v763_v22, 0.0  ;;  %v920_v20 = vmax.f32 %v709_v33, 0.0 }
 0x256   : > { %v973_v59 = vmax.f32 %v868_v35, 0.0  ;;  %6063 = vmatmul.msk.f32.gmra.mxu0 %vm464_vm1, %v455_v43  ;;  %v992_v19 = vmax.f32 %v920_v20, %v938_v63  ;;  %v820_v35 = vadd.f32 %v7169_v15, %v7098_v49  ;;  %v769_v49 = vadd.f32 %v7169_v15, %v7030_v0 }
 0x258   : > { %v1009_v58 = vmax.f32 %v955_v55, %v973_v59  ;;  %v6377_v55 = vld [vmem:[%s9158_s3 + $0xf0] sm:$0xff]  ;;  %v957_v26 = vmax.f32 %v820_v35, 0.0 }
 0x259   : > { %3672 = vmatpush.msrb.mxu0 %v6377_v55 }
 0x25a   : > { %v1027_v7 = vmax.f32 %v991_v54, %v1009_v58  ;;  %v939_v54 = vmax.f32 %v766_v24, 0.0  ;;  %v921_v58 = vmax.f32 %v712_v27, 0.0  ;;  %v826_v27 = vadd.f32 %v7169_v15, %v7106_v57 }
 0x25b   : > { %v870_v3 = vpop.f32.mrf.mxu0  ;;  %v1074_v11 = vld [vmem:[#allocation2] sm:$0xff]  ;;  %v721_v57 = vadd.f32 %v7169_v15, %v6966_v32  ;;  %v778_v32 = vadd.f32 %v7169_v15, %v7042_v6 }
 0x25c   : > { %1046 = vst.msk [vmem:[#allocation2 + $0x8] sm:$0xff] %vm1044_vm3, %v1027_v7  ;;  %v871_v56 = vadd.f32 %v7169_v15, %v870_v3  ;;  %6065 = vmatmul.msk.f32.vlgmr.msra.gmra.mxu1 %vm1044_vm3, %v1074_v11  ;;  %v993_v41 = vmax.f32 %v921_v58, %v939_v54  ;;  %v715_v3 = vadd.f32 %v7169_v15, %v6958_v28 }
 0x25d   : > { %v823_v11 = vadd.f32 %v7169_v15, %v7102_v53  ;;  %v772_v28 = vadd.f32 %v7169_v15, %v7034_v2  ;;  %v718_v53 = vadd.f32 %v7169_v15, %v6962_v30  ;;  %v775_v30 = vadd.f32 %v7169_v15, %v7038_v4 }
 0x25e   : > { %v974_v60 = vmax.f32 %v871_v56, 0.0 }
 0x25f   : > { %v958_v24 = vmax.f32 %v823_v11, 0.0  ;;  %v923_v54 = vmax.f32 %v718_v53, 0.0 }
 0x260   : > { %v1010_v43 = vmax.f32 %v956_v37, %v974_v60  ;;  %v940_v37 = vmax.f32 %v769_v49, 0.0 }
 0x262   : > { %v1028_v51 = vmax.f32 %v992_v19, %v1010_v43  ;;  %v922_v19 = vmax.f32 %v715_v3, 0.0  ;;  %v942_v3 = vmax.f32 %v775_v30, 0.0 }
 0x263   : > { %v873_v59 = vpop.f32.mrf.mxu0  ;;  %v1075_v62 = vld [vmem:[#allocation2 + $0x8] sm:$0xff] }
 0x264   : > { %1047 = vst.msk [vmem:[#allocation2 + $0x10] sm:$0xff] %vm1044_vm3, %v1028_v51  ;;  %v874_v22 = vadd.f32 %v7169_v15, %v873_v59  ;;  %6066 = vmatmul.msk.f32.gmra.mxu1 %vm1044_vm3, %v1075_v62  ;;  %v994_v43 = vmax.f32 %v922_v19, %v940_v37  ;;  %v941_v59 = vmax.f32 %v772_v28, 0.0  ;;  %v943_v28 = vmax.f32 %v778_v32, 0.0 }
 0x266   : > { %v975_v33 = vmax.f32 %v874_v22, 0.0  ;;  %v959_v22 = vmax.f32 %v826_v27, 0.0  ;;  %v995_v58 = vmax.f32 %v923_v54, %v941_v59  ;;  %v835_v59 = vadd.f32 %v7169_v15, %v7118_v5 }
 0x268   : > { %v1011_v7 = vmax.f32 %v957_v26, %v975_v33  ;;  %v829_v33 = vadd.f32 %v7169_v15, %v7110_v61  ;;  %v724_v61 = vadd.f32 %v7169_v15, %v6970_v34  ;;  %v6126_v34 = vld [vmem:[%s9158_s3 + $0x38] sm:$0x3] }
 0x269   : > { %6127 = vmatpush.msk.msrb.mxu1 %vm1148_vm2, %v6126_v34 }
 0x26a   : > { %v1029_v63 = vmax.f32 %v993_v41, %v1011_v7  ;;  %v925_v6 = vmax.f32 %v724_v61, 0.0 }
 0x26b   : > { %v876_v56 = vpop.f32.mrf.mxu0  ;;  %v1076_v20 = vld [vmem:[#allocation2 + $0x10] sm:$0xff] }
 0x26c   : > { %1048 = vst.msk [vmem:[#allocation2 + $0x18] sm:$0xff] %vm1044_vm3, %v1029_v63  ;;  %v877_v60 = vadd.f32 %v7169_v15, %v876_v56  ;;  %6067 = vmatmul.msk.f32.gmra.mxu1 %vm1044_vm3, %v1076_v20  ;;  %v924_v63 = vmax.f32 %v721_v57, 0.0  ;;  %v960_v56 = vmax.f32 %v829_v33, 0.0  ;;  %v997_v27 = vmax.f32 %v925_v6, %v943_v28 }
 0x26d   : > { %v784_v57 = vadd.f32 %v7169_v15, %v7050_v10 }
 0x26e   : > { %v976_v0 = vmax.f32 %v877_v60, 0.0  ;;  %v996_v20 = vmax.f32 %v924_v63, %v942_v3  ;;  %v832_v60 = vadd.f32 %v7169_v15, %v7114_v1  ;;  %v6125_v3 = vld [vmem:[%s9158_s3 + $0x30] sm:$0xff] }
 0x26f   : > { %1668 = vmatpush.msrb.mxu1 %v6125_v3 }
 0x270   : > { %v1012_v45 = vmax.f32 %v958_v24, %v976_v0  ;;  %v961_v1 = vmax.f32 %v832_v60, 0.0  ;;  %v733_v60 = vadd.f32 %v7169_v15, %v6982_v40 }
 0x272   : > { %v1030_v35 = vmax.f32 %v994_v43, %v1012_v45  ;;  %v928_v40 = vmax.f32 %v733_v60, 0.0 }
 0x273   : > { %v879_v51 = vpop.f32.mrf.mxu0  ;;  %v1077_v55 = vld [vmem:[#allocation2 + $0x18] sm:$0xff] }
 0x274   : > { %1049 = vst.msk [vmem:[#allocation2 + $0x20] sm:$0xff] %vm1044_vm3, %v1030_v35  ;;  %v880_v62 = vadd.f32 %v7169_v15, %v879_v51  ;;  %6068 = vmatmul.msk.f32.gmra.mxu1 %vm1044_vm3, %v1077_v55  ;;  %v781_v35 = vadd.f32 %v7169_v15, %v7046_v8  ;;  %v727_v55 = vadd.f32 %v7169_v15, %v6974_v36  ;;  %v962_v8 = vmax.f32 %v835_v59, 0.0 }
 0x276   : > { %v977_v2 = vmax.f32 %v880_v62, 0.0  ;;  %v926_v36 = vmax.f32 %v727_v55, 0.0  ;;  %v844_v55 = vadd.f32 %v7169_v15, %v7130_v17 }
 0x278   : > { %v1013_v26 = vmax.f32 %v959_v22, %v977_v2  ;;  %v965_v17 = vmax.f32 %v844_v55, 0.0 }
 0x27a   : > { %v1031_v41 = vmax.f32 %v995_v58, %v1013_v26  ;;  %v944_v58 = vmax.f32 %v781_v35, 0.0 }
 0x27b   : > { %v882_v49 = vpop.f32.mrf.mxu0  ;;  %v1078_v7 = vld [vmem:[#allocation2 + $0x20] sm:$0xff] }
 0x27c   : > { %1050 = vst.msk [vmem:[#allocation2 + $0x28] sm:$0xff] %vm1044_vm3, %v1031_v41  ;;  %v883_v11 = vadd.f32 %v7169_v15, %v882_v49  ;;  %6069 = vmatmul.msk.f32.gmra.mxu1 %vm1044_vm3, %v1078_v7  ;;  %v998_v26 = vmax.f32 %v926_v36, %v944_v58  ;;  %v730_v41 = vadd.f32 %v7169_v15, %v6978_v38 }
 0x27d   : > { %v838_v49 = vadd.f32 %v7169_v15, %v7122_v9 }
 0x27e   : > { %v978_v4 = vmax.f32 %v883_v11, 0.0  ;;  %v927_v38 = vmax.f32 %v730_v41, 0.0  ;;  %v847_v41 = vadd.f32 %v7169_v15, %v7134_v23 }
 0x27f   : > { %v963_v9 = vmax.f32 %v838_v49, 0.0 }
 0x280   : > { %v1014_v37 = vmax.f32 %v960_v56, %v978_v4  ;;  %v945_v4 = vmax.f32 %v784_v57, 0.0 }
 0x282   : > { %v1032_v19 = vmax.f32 %v996_v20, %v1014_v37  ;;  %v999_v32 = vmax.f32 %v927_v38, %v945_v4  ;;  %v787_v37 = vadd.f32 %v7169_v15, %v7054_v12 }
 0x283   : > { %v885_v24 = vpop.f32.mrf.mxu0  ;;  %v7249_v0 = vld [vmem:[#allocation2 + $0x28] sm:$0xff] }
 0x284   : > { %v7251_v43 = vld [vmem:[#allocation2 + $0x24] sm:$0xff]  ;;  %1051 = vst.msk [vmem:[#allocation2 + $0x30] sm:$0xff] %vm1044_vm3, %v1032_v19  ;;  %v886_v45 = vadd.f32 %v7169_v15, %v885_v24  ;;  %6070 = vmatmul.msk.f32.gmra.mxu1 %vm1044_vm3, %v7249_v0  ;;  %v841_v19 = vadd.f32 %v7169_v15, %v7126_v13  ;;  %v946_v6 = vmax.f32 %v787_v37, 0.0  ;;  %v850_v37 = vadd.f32 %v7169_v15, %v7138_v31 }
 0x285   : > { %6380 = vmatmul.msk.f32.vlgmr.msrb.gmra.mxu0 %vm1044_vm3, %v7251_v43 }
 0x286   : > { %v979_v53 = vmax.f32 %v886_v45, 0.0  ;;  %v964_v12 = vmax.f32 %v841_v19, 0.0 }
 0x288   : > { %v1015_v51 = vmax.f32 %v961_v1, %v979_v53  ;;  %v1000_v53 = vmax.f32 %v928_v40, %v946_v6 }
 0x28a   : > { %v1033_v62 = vmax.f32 %v997_v27, %v1015_v51  ;;  %v790_v27 = vadd.f32 %v7169_v15, %v7058_v14  ;;  %v736_v51 = vadd.f32 %v7169_v15, %v6986_v42  ;;  %v6084_v42 = vld [vmem:[%s9158_s3 + $0x18] sm:$0x3] }
 0x28b   : > { %v888_v54 = vpop.f32.mrf.mxu0  ;;  %v7269_v22 = vld [vmem:[#allocation2 + $0x30] sm:$0xff]  ;;  %6085 = vmatpush.msk.msrb.mxu2 %vm1148_vm2, %v6084_v42 }
 0x28c   : > { %v7271_v2 = vld [vmem:[#allocation2 + $0x2c] sm:$0xff]  ;;  %1052 = vst.msk [vmem:[#allocation2 + $0x38] sm:$0xff] %vm1044_vm3, %v1033_v62  ;;  %v889_v30 = vadd.f32 %v7169_v15, %v888_v54  ;;  %6071 = vmatmul.msk.f32.gmra.mxu1 %vm1044_vm3, %v7269_v22  ;;  %v929_v14 = vmax.f32 %v736_v51, 0.0 }
 0x28d   : > { %6381 = vmatmul.msk.f32.gmra.mxu0 %vm1044_vm3, %v7271_v2  ;;  %v1576_v51 = vld [vmem:[#allocation2 + $0xb] sm:$0xff] }
 0x28e   : > { %v980_v5 = vmax.f32 %v889_v30, 0.0  ;;  %v947_v30 = vmax.f32 %v790_v27, 0.0  ;;  %v853_v27 = vadd.f32 %v7169_v15, %v7142_v39  ;;  %v6781_v39 = vmov 0.0  }
 0x28f   : > { %1063 = vst.msk [vmem:[#allocation2 + $0x90] sm:$0xff] %vm1044_vm3, %v6781_v39 }
 0x290   : > { %v1016_v33 = vmax.f32 %v962_v8, %v980_v5  ;;  %v1001_v5 = vmax.f32 %v929_v14, %v947_v30  ;;  %v6083_v30 = vld [vmem:[%s9158_s3 + $0x10] sm:$0xff]  ;;  %v968_v14 = vmax.f32 %v853_v27, 0.0  ;;  %1064 = vst.msk [vmem:[#allocation2 + $0x98] sm:$0xff] %vm1044_vm3, %v6781_v39 }
 0x291   : > { %1334 = vmatpush.msrb.mxu2 %v6083_v30  ;;  %1065 = vst.msk [vmem:[#allocation2 + $0xa0] sm:$0xff] %vm1044_vm3, %v6781_v39  ;;  %v9178_v30 = vld [vmem:[#allocation10_spill] sm:$0xff] }
 0x292   : > { %v1034_v7 = vmax.f32 %v998_v26, %v1016_v33  ;;  %v793_v26 = vadd.f32 %v7169_v15, %v7062_v16  ;;  %v739_v33 = vadd.f32 %v7169_v15, %v6990_v44  ;;  %v966_v16 = vmax.f32 %v847_v41, 0.0  ;;  %1066 = vst.msk [vmem:[#allocation2 + $0xa8] sm:$0xff] %vm1044_vm3, %v6781_v39 }
 0x293   : > { %v891_v11 = vpop.f32.mrf.mxu0  ;;  %v7288_v63 = vld [vmem:[#allocation2 + $0x38] sm:$0xff]  ;;  %1067 = vst.msk [vmem:[#allocation2 + $0xb0] sm:$0xff] %vm1044_vm3, %v6781_v39 }
 0x294   : > { %v7290_v56 = vld [vmem:[#allocation2 + $0x34] sm:$0xff]  ;;  %1053 = vst.msk [vmem:[#allocation2 + $0x40] sm:$0xff] %vm1044_vm3, %v1034_v7  ;;  %v892_v10 = vadd.f32 %v7169_v15, %v891_v11  ;;  %6072 = vmatmul.msk.f32.gmra.mxu1 %vm1044_vm3, %v7288_v63  ;;  %v948_v4 = vmax.f32 %v793_v26, 0.0  ;;  %v930_v44 = vmax.f32 %v739_v33, 0.0  ;;  %v856_v33 = vadd.f32 %v7169_v15, %v7146_v47 }
 0x295   : > { %6382 = vmatmul.msk.f32.gmra.mxu0 %vm1044_vm3, %v7290_v56  ;;  %1068 = vst.msk [vmem:[#allocation2 + $0xb8] sm:$0xff] %vm1044_vm3, %v6781_v39 }
 0x296   : > { %v981_v20 = vmax.f32 %v892_v10, 0.0  ;;  %v1002_v38 = vmax.f32 %v930_v44, %v948_v4  ;;  %v1577_v4 = vld [vmem:[#allocation2 + $0x13] sm:$0xff]  ;;  %1069 = vst.msk [vmem:[#allocation2 + $0xc0] sm:$0xff] %vm1044_vm3, %v6781_v39 }
 0x298   : > { %v1017_v61 = vmax.f32 %v963_v9, %v981_v20  ;;  %v796_v9 = vadd.f32 %v7169_v15, %v7066_v18  ;;  %v967_v18 = vmax.f32 %v850_v37, 0.0  ;;  %v9175_v37 = vld [vmem:[#allocation9_spill] sm:$0xff] }
 0x29a   : > { %v1035_v24 = vmax.f32 %v999_v32, %v1017_v61  ;;  %v742_v32 = vadd.f32 %v7169_v15, %v6994_v46  ;;  %v949_v6 = vmax.f32 %v796_v9, 0.0  ;;  %v805_v9 = vadd.f32 %v7169_v15, %v7078_v29 }
 0x29b   : > { %v894_v28 = vpop.f32.mrf.mxu0  ;;  %v7304_v45 = vld [vmem:[#allocation2 + $0x40] sm:$0xff] }
 0x29c   : > { %v7306_v34 = vld [vmem:[#allocation2 + $0x3c] sm:$0xff]  ;;  %1054 = vst.msk [vmem:[#allocation2 + $0x48] sm:$0xff] %vm1044_vm3, %v1035_v24  ;;  %v895_v1 = vadd.f32 %v7169_v15, %v894_v28  ;;  %6073 = vmatmul.msk.f32.gmra.mxu1 %vm1044_vm3, %v7304_v45  ;;  %v931_v46 = vmax.f32 %v742_v32, 0.0  ;;  %v751_v32 = vadd.f32 %v7169_v15, %v7006_v52  ;;  %v952_v29 = vmax.f32 %v805_v9, 0.0  ;;  %v1242_v9 = vld [vmem:[#allocation2 + $0x9] sm:$0xff] }
 0x29d   : > { %6383 = vmatmul.msk.f32.gmra.mxu0 %vm1044_vm3, %v7306_v34  ;;  %v1575_v24 = vld [vmem:[#allocation2 + $0x3] sm:$0xff] }
 0x29e   : > { %v982_v13 = vmax.f32 %v895_v1, 0.0  ;;  %v1003_v40 = vmax.f32 %v931_v46, %v949_v6  ;;  %v1578_v46 = vld [vmem:[#allocation2 + $0x1b] sm:$0xff] }
 0x2a0   : > { %v1018_v35 = vmax.f32 %v964_v12, %v982_v13  ;;  %v799_v12 = vadd.f32 %v7169_v15, %v7070_v21 }
 0x2a2   : > { %v1036_v59 = vmax.f32 %v1000_v53, %v1018_v35  ;;  %v745_v53 = vadd.f32 %v7169_v15, %v6998_v48  ;;  %v6105_v48 = vld [vmem:[%s9158_s3 + $0x28] sm:$0x3] }
 0x2a3   : > { %v897_v62 = vpop.f32.mrf.mxu0  ;;  %v7320_v54 = vld [vmem:[#allocation2 + $0x48] sm:$0xff]  ;;  %6106 = vmatpush.msk.msrb.mxu3 %vm1148_vm2, %v6105_v48 }
 0x2a4   : > { %v7322_v58 = vld [vmem:[#allocation2 + $0x44] sm:$0xff]  ;;  %1055 = vst.msk [vmem:[#allocation2 + $0x50] sm:$0xff] %vm1044_vm3, %v1036_v59  ;;  %v898_v36 = vadd.f32 %v7169_v15, %v897_v62  ;;  %6074 = vmatmul.msk.f32.gmra.mxu1 %vm1044_vm3, %v7320_v54  ;;  %v932_v42 = vmax.f32 %v745_v53, 0.0  ;;  %v9176_v53 = vld [vmem:[#allocation8_spill] sm:$0xff] }
 0x2a5   : > { %6384 = vmatmul.msk.f32.gmra.mxu0 %vm1044_vm3, %v7322_v58  ;;  %v808_v27 = vadd.f32 %v7169_v15, %v9176_v53 }
 0x2a6   : > { %v983_v8 = vmax.f32 %v898_v36, 0.0  ;;  %v950_v36 = vmax.f32 %v799_v12, 0.0 }
 0x2a8   : > { %v1019_v57 = vmax.f32 %v965_v17, %v983_v8  ;;  %v1004_v8 = vmax.f32 %v932_v42, %v950_v36  ;;  %v862_v36 = vadd.f32 %v7169_v15, %v9178_v30  ;;  %v1579_v42 = vld [vmem:[#allocation2 + $0x23] sm:$0xff] }
 0x2aa   : > { %v1037_v49 = vmax.f32 %v1001_v5, %v1019_v57  ;;  %v802_v5 = vadd.f32 %v7169_v15, %v7074_v25  ;;  %v748_v57 = vadd.f32 %v7169_v15, %v7002_v50  ;;  %v6104_v50 = vld [vmem:[%s9158_s3 + $0x20] sm:$0xff] }
 0x2ab   : > { %v900_v7 = vpop.f32.mrf.mxu0  ;;  %v7340_v3 = vld [vmem:[#allocation2 + $0x50] sm:$0xff]  ;;  %1501 = vmatpush.msrb.mxu3 %v6104_v50 }
 0x2ac   : > { %v7342_v11 = vld [vmem:[#allocation2 + $0x4c] sm:$0xff]  ;;  %1056 = vst.msk [vmem:[#allocation2 + $0x58] sm:$0xff] %vm1044_vm3, %v1037_v49  ;;  %v901_v10 = vadd.f32 %v7169_v15, %v900_v7  ;;  %6075 = vmatmul.msk.f32.gmra.mxu1 %vm1044_vm3, %v7340_v3  ;;  %v951_v25 = vmax.f32 %v802_v5, 0.0  ;;  %v933_v47 = vmax.f32 %v748_v57, 0.0  ;;  %v6189_v5 = vld [vmem:[%s9158_s3 + $0x68] sm:$0x3] }
 0x2ad   : > { %6385 = vmatmul.msk.f32.gmra.mxu0 %vm1044_vm3, %v7342_v11  ;;  %v971_v57 = vmax.f32 %v862_v36, 0.0  ;;  %6190 = vmatpush.msk.msra.mxu1 %vm1148_vm2, %v6189_v5  ;;  %v3595_v36 = vld [vmem:[#allocation2 + $0xa4] sm:$0xff]  ;;  %v1247_v5 = vld [vmem:[#allocation2 + $0x31] sm:$0xff] }
 0x2ae   : > { %v984_v23 = vmax.f32 %v901_v10, 0.0 }
 0x2b0   : > { %v1020_v20 = vmax.f32 %v966_v16, %v984_v23  ;;  %v969_v16 = vmax.f32 %v856_v33, 0.0 }
 0x2b2   : > { %v1038_v61 = vmax.f32 %v1002_v38, %v1020_v20  ;;  %v1005_v38 = vmax.f32 %v933_v47, %v951_v25  ;;  %v1241_v25 = vld [vmem:[#allocation2 + $0x1] sm:$0xff]  ;;  %v6168_v47 = vld [vmem:[%s9158_s3 + $0x58] sm:$0x3] }
 0x2b3   : > { %v903_v60 = vpop.f32.mrf.mxu0  ;;  %v7356_v19 = vld [vmem:[#allocation2 + $0x58] sm:$0xff] }
 0x2b4   : > { %v7358_v28 = vld [vmem:[#allocation2 + $0x54] sm:$0xff]  ;;  %1057 = vst.msk [vmem:[#allocation2 + $0x60] sm:$0xff] %vm1044_vm3, %v1038_v61  ;;  %v904_v1 = vadd.f32 %v7169_v15, %v903_v60  ;;  %6076 = vmatmul.msk.f32.vlgmr.msra.gmra.mxu2 %vm1044_vm3, %v7356_v19  ;;  %6128 = vmatmul.msk.f32.vlgmr.msrb.gmra.mxu1 %vm1044_vm3, %v1575_v24  ;;  %v859_v61 = vadd.f32 %v7169_v15, %v9175_v37  ;;  %v6147_v24 = vld [vmem:[%s9158_s3 + $0x48] sm:$0x3] }
 0x2b5   : > { %6386 = vmatmul.msk.f32.gmra.mxu0 %vm1044_vm3, %v7358_v28  ;;  %6148 = vmatpush.msk.msra.mxu2 %vm1148_vm2, %v6147_v24  ;;  %v7496_v24 = vld [vmem:[#allocation2 + $0x3b] sm:$0xff] }
 0x2b6   : > { %v985_v31 = vmax.f32 %v904_v1, 0.0 }
 0x2b8   : > { %v1021_v13 = vmax.f32 %v967_v18, %v985_v31  ;;  %v934_v31 = vmax.f32 %v751_v32, 0.0  ;;  %v7486_v32 = vld [vmem:[#allocation2 + $0x33] sm:$0xff] }
 0x2ba   : > { %v1039_v35 = vmax.f32 %v1003_v40, %v1021_v13  ;;  %v970_v40 = vmax.f32 %v859_v61, 0.0  ;;  %v1006_v13 = vmax.f32 %v934_v31, %v952_v29  ;;  %v1243_v61 = vld [vmem:[#allocation2 + $0x11] sm:$0xff]  ;;  %v1244_v31 = vld [vmem:[#allocation2 + $0x19] sm:$0xff] }
 0x2bb   : > { %v906_v55 = vpop.f32.mrf.mxu0  ;;  %v7373_v59 = vld [vmem:[#allocation2 + $0x60] sm:$0xff]  ;;  %v6462_v29 = vld [vmem:[%s9158_s3 + $0x138] sm:$0x3] }
 0x2bc   : > { %v7375_v62 = vld [vmem:[#allocation2 + $0x5c] sm:$0xff]  ;;  %1058 = vst.msk [vmem:[#allocation2 + $0x68] sm:$0xff] %vm1044_vm3, %v1039_v35  ;;  %v907_v21 = vadd.f32 %v7169_v15, %v906_v55  ;;  %6077 = vmatmul.msk.f32.gmra.mxu2 %vm1044_vm3, %v7373_v59  ;;  %6129 = vmatmul.msk.f32.gmra.mxu1 %vm1044_vm3, %v1576_v51  ;;  %v9177_v51 = vld [vmem:[#allocation7_spill] sm:$0xff] }
 0x2bd   : > { %6387 = vmatmul.msk.f32.gmra.mxu0 %vm1044_vm3, %v7375_v62  ;;  %v754_v55 = vadd.f32 %v7169_v15, %v9177_v51  ;;  %v1410_v51 = vld [vmem:[#allocation2 + $0x12] sm:$0xff] }
 0x2be   : > { %v986_v17 = vmax.f32 %v907_v21, 0.0  ;;  %6463 = vmatpush.msk.msra.mxu0 %vm1148_vm2, %v6462_v29 }
 0x2c0   : > { %v1022_v26 = vmax.f32 %v968_v14, %v986_v17  ;;  %v953_v17 = vmax.f32 %v808_v27, 0.0  ;;  %v3594_v27 = vld [vmem:[#allocation2 + $0x9c] sm:$0xff] }
 0x2c2   : > { %v1040_v41 = vmax.f32 %v1004_v8, %v1022_v26  ;;  %v935_v26 = vmax.f32 %v754_v55, 0.0  ;;  %v7527_v55 = vld [vmem:[#allocation2 + $0x4b] sm:$0xff] }
 0x2c3   : > { %v909_v49 = vpop.f32.mrf.mxu0  ;;  %v7403_v7 = vld [vmem:[#allocation2 + $0x68] sm:$0xff] }
 0x2c4   : > { %v7405_v10 = vld [vmem:[#allocation2 + $0x64] sm:$0xff]  ;;  %1059 = vst.msk [vmem:[#allocation2 + $0x70] sm:$0xff] %vm1044_vm3, %v1040_v41  ;;  %v910_v44 = vadd.f32 %v7169_v15, %v909_v49  ;;  %6078 = vmatmul.msk.f32.gmra.mxu2 %vm1044_vm3, %v7403_v7  ;;  %6130 = vmatmul.msk.f32.gmra.mxu1 %vm1044_vm3, %v1577_v4  ;;  %v1007_v41 = vmax.f32 %v935_v26, %v953_v17 }
 0x2c5   : > { %6388 = vmatmul.msk.f32.gmra.mxu0 %vm1044_vm3, %v7405_v10  ;;  %v1412_v26 = vld [vmem:[#allocation2 + $0x22] sm:$0xff] }
 0x2c6   : > { %v987_v23 = vmax.f32 %v910_v44, 0.0 }
 0x2c8   : > { %v1023_v20 = vmax.f32 %v969_v16, %v987_v23  ;;  %v1580_v16 = vld [vmem:[#allocation2 + $0x2b] sm:$0xff] }
 0x2ca   : > { %v1041_v60 = vmax.f32 %v1005_v38, %v1023_v20 }
 0x2cb   : > { %v912_v6 = vpop.f32.mrf.mxu0  ;;  %v7427_v1 = vld [vmem:[#allocation2 + $0x70] sm:$0xff] }
 0x2cc   : > { %v7429_v18 = vld [vmem:[#allocation2 + $0x6c] sm:$0xff]  ;;  %1060 = vst.msk [vmem:[#allocation2 + $0x78] sm:$0xff] %vm1044_vm3, %v1041_v60  ;;  %v913_v52 = vadd.f32 %v7169_v15, %v912_v6  ;;  %6079 = vmatmul.msk.f32.gmra.mxu2 %vm1044_vm3, %v7427_v1  ;;  %6131 = vmatmul.msk.f32.gmra.mxu1 %vm1044_vm3, %v1578_v46  ;;  %v1408_v60 = vld [vmem:[#allocation2 + $0x2] sm:$0xff] }
 0x2cd   : > { %6389 = vmatmul.msk.f32.gmra.mxu0 %vm1044_vm3, %v7429_v18  ;;  %v7572_v29 = vld [vmem:[#allocation2 + $0x6b] sm:$0xff] }
 0x2ce   : > { %v988_v12 = vmax.f32 %v913_v52, 0.0  ;;  %v7509_v52 = vld [vmem:[#allocation2 + $0x94] sm:$0xff] }
 0x2d0   : > { %v1024_v35 = vmax.f32 %v970_v40, %v988_v12  ;;  %v1409_v40 = vld [vmem:[#allocation2 + $0xa] sm:$0xff] }
 0x2d1   : > { %v6461_v12 = vld [vmem:[%s9158_s3 + $0x130] sm:$0xff] }
 0x2d2   : > { %v1042_v21 = vmax.f32 %v1006_v13, %v1024_v35  ;;  %v7517_v13 = vld [vmem:[#allocation2 + $0x43] sm:$0xff]  ;;  %4340 = vmatpush.msra.mxu0 %v6461_v12 }
 0x2d3   : > { %v915_v48 = vpop.f32.mrf.mxu0  ;;  %v7445_v39 = vld [vmem:[#allocation2 + $0x78] sm:$0xff]  ;;  %v1245_v35 = vld [vmem:[#allocation2 + $0x21] sm:$0xff]  ;;  %v1250_v12 = vld [vmem:[#allocation2 + $0x49] sm:$0xff] }
 0x2d4   : > { %v7447_v14 = vld [vmem:[#allocation2 + $0x74] sm:$0xff]  ;;  %1061 = vst.msk [vmem:[#allocation2 + $0x80] sm:$0xff] %vm1044_vm3, %v1042_v21  ;;  %v916_v8 = vadd.f32 %v7169_v15, %v915_v48  ;;  %6080 = vmatmul.msk.f32.gmra.mxu2 %vm1044_vm3, %v7445_v39  ;;  %6132 = vmatmul.msk.f32.gmra.mxu1 %vm1044_vm3, %v1579_v42  ;;  %v1246_v21 = vld [vmem:[#allocation2 + $0x29] sm:$0xff] }
 0x2d5   : > { %6390 = vmatmul.msk.f32.gmra.mxu0 %vm1044_vm3, %v7447_v14  ;;  %v1411_v48 = vld [vmem:[#allocation2 + $0x1a] sm:$0xff] }
 0x2d6   : > { %v989_v33 = vmax.f32 %v916_v8, 0.0  ;;  %v7536_v42 = vld [vmem:[#allocation2 + $0x53] sm:$0xff] }
 0x2d7   : > { %v3596_v8 = vld [vmem:[#allocation2 + $0xac] sm:$0xff] }
 0x2d8   : > { %v1025_v49 = vmax.f32 %v971_v57, %v989_v33  ;;  %v7545_v57 = vld [vmem:[#allocation2 + $0x5b] sm:$0xff] }
 0x2d9   : > { %v7460_v15 = vpop.f32.mrf.mxu1 }
 0x2da   : > { %v1043_v4 = vmax.f32 %v1007_v41, %v1025_v49  ;;  %v6146_v41 = vld [vmem:[%s9158_s3 + $0x40] sm:$0xff] }
 0x2db   : > { %v7462_v44 = vld [vmem:[#allocation2 + $0x80] sm:$0xff]  ;;  %1835 = vmatpush.msra.mxu2 %v6146_v41 }
 0x2dc   : > { %v7464_v50 = vld [vmem:[#allocation2 + $0x7c] sm:$0xff]  ;;  %1062 = vst.msk [vmem:[#allocation2 + $0x88] sm:$0xff] %vm1044_vm3, %v1043_v4  ;;  %6081 = vmatmul.msk.f32.vlgmr.msra.gmra.mxu3 %vm1044_vm3, %v7462_v44  ;;  %6086 = vmatmul.msk.f32.vlgmr.msrb.gmra.mxu2 %vm1044_vm3, %v1241_v25  ;;  %v1413_v4 = vld [vmem:[#allocation2 + $0x2a] sm:$0xff] }
 0x2dd   : > { %6133 = vmatmul.msk.f32.gmra.mxu1 %vm1044_vm3, %v1580_v16  ;;  %6391 = vmatmul.msk.f32.gmra.mxu0 %vm1044_vm3, %v7464_v50  ;;  %v1248_v49 = vld [vmem:[#allocation2 + $0x39] sm:$0xff]  ;;  %v7557_v25 = vld [vmem:[#allocation2 + $0x63] sm:$0xff] }
 0x2de   : > { %6169 = vmatpush.msk.msra.mxu3 %vm1148_vm2, %v6168_v47  ;;  %v6167_v47 = vld [vmem:[%s9158_s3 + $0x50] sm:$0xff] }
 0x2e0   : > { %2002 = vmatpush.msra.mxu3 %v6167_v47  ;;  %v1418_v47 = vld [vmem:[#allocation2 + $0x52] sm:$0xff] }
 0x2e1   : > { %v7477_v23 = vpop.f32.mrf.mxu1 }
 0x2e3   : > { %v7479_v38 = vld [vmem:[#allocation2 + $0x88] sm:$0xff] }
 0x2e4   : > { %v7481_v20 = vld [vmem:[#allocation2 + $0x84] sm:$0xff]  ;;  %6082 = vmatmul.msk.f32.gmra.mxu3 %vm1044_vm3, %v7479_v38  ;;  %6087 = vmatmul.msk.f32.gmra.mxu2 %vm1044_vm3, %v1242_v9  ;;  %v7498_v6 = vld [vmem:[#allocation2 + $0x8c] sm:$0xff] }
 0x2e5   : > { %6134 = vmatmul.msk.f32.gmra.mxu1 %vm1044_vm3, %v7486_v32  ;;  %6392 = vmatmul.msk.f32.gmra.mxu0 %vm1044_vm3, %v7481_v20  ;;  %v7611_v41 = vld [vmem:[#allocation2 + $0x83] sm:$0xff] }
 0x2e9   : > { %v7492_v37 = vpop.f32.mrf.mxu1 }
 0x2ec   : > { %6088 = vmatmul.msk.f32.gmra.mxu2 %vm1044_vm3, %v1243_v61  ;;  %6107 = vmatmul.msk.f32.vlgmr.msrb.gmra.mxu3 %vm1044_vm3, %v1408_v60  ;;  %v1249_v61 = vld [vmem:[#allocation2 + $0x41] sm:$0xff]  ;;  %v1414_v60 = vld [vmem:[#allocation2 + $0x32] sm:$0xff] }
 0x2ed   : > { %6135 = vmatmul.msk.f32.gmra.mxu1 %vm1044_vm3, %v7496_v24  ;;  %6393 = vmatmul.msk.f32.gmra.mxu0 %vm1044_vm3, %v7498_v6 }
 0x2f1   : > { %v7504_v46 = vpop.f32.mrf.mxu1 }
 0x2f4   : > { %6089 = vmatmul.msk.f32.gmra.mxu2 %vm1044_vm3, %v1244_v31  ;;  %6108 = vmatmul.msk.f32.gmra.mxu3 %vm1044_vm3, %v1409_v40 }
 0x2f5   : > { %6136 = vmatmul.msk.f32.gmra.mxu1 %vm1044_vm3, %v7517_v13  ;;  %6394 = vmatmul.msk.f32.gmra.mxu0 %vm1044_vm3, %v7509_v52 }
 0x2f9   : > { %v7523_v53 = vpop.f32.mrf.mxu1 }
 0x2fc   : > { %6090 = vmatmul.msk.f32.gmra.mxu2 %vm1044_vm3, %v1245_v35  ;;  %6109 = vmatmul.msk.f32.gmra.mxu3 %vm1044_vm3, %v1410_v51  ;;  %v7587_v35 = vld [vmem:[#allocation2 + $0x73] sm:$0xff] }
 0x2fd   : > { %6137 = vmatmul.msk.f32.gmra.mxu1 %vm1044_vm3, %v7527_v55  ;;  %6395 = vmatmul.msk.f32.gmra.mxu0 %vm1044_vm3, %v3594_v27  ;;  %v1415_v27 = vld [vmem:[#allocation2 + $0x3a] sm:$0xff] }
 0x301   : > { %v7532_v30 = vpop.f32.mrf.mxu1 }
 0x302   : > { %v7566_v16 = vpop.f32.mrf.mxu0 }
 0x303   : > { %9179 = vst [vmem:[#allocation9_spill] sm:$0xff] %v7566_v16 }
 0x304   : > { %6091 = vmatmul.msk.f32.gmra.mxu2 %vm1044_vm3, %v1246_v21  ;;  %6110 = vmatmul.msk.f32.gmra.mxu3 %vm1044_vm3, %v1411_v48  ;;  %v1416_v21 = vld [vmem:[#allocation2 + $0x42] sm:$0xff] }
 0x305   : > { %6138 = vmatmul.msk.f32.gmra.mxu1 %vm1044_vm3, %v7536_v42  ;;  %6396 = vmatmul.msk.f32.gmra.mxu0 %vm1044_vm3, %v3595_v36  ;;  %v1251_v36 = vld [vmem:[#allocation2 + $0x51] sm:$0xff]  ;;  %v7599_v48 = vld [vmem:[#allocation2 + $0x7b] sm:$0xff] }
 0x309   : > { %v7541_v17 = vpop.f32.mrf.mxu1 }
 0x30a   : > { %v7581_v31 = vpop.f32.mrf.mxu0 }
 0x30b   : > { %9180 = vst [vmem:[#allocation8_spill] sm:$0xff] %v7581_v31  ;;  %v1743_v31 = vld [vmem:[#allocation2 + $0xc] sm:$0xff] }
 0x30c   : > { %6092 = vmatmul.msk.f32.gmra.mxu2 %vm1044_vm3, %v1247_v5  ;;  %6111 = vmatmul.msk.f32.gmra.mxu3 %vm1044_vm3, %v1412_v26  ;;  %v1417_v5 = vld [vmem:[#allocation2 + $0x4a] sm:$0xff] }
 0x30d   : > { %6139 = vmatmul.msk.f32.gmra.mxu1 %vm1044_vm3, %v7545_v57  ;;  %6397 = vmatmul.msk.f32.gmra.mxu0 %vm1044_vm3, %v3596_v8 }
 0x311   : > { %v7550_v33 = vpop.f32.mrf.mxu1 }
 0x312   : > { %v7595_v51 = vpop.f32.mrf.mxu0 }
 0x313   : > { %9181 = vst [vmem:[#allocation7_spill] sm:$0xff] %v7595_v51 }
 0x314   : > { %6093 = vmatmul.msk.f32.gmra.mxu2 %vm1044_vm3, %v1248_v49  ;;  %6112 = vmatmul.msk.f32.gmra.mxu3 %vm1044_vm3, %v1413_v4  ;;  %v1253_v4 = vld [vmem:[#allocation2 + $0x61] sm:$0xff] }
 0x315   : > { %6140 = vmatmul.msk.f32.gmra.mxu1 %vm1044_vm3, %v7557_v25  ;;  %6464 = vmatmul.msk.f32.vlgmr.msra.gmra.mxu0 %vm1044_vm3, %v7249_v0  ;;  %v6188_v0 = vld [vmem:[%s9158_s3 + $0x60] sm:$0xff] }
 0x316   : > { %2169 = vmatpush.msra.mxu1 %v6188_v0 }
 0x319   : > { %v7568_v9 = vpop.f32.mrf.mxu1 }
 0x31a   : > { %v7607_v26 = vpop.f32.mrf.mxu0 }
 0x31b   : > { %9182 = vst [vmem:[#allocation10_spill] sm:$0xff] %v7607_v26 }
 0x31c   : > { %6094 = vmatmul.msk.f32.gmra.mxu2 %vm1044_vm3, %v1249_v61  ;;  %6113 = vmatmul.msk.f32.gmra.mxu3 %vm1044_vm3, %v1414_v60  ;;  %v7623_v61 = vld [vmem:[#allocation2 + $0x8b] sm:$0xff] }
 0x31d   : > { %6141 = vmatmul.msk.f32.gmra.mxu1 %vm1044_vm3, %v7572_v29  ;;  %6465 = vmatmul.msk.f32.gmra.mxu0 %vm1044_vm3, %v7269_v22 }
 0x321   : > { %v7583_v40 = vpop.f32.mrf.mxu1 }
 0x322   : > { %v7629_v60 = vpop.f32.mrf.mxu0 }
 0x323   : > { %9183 = vst [vmem:[#allocation11_spill] sm:$0xff] %v7629_v60 }
 0x324   : > { %6095 = vmatmul.msk.f32.gmra.mxu2 %vm1044_vm3, %v1250_v12  ;;  %6114 = vmatmul.msk.f32.gmra.mxu3 %vm1044_vm3, %v1415_v27  ;;  %v1254_v12 = vld [vmem:[#allocation2 + $0x69] sm:$0xff]  ;;  %v1419_v27 = vld [vmem:[#allocation2 + $0x5a] sm:$0xff] }
 0x325   : > { %6142 = vmatmul.msk.f32.gmra.mxu1 %vm1044_vm3, %v7587_v35  ;;  %6466 = vmatmul.msk.f32.gmra.mxu0 %vm1044_vm3, %v7288_v63  ;;  %v1252_v63 = vld [vmem:[#allocation2 + $0x59] sm:$0xff] }
 0x329   : > { %v7593_v22 = vpop.f32.mrf.mxu1 }
 0x32c   : > { %6096 = vmatmul.msk.f32.gmra.mxu2 %vm1044_vm3, %v1251_v36  ;;  %6115 = vmatmul.msk.f32.gmra.mxu3 %vm1044_vm3, %v1416_v21  ;;  %v2076_v36 = vld [vmem:[#allocation2 + $0xd] sm:$0xff] }
 0x32d   : > { %6143 = vmatmul.msk.f32.gmra.mxu1 %vm1044_vm3, %v7599_v48  ;;  %6467 = vmatmul.msk.f32.gmra.mxu0 %vm1044_vm3, %v7304_v45 }
 0x331   : > { %v7605_v8 = vpop.f32.mrf.mxu1 }
 0x334   : > { %6097 = vmatmul.msk.f32.gmra.mxu2 %vm1044_vm3, %v1252_v63  ;;  %6116 = vmatmul.msk.f32.gmra.mxu3 %vm1044_vm3, %v1417_v5  ;;  %v7638_v63 = vpop.f32.mrf.mxu0  ;;  %v1255_v5 = vld [vmem:[#allocation2 + $0x71] sm:$0xff] }
 0x335   : > { %6144 = vmatmul.msk.f32.gmra.mxu1 %vm1044_vm3, %v7611_v41  ;;  %6468 = vmatmul.msk.f32.gmra.mxu0 %vm1044_vm3, %v7320_v54  ;;  %9184 = vst [vmem:[#allocation12_spill] sm:$0xff] %v7638_v63 }
 0x337   : > { %v7617_v49 = vpop.f32.mrf.mxu2 }
 0x339   : > { %v7619_v45 = vpop.f32.mrf.mxu1 }
 0x33c   : > { %6098 = vmatmul.msk.f32.gmra.mxu2 %vm1044_vm3, %v1253_v4  ;;  %6117 = vmatmul.msk.f32.gmra.mxu3 %vm1044_vm3, %v1418_v47  ;;  %v1420_v4 = vld [vmem:[#allocation2 + $0x62] sm:$0xff]  ;;  %v2077_v47 = vld [vmem:[#allocation2 + $0x15] sm:$0xff] }
 0x33d   : > { %6145 = vmatmul.msk.f32.gmra.mxu1 %vm1044_vm3, %v7623_v61  ;;  %6469 = vmatmul.msk.f32.gmra.mxu0 %vm1044_vm3, %v7340_v3 }
 0x33f   : > { %v1205_v54 = vpop.f32.mrf.mxu2 }
 0x341   : > { %v7631_v0 = vpop.f32.mrf.mxu1 }
 0x344   : > { %6099 = vmatmul.msk.f32.gmra.mxu2 %vm1044_vm3, %v1254_v12  ;;  %6118 = vmatmul.msk.f32.gmra.mxu3 %vm1044_vm3, %v1419_v27  ;;  %v1256_v27 = vld [vmem:[#allocation2 + $0x79] sm:$0xff] }
 0x345   : > { %6191 = vmatmul.msk.f32.vlgmr.msra.gmra.mxu1 %vm1044_vm3, %v2076_v36  ;;  %6470 = vmatmul.msk.f32.gmra.mxu0 %vm1044_vm3, %v7356_v19  ;;  %v7649_v19 = vpop.f32.mrf.mxu0  ;;  %v1421_v36 = vld [vmem:[#allocation2 + $0x6a] sm:$0xff] }
 0x346   : > { %9185 = vst [vmem:[#allocation13_spill] sm:$0xff] %v7649_v19  ;;  %v1742_v19 = vld [vmem:[#allocation2 + $0x4] sm:$0xff] }
 0x347   : > { %v1208_v21 = vpop.f32.mrf.mxu2 }
 0x348   : > { %v2078_v21 = vld [vmem:[#allocation2 + $0x1d] sm:$0xff] }
 0x349   : > { %v7640_v3 = vpop.f32.mrf.mxu1 }
 0x34c   : > { %6100 = vmatmul.msk.f32.gmra.mxu2 %vm1044_vm3, %v1255_v5  ;;  %6119 = vmatmul.msk.f32.gmra.mxu3 %vm1044_vm3, %v1420_v4 }
 0x34d   : > { %6192 = vmatmul.msk.f32.gmra.mxu1 %vm1044_vm3, %v2077_v47  ;;  %6471 = vmatmul.msk.f32.gmra.mxu0 %vm1044_vm3, %v7373_v59  ;;  %v6210_v59 = vld [vmem:[%s9158_s3 + $0x78] sm:$0x3]  ;;  %v1257_v47 = vld [vmem:[#allocation2 + $0x81] sm:$0xff] }
 0x34e   : > { %6211 = vmatpush.msk.msrb.mxu2 %vm1148_vm2, %v6210_v59 }
 0x34f   : > { %v1211_v54 = vpop.f32.mrf.mxu2 }
 0x350   : > { %v1422_v54 = vld [vmem:[#allocation2 + $0x72] sm:$0xff] }
 0x351   : > { %v7647_v12 = vpop.f32.mrf.mxu1 }
 0x354   : > { %6101 = vmatmul.msk.f32.gmra.mxu2 %vm1044_vm3, %v1256_v27  ;;  %6120 = vmatmul.msk.f32.gmra.mxu3 %vm1044_vm3, %v1421_v36  ;;  %v7662_v27 = vpop.f32.mrf.mxu0  ;;  %v2079_v36 = vld [vmem:[#allocation2 + $0x25] sm:$0xff] }
 0x355   : > { %6193 = vmatmul.msk.f32.gmra.mxu1 %vm1044_vm3, %v2078_v21  ;;  %6472 = vmatmul.msk.f32.gmra.mxu0 %vm1044_vm3, %v7403_v7  ;;  %9186 = vst [vmem:[#allocation14_spill] sm:$0xff] %v7662_v27  ;;  %v6231_v7 = vld [vmem:[%s9158_s3 + $0x88] sm:$0x3] }
 0x356   : > { %6232 = vmatpush.msk.msrb.mxu3 %vm1148_vm2, %v6231_v7  ;;  %v1258_v27 = vld [vmem:[#allocation2 + $0x89] sm:$0xff] }
 0x357   : > { %v1214_v5 = vpop.f32.mrf.mxu2 }
 0x35a   : > { %v7656_v4 = vpop.f32.mrf.mxu1 }
 0x35c   : > { %6102 = vmatmul.msk.f32.gmra.mxu2 %vm1044_vm3, %v1257_v47  ;;  %6121 = vmatmul.msk.f32.gmra.mxu3 %vm1044_vm3, %v1422_v54  ;;  %v1423_v47 = vld [vmem:[#allocation2 + $0x7a] sm:$0xff]  ;;  %v2080_v54 = vld [vmem:[#allocation2 + $0x2d] sm:$0xff] }
 0x35d   : > { %6194 = vmatmul.msk.f32.gmra.mxu1 %vm1044_vm3, %v2079_v36  ;;  %6473 = vmatmul.msk.f32.gmra.mxu0 %vm1044_vm3, %v7427_v1  ;;  %v6252_v1 = vld [vmem:[%s9158_s3 + $0x98] sm:$0x3]  ;;  %v7683_v36 = vpop.f32.mrf.mxu0 }
 0x35e   : > { %9187 = vst [vmem:[#allocation15_spill] sm:$0xff] %v7683_v36  ;;  %6253 = vmatpush.msk.msrb.mxu1 %vm1148_vm2, %v6252_v1  ;;  %v2081_v36 = vld [vmem:[#allocation2 + $0x35] sm:$0xff] }
 0x35f   : > { %v1217_v21 = vpop.f32.mrf.mxu3  ;;  %v1336_v5 = vpop.f32.mrf.mxu2 }
 0x362   : > { %v7673_v59 = vpop.f32.mrf.mxu1 }
 0x364   : > { %6103 = vmatmul.msk.f32.gmra.mxu2 %vm1044_vm3, %v1258_v27  ;;  %6122 = vmatmul.msk.f32.gmra.mxu3 %vm1044_vm3, %v1423_v47  ;;  %v7689_v27 = vld [vmem:[%s9159_s4] ss:$0 sm:$0xff] }
 0x365   : > { %6195 = vmatmul.msk.f32.gmra.mxu1 %vm1044_vm3, %v2080_v54  ;;  %6474 = vmatmul.msk.f32.gmra.mxu0 %vm1044_vm3, %v7445_v39  ;;  %v1424_v54 = vld [vmem:[#allocation2 + $0x82] sm:$0xff]  ;;  %v1223_v39 = vadd.f32 %v7689_v27, %v7460_v15  ;;  %v7700_v60 = vpop.f32.mrf.mxu0 }
 0x366   : > { %9188 = vst [vmem:[#allocation16_spill] sm:$0xff] %v7700_v60 }
 0x367   : > { %v1220_v7 = vpop.f32.mrf.mxu3  ;;  %v1339_v21 = vpop.f32.mrf.mxu2  ;;  %v1390_v1 = vadd.f32 %v1336_v5, %v1223_v39 }
 0x36a   : > { %v7691_v47 = vpop.f32.mrf.mxu1 }
 0x36c   : > { %6123 = vmatmul.msk.f32.gmra.mxu3 %vm1044_vm3, %v1424_v54  ;;  %6149 = vmatmul.msk.f32.vlgmr.msra.gmra.mxu2 %vm1044_vm3, %v1742_v19  ;;  %v1425_v54 = vld [vmem:[#allocation2 + $0x8a] sm:$0xff]  ;;  %v1224_v19 = vadd.f32 %v7689_v27, %v7477_v23 }
 0x36d   : > { %6196 = vmatmul.msk.f32.gmra.mxu1 %vm1044_vm3, %v2081_v36  ;;  %6475 = vmatmul.msk.f32.gmra.mxu0 %vm1044_vm3, %v7462_v44  ;;  %v2082_v44 = vld [vmem:[#allocation2 + $0x3d] sm:$0xff] }
 0x36f   : > { %v1342_v7 = vpop.f32.mrf.mxu2  ;;  %v1503_v63 = vpop.f32.mrf.mxu3 }
 0x370   : > { %v1557_v26 = vadd.f32 %v1503_v63, %v1390_v1  ;;  %v1391_v63 = vadd.f32 %v1339_v21, %v1224_v19  ;;  %v7718_v1 = vld [vmem:[#allocation2 + $0x90] sm:$0xff] }
 0x372   : > { %v7702_v51 = vpop.f32.mrf.mxu1  ;;  %v7705_v15 = vadd.f32 %v7605_v8, %v1557_v26  ;;  %v7714_v26 = vpop.f32.mrf.mxu0 }
 0x373   : > { %9189 = vst [vmem:[#allocation17_spill] sm:$0xff] %v7714_v26  ;;  %v1745_v26 = vld [vmem:[#allocation2 + $0x1c] sm:$0xff] }
 0x374   : > { %6124 = vmatmul.msk.f32.gmra.mxu3 %vm1044_vm3, %v1425_v54  ;;  %6150 = vmatmul.msk.f32.gmra.mxu2 %vm1044_vm3, %v1743_v31  ;;  %v1744_v54 = vld [vmem:[#allocation2 + $0x14] sm:$0xff] }
 0x375   : > { %6197 = vmatmul.msk.f32.gmra.mxu1 %vm1044_vm3, %v2082_v44  ;;  %6476 = vmatmul.msk.f32.gmra.mxu0 %vm1044_vm3, %v7479_v38  ;;  %v1225_v44 = vadd.f32 %v7689_v27, %v7492_v37  ;;  %v2083_v38 = vld [vmem:[#allocation2 + $0x45] sm:$0xff]  ;;  %v6546_v37 = vld [vmem:[%s9158_s3 + $0x178] sm:$0x3] }
 0x376   : > { %6547 = vmatpush.msk.msrb.mxu0 %vm1148_vm2, %v6546_v37 }
 0x377   : > { %v1345_v5 = vpop.f32.mrf.mxu2  ;;  %v1506_v36 = vpop.f32.mrf.mxu3  ;;  %v1392_v21 = vadd.f32 %v1342_v7, %v1225_v44  ;;  %v6545_v7 = vld [vmem:[%s9158_s3 + $0x170] sm:$0xff]  ;;  %v1226_v44 = vadd.f32 %v7689_v27, %v7504_v46  ;;  %v4262_v46 = vld [vmem:[#allocation2 + $0xa0] sm:$0xff] }
 0x378   : > { %v1558_v8 = vadd.f32 %v1506_v36, %v1391_v63  ;;  %5008 = vmatpush.msrb.mxu0 %v6545_v7 }
 0x37a   : > { %v7716_v39 = vpop.f32.mrf.mxu1  ;;  %v7721_v23 = vadd.f32 %v7619_v45, %v1558_v8  ;;  %v7732_v8 = vld [vmem:[#allocation2 + $0x98] sm:$0xff] }
 0x37c   : > { %6151 = vmatmul.msk.f32.gmra.mxu2 %vm1044_vm3, %v1744_v54  ;;  %6170 = vmatmul.msk.f32.vlgmr.msra.gmra.mxu3 %vm1044_vm3, %v1743_v31 }
 0x37d   : > { %6198 = vmatmul.msk.f32.gmra.mxu1 %vm1044_vm3, %v2083_v38  ;;  %6477 = vmatmul.msk.f32.gmra.mxu0 %vm1044_vm3, %v7718_v1  ;;  %v7746_v38 = vpop.f32.mrf.mxu0 }
 0x37e   : > { %9190 = vst [vmem:[#allocation18_spill] sm:$0xff] %v7746_v38 }
 0x37f   : > { %v1348_v19 = vpop.f32.mrf.mxu2  ;;  %v1509_v63 = vpop.f32.mrf.mxu3 }
 0x380   : > { %v1559_v36 = vadd.f32 %v1509_v63, %v1392_v21  ;;  %v2084_v21 = vld [vmem:[#allocation2 + $0x4d] sm:$0xff] }
 0x382   : > { %v7730_v45 = vpop.f32.mrf.mxu1  ;;  %v7738_v31 = vadd.f32 %v7631_v0, %v1559_v36  ;;  %v1393_v0 = vadd.f32 %v1345_v5, %v1226_v44 }
 0x384   : > { %6152 = vmatmul.msk.f32.gmra.mxu2 %vm1044_vm3, %v1745_v26  ;;  %6171 = vmatmul.msk.f32.gmra.mxu3 %vm1044_vm3, %v1744_v54  ;;  %v1227_v54 = vadd.f32 %v7689_v27, %v7523_v53  ;;  %v1228_v53 = vadd.f32 %v7689_v27, %v7532_v30 }
 0x385   : > { %6199 = vmatmul.msk.f32.gmra.mxu1 %vm1044_vm3, %v2084_v21  ;;  %6478 = vmatmul.msk.f32.gmra.mxu0 %vm1044_vm3, %v7732_v8  ;;  %v2085_v21 = vld [vmem:[#allocation2 + $0x55] sm:$0xff]  ;;  %v3710_v5 = vpop.f32.mrf.mxu0 }
 0x386   : > { %v1394_v7 = vadd.f32 %v1348_v19, %v1227_v54 }
 0x387   : > { %v1351_v63 = vpop.f32.mrf.mxu2  ;;  %v1512_v36 = vpop.f32.mrf.mxu3 }
 0x388   : > { %v1560_v37 = vadd.f32 %v1512_v36, %v1393_v0  ;;  %v1395_v19 = vadd.f32 %v1351_v63, %v1228_v53 }
 0x38a   : > { %v7753_v60 = vpop.f32.mrf.mxu1  ;;  %v7756_v38 = vadd.f32 %v7640_v3, %v1560_v37  ;;  %v4263_v37 = vld [vmem:[#allocation2 + $0xa8] sm:$0xff] }
 0x38c   : > { %6153 = vmatmul.msk.f32.gmra.mxu2 %vm1044_vm3, %v7251_v43  ;;  %6172 = vmatmul.msk.f32.gmra.mxu3 %vm1044_vm3, %v1745_v26  ;;  %v2086_v26 = vld [vmem:[#allocation2 + $0x5d] sm:$0xff] }
 0x38d   : > { %6200 = vmatmul.msk.f32.gmra.mxu1 %vm1044_vm3, %v2085_v21  ;;  %6479 = vmatmul.msk.f32.gmra.mxu0 %vm1044_vm3, %v4262_v46  ;;  %v3713_v21 = vpop.f32.mrf.mxu0 }
 0x38f   : > { %v1354_v44 = vpop.f32.mrf.mxu2  ;;  %v1515_v0 = vpop.f32.mrf.mxu3 }
 0x390   : > { %v1561_v36 = vadd.f32 %v1515_v0, %v1394_v7  ;;  %v4264_v7 = vld [vmem:[#allocation2 + $0xb0] sm:$0xff]  ;;  %v1229_v0 = vadd.f32 %v7689_v27, %v7541_v17 }
 0x391   : > { %v6209_v17 = vld [vmem:[%s9158_s3 + $0x70] sm:$0xff] }
 0x392   : > { %v1706_v3 = vpop.f32.mrf.mxu1  ;;  %v7766_v16 = vadd.f32 %v7647_v12, %v1561_v36  ;;  %v1396_v63 = vadd.f32 %v1354_v44, %v1229_v0  ;;  %2336 = vmatpush.msrb.mxu2 %v6209_v17  ;;  %v2088_v44 = vld [vmem:[#allocation2 + $0x6d] sm:$0xff] }
 0x394   : > { %6154 = vmatmul.msk.f32.gmra.mxu2 %vm1044_vm3, %v7271_v2  ;;  %6173 = vmatmul.msk.f32.gmra.mxu3 %vm1044_vm3, %v7251_v43  ;;  %v2087_v43 = vld [vmem:[#allocation2 + $0x65] sm:$0xff] }
 0x395   : > { %6201 = vmatmul.msk.f32.gmra.mxu1 %vm1044_vm3, %v2086_v26  ;;  %6480 = vmatmul.msk.f32.gmra.mxu0 %vm1044_vm3, %v4263_v37 }
 0x397   : > { %v1357_v46 = vpop.f32.mrf.mxu2  ;;  %v1518_v54 = vpop.f32.mrf.mxu3 }
 0x398   : > { %v1562_v12 = vadd.f32 %v1518_v54, %v1395_v19 }
 0x39a   : > { %v1709_v5 = vpop.f32.mrf.mxu1  ;;  %v7777_v30 = vadd.f32 %v7656_v4, %v1562_v12  ;;  %v3716_v4 = vpop.f32.mrf.mxu0 }
 0x39c   : > { %6155 = vmatmul.msk.f32.gmra.mxu2 %vm1044_vm3, %v7290_v56  ;;  %6174 = vmatmul.msk.f32.gmra.mxu3 %vm1044_vm3, %v7271_v2  ;;  %v1230_v2 = vadd.f32 %v7689_v27, %v7550_v33 }
 0x39d   : > { %6202 = vmatmul.msk.f32.gmra.mxu1 %vm1044_vm3, %v2087_v43  ;;  %6481 = vmatmul.msk.f32.gmra.mxu0 %vm1044_vm3, %v4264_v7 }
 0x39e   : > { %v1397_v19 = vadd.f32 %v1357_v46, %v1230_v2 }
 0x39f   : > { %v1360_v36 = vpop.f32.mrf.mxu2  ;;  %v1521_v3 = vpop.f32.mrf.mxu3 }
 0x3a0   : > { %v1563_v37 = vadd.f32 %v1521_v3, %v1396_v63 }
 0x3a2   : > { %v1712_v53 = vpop.f32.mrf.mxu1  ;;  %v7791_v26 = vadd.f32 %v7673_v59, %v1563_v37  ;;  %v6230_v59 = vld [vmem:[%s9158_s3 + $0x80] sm:$0xff]  ;;  %v3719_v7 = vpop.f32.mrf.mxu0 }
 0x3a3   : > { %2503 = vmatpush.msrb.mxu3 %v6230_v59 }
 0x3a4   : > { %6156 = vmatmul.msk.f32.gmra.mxu2 %vm1044_vm3, %v7306_v34  ;;  %6175 = vmatmul.msk.f32.gmra.mxu3 %vm1044_vm3, %v7290_v56  ;;  %v1231_v56 = vadd.f32 %v7689_v27, %v7568_v9 }
 0x3a5   : > { %6203 = vmatmul.msk.f32.gmra.mxu1 %vm1044_vm3, %v2088_v44  ;;  %6548 = vmatmul.msk.f32.vlgmr.msrb.gmra.mxu0 %vm1044_vm3, %v7486_v32  ;;  %v2089_v32 = vld [vmem:[#allocation2 + $0x75] sm:$0xff] }
 0x3a6   : > { %v1398_v46 = vadd.f32 %v1360_v36, %v1231_v56  ;;  %v1234_v36 = vadd.f32 %v7689_v27, %v7617_v49 }
 0x3a7   : > { %v1363_v54 = vpop.f32.mrf.mxu2  ;;  %v1524_v33 = vpop.f32.mrf.mxu3 }
 0x3a8   : > { %v1564_v21 = vadd.f32 %v1524_v33, %v1397_v19 }
 0x3aa   : > { %v1715_v12 = vpop.f32.mrf.mxu1  ;;  %v7806_v5 = vadd.f32 %v7691_v47, %v1564_v21  ;;  %v6251_v47 = vld [vmem:[%s9158_s3 + $0x90] sm:$0xff] }
 0x3ab   : > { %2670 = vmatpush.msrb.mxu1 %v6251_v47 }
 0x3ac   : > { %6157 = vmatmul.msk.f32.gmra.mxu2 %vm1044_vm3, %v7322_v58  ;;  %6176 = vmatmul.msk.f32.gmra.mxu3 %vm1044_vm3, %v7306_v34  ;;  %v1232_v34 = vadd.f32 %v7689_v27, %v7583_v40 }
 0x3ad   : > { %6204 = vmatmul.msk.f32.gmra.mxu1 %vm1044_vm3, %v2089_v32  ;;  %6549 = vmatmul.msk.f32.gmra.mxu0 %vm1044_vm3, %v7496_v24  ;;  %v2090_v24 = vld [vmem:[#allocation2 + $0x7d] sm:$0xff] }
 0x3ae   : > { %v1399_v37 = vadd.f32 %v1363_v54, %v1232_v34 }
 0x3af   : > { %v1366_v9 = vpop.f32.mrf.mxu2  ;;  %v1527_v0 = vpop.f32.mrf.mxu3 }
 0x3b0   : > { %v1565_v43 = vadd.f32 %v1527_v0, %v1398_v46 }
 0x3b2   : > { %v1718_v63 = vpop.f32.mrf.mxu1  ;;  %v7821_v3 = vadd.f32 %v7702_v51, %v1565_v43  ;;  %v3722_v51 = vpop.f32.mrf.mxu0 }
 0x3b4   : > { %6158 = vmatmul.msk.f32.gmra.mxu2 %vm1044_vm3, %v7342_v11  ;;  %6177 = vmatmul.msk.f32.gmra.mxu3 %vm1044_vm3, %v7322_v58  ;;  %v1233_v58 = vadd.f32 %v7689_v27, %v7593_v22 }
 0x3b5   : > { %6205 = vmatmul.msk.f32.gmra.mxu1 %vm1044_vm3, %v2090_v24  ;;  %6550 = vmatmul.msk.f32.gmra.mxu0 %vm1044_vm3, %v7517_v13  ;;  %v2091_v13 = vld [vmem:[#allocation2 + $0x85] sm:$0xff] }
 0x3b6   : > { %v1400_v49 = vadd.f32 %v1366_v9, %v1233_v58  ;;  %v7889_v9 = vld [vmem:[#allocation2 + $0x18] sm:$0xff] }
 0x3b7   : > { %v1369_v4 = vpop.f32.mrf.mxu2  ;;  %v1530_v53 = vpop.f32.mrf.mxu3 }
 0x3b8   : > { %v1401_v40 = vadd.f32 %v1369_v4, %v1234_v36  ;;  %v1566_v17 = vadd.f32 %v1530_v53, %v1399_v37  ;;  %v6273_v36 = vld [vmem:[%s9158_s3 + $0xa8] sm:$0x3] }
 0x3b9   : > { %6274 = vmatpush.msk.msra.mxu2 %vm1148_vm2, %v6273_v36 }
 0x3ba   : > { %v1721_v2 = vpop.f32.mrf.mxu1  ;;  %v7835_v44 = vadd.f32 %v7716_v39, %v1566_v17  ;;  %v3725_v39 = vpop.f32.mrf.mxu0 }
 0x3bc   : > { %6159 = vmatmul.msk.f32.gmra.mxu2 %vm1044_vm3, %v7358_v28  ;;  %6178 = vmatmul.msk.f32.gmra.mxu3 %vm1044_vm3, %v7342_v11  ;;  %v2092_v11 = vld [vmem:[#allocation2 + $0x8d] sm:$0xff] }
 0x3bd   : > { %6206 = vmatmul.msk.f32.gmra.mxu1 %vm1044_vm3, %v2091_v13  ;;  %6551 = vmatmul.msk.f32.gmra.mxu0 %vm1044_vm3, %v7527_v55  ;;  %v7956_v13 = vld [vmem:[#allocation2 + $0x38] sm:$0xff] }
 0x3bf   : > { %v1372_v59 = vpop.f32.mrf.mxu2  ;;  %v1533_v19 = vpop.f32.mrf.mxu3 }
 0x3c0   : > { %v1567_v54 = vadd.f32 %v1533_v19, %v1400_v49 }
 0x3c2   : > { %v7846_v33 = vpop.f32.mrf.mxu1  ;;  %v7849_v22 = vadd.f32 %v7730_v45, %v1567_v54  ;;  %v7858_v12 = vpop.f32.mrf.mxu0  ;;  %v2093_v45 = vld [vmem:[#allocation2 + $0x95] sm:$0xff] }
 0x3c3   : > { %v2244_v54 = vld [vmem:[#allocation2 + $0x16] sm:$0xff] }
 0x3c4   : > { %6160 = vmatmul.msk.f32.gmra.mxu2 %vm1044_vm3, %v7375_v62  ;;  %6179 = vmatmul.msk.f32.gmra.mxu3 %vm1044_vm3, %v7358_v28 }
 0x3c5   : > { %6207 = vmatmul.msk.f32.gmra.mxu1 %vm1044_vm3, %v2092_v11  ;;  %6552 = vmatmul.msk.f32.gmra.mxu0 %vm1044_vm3, %v7536_v42  ;;  %v7973_v11 = vld [vmem:[#allocation2 + $0x40] sm:$0xff] }
 0x3c7   : > { %v1375_v55 = vpop.f32.mrf.mxu2  ;;  %v1536_v27 = vpop.f32.mrf.mxu3 }
 0x3c8   : > { %v1568_v21 = vadd.f32 %v1536_v27, %v1401_v40 }
 0x3ca   : > { %v7860_v56 = vpop.f32.mrf.mxu1  ;;  %v7863_v7 = vadd.f32 %v7753_v60, %v1568_v21  ;;  %v7874_v47 = vpop.f32.mrf.mxu0  ;;  %v2577_v60 = vld [vmem:[#allocation2 + $0x10] sm:$0xff] }
 0x3cc   : > { %6161 = vmatmul.msk.f32.gmra.mxu2 %vm1044_vm3, %v7405_v10  ;;  %6180 = vmatmul.msk.f32.gmra.mxu3 %vm1044_vm3, %v7375_v62 }
 0x3cd   : > { %6208 = vmatmul.msk.f32.gmra.mxu1 %vm1044_vm3, %v2093_v45  ;;  %6553 = vmatmul.msk.f32.gmra.mxu0 %vm1044_vm3, %v7545_v57  ;;  %v2245_v45 = vld [vmem:[#allocation2 + $0x1e] sm:$0xff] }
 0x3cf   : > { %v1378_v28 = vpop.f32.mrf.mxu2  ;;  %v1539_v42 = vpop.f32.mrf.mxu3 }
 0x3d0   : > { %v2410_v28 = vld [vmem:[#allocation2 + $0xf] sm:$0xff] }
 0x3d2   : > { %v7872_v32 = vpop.f32.mrf.mxu1 }
 0x3d4   : > { %6162 = vmatmul.msk.f32.gmra.mxu2 %vm1044_vm3, %v7429_v18  ;;  %6181 = vmatmul.msk.f32.gmra.mxu3 %vm1044_vm3, %v7405_v10  ;;  %v7895_v10 = vpop.f32.mrf.mxu0 }
 0x3d5   : > { %6254 = vmatmul.msk.f32.vlgmr.msrb.gmra.mxu1 %vm1044_vm3, %v2577_v60  ;;  %6554 = vmatmul.msk.f32.gmra.mxu0 %vm1044_vm3, %v7557_v25 }
 0x3d7   : > { %v1381_v62 = vpop.f32.mrf.mxu2  ;;  %v1542_v57 = vpop.f32.mrf.mxu3 }
 0x3da   : > { %v7883_v46 = vpop.f32.mrf.mxu1 }
 0x3dc   : > { %6163 = vmatmul.msk.f32.gmra.mxu2 %vm1044_vm3, %v7447_v14  ;;  %6182 = vmatmul.msk.f32.gmra.mxu3 %vm1044_vm3, %v7429_v18  ;;  %v7903_v18 = vld [vmem:[#allocation2 + $0x20] sm:$0xff]  ;;  %v7909_v34 = vpop.f32.mrf.mxu0 }
 0x3dd   : > { %6255 = vmatmul.msk.f32.gmra.mxu1 %vm1044_vm3, %v7889_v9  ;;  %6555 = vmatmul.msk.f32.gmra.mxu0 %vm1044_vm3, %v7572_v29 }
 0x3df   : > { %v1384_v25 = vpop.f32.mrf.mxu2  ;;  %v1545_v0 = vpop.f32.mrf.mxu3 }
 0x3e0   : > { %v2246_v25 = vld [vmem:[#allocation2 + $0x26] sm:$0xff]  ;;  %v2411_v0 = vld [vmem:[#allocation2 + $0x17] sm:$0xff] }
 0x3e2   : > { %v7897_v43 = vpop.f32.mrf.mxu1 }
 0x3e4   : > { %6164 = vmatmul.msk.f32.gmra.mxu2 %vm1044_vm3, %v7464_v50  ;;  %6183 = vmatmul.msk.f32.gmra.mxu3 %vm1044_vm3, %v7447_v14  ;;  %v7921_v14 = vld [vmem:[#allocation2 + $0x28] sm:$0xff] }
 0x3e5   : > { %6256 = vmatmul.msk.f32.gmra.mxu1 %vm1044_vm3, %v7903_v18  ;;  %6556 = vmatmul.msk.f32.gmra.mxu0 %vm1044_vm3, %v7587_v35  ;;  %v6294_v35 = vld [vmem:[%s9158_s3 + $0xb8] sm:$0x3] }
 0x3e6   : > { %6295 = vmatpush.msk.msra.mxu3 %vm1148_vm2, %v6294_v35 }
 0x3e7   : > { %v1387_v29 = vpop.f32.mrf.mxu2  ;;  %v1548_v63 = vpop.f32.mrf.mxu3 }
 0x3e8   : > { %v7997_v29 = vld [vmem:[#allocation2 + $0x50] sm:$0xff] }
 0x3ea   : > { %v7911_v24 = vpop.f32.mrf.mxu1 }
 0x3ec   : > { %6165 = vmatmul.msk.f32.gmra.mxu2 %vm1044_vm3, %v7481_v20  ;;  %6184 = vmatmul.msk.f32.gmra.mxu3 %vm1044_vm3, %v7464_v50  ;;  %v7934_v50 = vpop.f32.mrf.mxu0 }
 0x3ed   : > { %6257 = vmatmul.msk.f32.gmra.mxu1 %vm1044_vm3, %v7921_v14  ;;  %6557 = vmatmul.msk.f32.gmra.mxu0 %vm1044_vm3, %v7599_v48  ;;  %v7940_v48 = vld [vmem:[#allocation2 + $0x30] sm:$0xff] }
 0x3ef   : > { %v1551_v51 = vpop.f32.mrf.mxu3  ;;  %v1837_v37 = vpop.f32.mrf.mxu2 }
 0x3f0   : > { %v1891_v4 = vadd.f32 %v1837_v37, %v7705_v15  ;;  %v6315_v15 = vld [vmem:[%s9158_s3 + $0xc8] sm:$0x3]  ;;  %v2247_v37 = vld [vmem:[#allocation2 + $0x2e] sm:$0xff] }
 0x3f1   : > { %6316 = vmatpush.msk.msra.mxu1 %vm1148_vm2, %v6315_v15  ;;  %v8009_v15 = vld [vmem:[#allocation2 + $0x58] sm:$0xff] }
 0x3f2   : > { %v7932_v53 = vpop.f32.mrf.mxu1 }
 0x3f4   : > { %6166 = vmatmul.msk.f32.gmra.mxu2 %vm1044_vm3, %v7498_v6  ;;  %6185 = vmatmul.msk.f32.gmra.mxu3 %vm1044_vm3, %v7481_v20  ;;  %v2243_v20 = vld [vmem:[#allocation2 + $0xe] sm:$0xff] }
 0x3f5   : > { %6258 = vmatmul.msk.f32.gmra.mxu1 %vm1044_vm3, %v7940_v48  ;;  %6558 = vmatmul.msk.f32.gmra.mxu0 %vm1044_vm3, %v7611_v41  ;;  %v7958_v41 = vpop.f32.mrf.mxu0 }
 0x3f7   : > { %v1554_v40 = vpop.f32.mrf.mxu3  ;;  %v1840_v17 = vpop.f32.mrf.mxu2 }
 0x3f8   : > { %v1892_v2 = vadd.f32 %v1840_v17, %v7721_v23 }
 0x3fa   : > { %v7951_v58 = vpop.f32.mrf.mxu1 }
 0x3fc   : > { %6186 = vmatmul.msk.f32.gmra.mxu3 %vm1044_vm3, %v7498_v6  ;;  %6212 = vmatmul.msk.f32.vlgmr.msrb.gmra.mxu2 %vm1044_vm3, %v2243_v20 }
 0x3fd   : > { %6259 = vmatmul.msk.f32.gmra.mxu1 %vm1044_vm3, %v7956_v13  ;;  %6559 = vmatmul.msk.f32.gmra.mxu0 %vm1044_vm3, %v7623_v61 }
 0x3ff   : > { %v1843_v49 = vpop.f32.mrf.mxu2  ;;  %v2004_v23 = vpop.f32.mrf.mxu3 }
 0x400   : > { %v1893_v59 = vadd.f32 %v1843_v49, %v7738_v31  ;;  %v2058_v19 = vadd.f32 %v2004_v23, %v1891_v4  ;;  %v2412_v4 = vld [vmem:[#allocation2 + $0x1f] sm:$0xff]  ;;  %v2248_v49 = vld [vmem:[#allocation2 + $0x36] sm:$0xff]  ;;  %v2413_v23 = vld [vmem:[#allocation2 + $0x27] sm:$0xff] }
 0x402   : > { %v7965_v39 = vpop.f32.mrf.mxu1  ;;  %v7968_v6 = vadd.f32 %v7846_v33, %v2058_v19 }
 0x404   : > { %6187 = vmatmul.msk.f32.gmra.mxu3 %vm1044_vm3, %v7509_v52  ;;  %6213 = vmatmul.msk.f32.gmra.mxu2 %vm1044_vm3, %v2244_v54  ;;  %v7985_v52 = vld [vmem:[#allocation2 + $0x48] sm:$0xff] }
 0x405   : > { %6260 = vmatmul.msk.f32.gmra.mxu1 %vm1044_vm3, %v7973_v11 }
 0x407   : > { %v1846_v61 = vpop.f32.mrf.mxu2  ;;  %v2007_v55 = vpop.f32.mrf.mxu3 }
 0x408   : > { %v1894_v31 = vadd.f32 %v1846_v61, %v7756_v38  ;;  %v2059_v27 = vadd.f32 %v2007_v55, %v1892_v2 }
 0x40a   : > { %v7978_v21 = vpop.f32.mrf.mxu1  ;;  %v7981_v33 = vadd.f32 %v7860_v56, %v2059_v27  ;;  %v2414_v27 = vld [vmem:[#allocation2 + $0x2f] sm:$0xff] }
 0x40c   : > { %6214 = vmatmul.msk.f32.gmra.mxu2 %vm1044_vm3, %v2245_v45  ;;  %6233 = vmatmul.msk.f32.vlgmr.msrb.gmra.mxu3 %vm1044_vm3, %v2410_v28  ;;  %v8029_v45 = vld [vmem:[#allocation2 + $0x68] sm:$0xff] }
 0x40d   : > { %6261 = vmatmul.msk.f32.gmra.mxu1 %vm1044_vm3, %v7985_v52 }
 0x40f   : > { %v1849_v42 = vpop.f32.mrf.mxu2  ;;  %v2010_v60 = vpop.f32.mrf.mxu3 }
 0x410   : > { %v1895_v38 = vadd.f32 %v1849_v42, %v7766_v16  ;;  %v2060_v62 = vadd.f32 %v2010_v60, %v1893_v59  ;;  %v8019_v59 = vld [vmem:[#allocation2 + $0x60] sm:$0xff] }
 0x412   : > { %v7990_v57 = vpop.f32.mrf.mxu1  ;;  %v7993_v56 = vadd.f32 %v7872_v32, %v2060_v62 }
 0x414   : > { %6215 = vmatmul.msk.f32.gmra.mxu2 %vm1044_vm3, %v2246_v25  ;;  %6234 = vmatmul.msk.f32.gmra.mxu3 %vm1044_vm3, %v2411_v0  ;;  %v2250_v25 = vld [vmem:[#allocation2 + $0x46] sm:$0xff]  ;;  %v2415_v0 = vld [vmem:[#allocation2 + $0x37] sm:$0xff] }
 0x415   : > { %6262 = vmatmul.msk.f32.gmra.mxu1 %vm1044_vm3, %v7997_v29 }
 0x417   : > { %v1852_v63 = vpop.f32.mrf.mxu2  ;;  %v2013_v36 = vpop.f32.mrf.mxu3 }
 0x418   : > { %v1896_v16 = vadd.f32 %v1852_v63, %v7777_v30  ;;  %v2061_v35 = vadd.f32 %v2013_v36, %v1894_v31  ;;  %v2249_v31 = vld [vmem:[#allocation2 + $0x3e] sm:$0xff]  ;;  %v8042_v63 = vld [vmem:[#allocation2 + $0x70] sm:$0xff] }
 0x41a   : > { %v8002_v51 = vpop.f32.mrf.mxu1  ;;  %v8005_v32 = vadd.f32 %v7883_v46, %v2061_v35 }
 0x41c   : > { %6216 = vmatmul.msk.f32.gmra.mxu2 %vm1044_vm3, %v2247_v37  ;;  %6235 = vmatmul.msk.f32.gmra.mxu3 %vm1044_vm3, %v2412_v4 }
 0x41d   : > { %6263 = vmatmul.msk.f32.gmra.mxu1 %vm1044_vm3, %v8009_v15 }
 0x41f   : > { %v1855_v40 = vpop.f32.mrf.mxu2  ;;  %v2016_v17 = vpop.f32.mrf.mxu3 }
 0x420   : > { %v1897_v30 = vadd.f32 %v1855_v40, %v7791_v26  ;;  %v2062_v2 = vadd.f32 %v2016_v17, %v1895_v38  ;;  %v2251_v40 = vld [vmem:[#allocation2 + $0x4e] sm:$0xff]  ;;  %v2416_v17 = vld [vmem:[#allocation2 + $0x3f] sm:$0xff] }
 0x422   : > { %v2207_v20 = vpop.f32.mrf.mxu1  ;;  %v8015_v46 = vadd.f32 %v7897_v43, %v2062_v2 }
 0x424   : > { %6217 = vmatmul.msk.f32.gmra.mxu2 %vm1044_vm3, %v2248_v49  ;;  %6236 = vmatmul.msk.f32.gmra.mxu3 %vm1044_vm3, %v2413_v23 }
 0x425   : > { %6264 = vmatmul.msk.f32.gmra.mxu1 %vm1044_vm3, %v8019_v59 }
 0x427   : > { %v1858_v19 = vpop.f32.mrf.mxu2  ;;  %v2019_v54 = vpop.f32.mrf.mxu3 }
 0x428   : > { %v1898_v26 = vadd.f32 %v1858_v19, %v7806_v5  ;;  %v2063_v61 = vadd.f32 %v2019_v54, %v1896_v16  ;;  %v2252_v54 = vld [vmem:[#allocation2 + $0x56] sm:$0xff] }
 0x42a   : > { %v2210_v55 = vpop.f32.mrf.mxu1  ;;  %v8025_v43 = vadd.f32 %v7911_v24, %v2063_v61  ;;  %v6272_v24 = vld [vmem:[%s9158_s3 + $0xa0] sm:$0xff] }
 0x42b   : > { %2837 = vmatpush.msra.mxu2 %v6272_v24  ;;  %v8068_v61 = vld [vmem:[#allocation2 + $0x80] sm:$0xff] }
 0x42c   : > { %6218 = vmatmul.msk.f32.gmra.mxu2 %vm1044_vm3, %v2249_v31  ;;  %6237 = vmatmul.msk.f32.gmra.mxu3 %vm1044_vm3, %v2414_v27 }
 0x42d   : > { %6265 = vmatmul.msk.f32.gmra.mxu1 %vm1044_vm3, %v8029_v45 }
 0x42f   : > { %v1861_v28 = vpop.f32.mrf.mxu2  ;;  %v2022_v42 = vpop.f32.mrf.mxu3 }
 0x430   : > { %v1899_v5 = vadd.f32 %v1861_v28, %v7821_v3  ;;  %v2064_v60 = vadd.f32 %v2022_v42, %v1897_v30  ;;  %v6293_v3 = vld [vmem:[%s9158_s3 + $0xb0] sm:$0xff]  ;;  %v8055_v30 = vld [vmem:[#allocation2 + $0x78] sm:$0xff] }
 0x431   : > { %3004 = vmatpush.msra.mxu3 %v6293_v3  ;;  %v2253_v42 = vld [vmem:[#allocation2 + $0x5e] sm:$0xff] }
 0x432   : > { %v2213_v38 = vpop.f32.mrf.mxu1  ;;  %v8038_v62 = vadd.f32 %v7932_v53, %v2064_v60  ;;  %v8078_v60 = vld [vmem:[#allocation2 + $0x88] sm:$0xff]  ;;  %v2419_v3 = vld [vmem:[#allocation2 + $0x57] sm:$0xff] }
 0x434   : > { %6219 = vmatmul.msk.f32.gmra.mxu2 %vm1044_vm3, %v2250_v25  ;;  %6238 = vmatmul.msk.f32.gmra.mxu3 %vm1044_vm3, %v2415_v0 }
 0x435   : > { %6266 = vmatmul.msk.f32.gmra.mxu1 %vm1044_vm3, %v8042_v63 }
 0x437   : > { %v1864_v36 = vpop.f32.mrf.mxu2  ;;  %v2025_v53 = vpop.f32.mrf.mxu3 }
 0x438   : > { %v1900_v16 = vadd.f32 %v1864_v36, %v7835_v44  ;;  %v2065_v35 = vadd.f32 %v2025_v53, %v1898_v26  ;;  %v6314_v44 = vld [vmem:[%s9158_s3 + $0xc0] sm:$0xff] }
 0x439   : > { %3171 = vmatpush.msra.mxu1 %v6314_v44  ;;  %v2417_v26 = vld [vmem:[#allocation2 + $0x47] sm:$0xff] }
 0x43a   : > { %v2216_v37 = vpop.f32.mrf.mxu1  ;;  %v8051_v4 = vadd.f32 %v7951_v58, %v2065_v35 }
 0x43c   : > { %6220 = vmatmul.msk.f32.gmra.mxu2 %vm1044_vm3, %v2251_v40  ;;  %6239 = vmatmul.msk.f32.gmra.mxu3 %vm1044_vm3, %v2416_v17  ;;  %v2255_v40 = vld [vmem:[#allocation2 + $0x6e] sm:$0xff] }
 0x43d   : > { %6267 = vmatmul.msk.f32.gmra.mxu1 %vm1044_vm3, %v8055_v30 }
 0x43f   : > { %v1867_v2 = vpop.f32.mrf.mxu2  ;;  %v2028_v20 = vpop.f32.mrf.mxu3 }
 0x440   : > { %v1901_v58 = vadd.f32 %v1867_v2, %v7849_v22  ;;  %v2066_v49 = vadd.f32 %v2028_v20, %v1899_v5  ;;  %v2418_v5 = vld [vmem:[#allocation2 + $0x4f] sm:$0xff]  ;;  %v2421_v20 = vld [vmem:[#allocation2 + $0x67] sm:$0xff] }
 0x441   : > { %v2256_v2 = vld [vmem:[#allocation2 + $0x76] sm:$0xff] }
 0x442   : > { %v2219_v23 = vpop.f32.mrf.mxu1  ;;  %v8064_v19 = vadd.f32 %v7965_v39, %v2066_v49 }
 0x444   : > { %6221 = vmatmul.msk.f32.gmra.mxu2 %vm1044_vm3, %v2252_v54  ;;  %6240 = vmatmul.msk.f32.gmra.mxu3 %vm1044_vm3, %v2417_v26  ;;  %v2257_v54 = vld [vmem:[#allocation2 + $0x7e] sm:$0xff]  ;;  %v2422_v26 = vld [vmem:[#allocation2 + $0x6f] sm:$0xff] }
 0x445   : > { %6268 = vmatmul.msk.f32.gmra.mxu1 %vm1044_vm3, %v8068_v61 }
 0x447   : > { %v1870_v55 = vpop.f32.mrf.mxu2  ;;  %v2031_v31 = vpop.f32.mrf.mxu3 }
 0x448   : > { %v1902_v22 = vadd.f32 %v1870_v55, %v7863_v7  ;;  %v2067_v27 = vadd.f32 %v2031_v31, %v1900_v16 }
 0x44a   : > { %v2222_v28 = vpop.f32.mrf.mxu1  ;;  %v8074_v39 = vadd.f32 %v7978_v21, %v2067_v27  ;;  %v2254_v21 = vld [vmem:[#allocation2 + $0x66] sm:$0xff] }
 0x44b   : > { %v2258_v27 = vld [vmem:[#allocation2 + $0x86] sm:$0xff]  ;;  %v2423_v28 = vld [vmem:[#allocation2 + $0x77] sm:$0xff] }
 0x44c   : > { %6222 = vmatmul.msk.f32.gmra.mxu2 %vm1044_vm3, %v2253_v42  ;;  %6241 = vmatmul.msk.f32.gmra.mxu3 %vm1044_vm3, %v2418_v5  ;;  %v3080_v42 = vld [vmem:[#allocation2 + $0x2a] sm:$0xff] }
 0x44d   : > { %6269 = vmatmul.msk.f32.gmra.mxu1 %vm1044_vm3, %v8078_v60 }
 0x44f   : > { %v1873_v38 = vpop.f32.mrf.mxu2  ;;  %v2034_v24 = vpop.f32.mrf.mxu3 }
 0x450   : > { %v2068_v25 = vadd.f32 %v2034_v24, %v1901_v58 }
 0x452   : > { %v8082_v7 = vpop.f32.mrf.mxu1  ;;  %v8085_v0 = vadd.f32 %v7990_v57, %v2068_v25  ;;  %v2420_v57 = vld [vmem:[#allocation2 + $0x5f] sm:$0xff]  ;;  %v6336_v25 = vld [vmem:[%s9158_s3 + $0xd8] sm:$0x3] }
 0x453   : > { %6337 = vmatpush.msk.msrb.mxu2 %vm1148_vm2, %v6336_v25 }
 0x454   : > { %6223 = vmatmul.msk.f32.gmra.mxu2 %vm1044_vm3, %v2254_v21  ;;  %6242 = vmatmul.msk.f32.gmra.mxu3 %vm1044_vm3, %v2419_v3  ;;  %v2259_v21 = vld [vmem:[#allocation2 + $0x8e] sm:$0xff]  ;;  %v2424_v3 = vld [vmem:[#allocation2 + $0x7f] sm:$0xff] }
 0x455   : > { %6270 = vmatmul.msk.f32.gmra.mxu1 %vm1044_vm3, %v7718_v1 }
 0x457   : > { %v1876_v36 = vpop.f32.mrf.mxu2  ;;  %v2037_v53 = vpop.f32.mrf.mxu3 }
 0x458   : > { %v2069_v16 = vadd.f32 %v2037_v53, %v1902_v22  ;;  %v3081_v36 = vld [vmem:[#allocation2 + $0x32] sm:$0xff]  ;;  %v6357_v53 = vld [vmem:[%s9158_s3 + $0xe8] sm:$0x3] }
 0x459   : > { %6358 = vmatpush.msk.msrb.mxu3 %vm1148_vm2, %v6357_v53 }
 0x45a   : > { %v8091_v35 = vpop.f32.mrf.mxu1  ;;  %v8094_v37 = vadd.f32 %v8002_v51, %v2069_v16  ;;  %v3078_v51 = vld [vmem:[#allocation2 + $0x1a] sm:$0xff] }
 0x45c   : > { %6224 = vmatmul.msk.f32.gmra.mxu2 %vm1044_vm3, %v2255_v40  ;;  %6243 = vmatmul.msk.f32.gmra.mxu3 %vm1044_vm3, %v2420_v57 }
 0x45d   : > { %6271 = vmatmul.msk.f32.gmra.mxu1 %vm1044_vm3, %v7732_v8  ;;  %v3079_v8 = vld [vmem:[#allocation2 + $0x22] sm:$0xff] }
 0x45f   : > { %v1879_v17 = vpop.f32.mrf.mxu2  ;;  %v2040_v44 = vpop.f32.mrf.mxu3 }
 0x460   : > { %v2260_v17 = vld [vmem:[#allocation2 + $0x96] sm:$0xff] }
 0x462   : > { %v8100_v1 = vpop.f32.mrf.mxu1 }
 0x464   : > { %6225 = vmatmul.msk.f32.gmra.mxu2 %vm1044_vm3, %v2256_v2  ;;  %6244 = vmatmul.msk.f32.gmra.mxu3 %vm1044_vm3, %v2421_v20  ;;  %v2425_v2 = vld [vmem:[#allocation2 + $0x87] sm:$0xff]  ;;  %v3082_v20 = vld [vmem:[#allocation2 + $0x3a] sm:$0xff] }
 0x465   : > { %6317 = vmatmul.msk.f32.vlgmr.msra.gmra.mxu1 %vm1044_vm3, %v3078_v51  ;;  %v6399_v51 = vld [vmem:[%s9158_s3 + $0x108] sm:$0x3] }
 0x466   : > { %6400 = vmatpush.msk.msrb.mxu1 %vm1148_vm2, %v6399_v51 }
 0x467   : > { %v1882_v58 = vpop.f32.mrf.mxu2  ;;  %v2043_v49 = vpop.f32.mrf.mxu3 }
 0x46a   : > { %v8105_v23 = vpop.f32.mrf.mxu1 }
 0x46c   : > { %6226 = vmatmul.msk.f32.gmra.mxu2 %vm1044_vm3, %v2257_v54  ;;  %6245 = vmatmul.msk.f32.gmra.mxu3 %vm1044_vm3, %v2422_v26  ;;  %v2426_v26 = vld [vmem:[#allocation2 + $0x8f] sm:$0xff] }
 0x46d   : > { %6318 = vmatmul.msk.f32.gmra.mxu1 %vm1044_vm3, %v3079_v8  ;;  %v3083_v8 = vld [vmem:[#allocation2 + $0x42] sm:$0xff] }
 0x46f   : > { %v1885_v55 = vpop.f32.mrf.mxu2  ;;  %v2046_v31 = vpop.f32.mrf.mxu3 }
 0x472   : > { %v8110_v22 = vpop.f32.mrf.mxu1 }
 0x474   : > { %6227 = vmatmul.msk.f32.gmra.mxu2 %vm1044_vm3, %v2258_v27  ;;  %6246 = vmatmul.msk.f32.gmra.mxu3 %vm1044_vm3, %v2423_v28 }
 0x475   : > { %6319 = vmatmul.msk.f32.gmra.mxu1 %vm1044_vm3, %v3080_v42  ;;  %v2427_v42 = vld [vmem:[#allocation2 + $0x97] sm:$0xff] }
 0x477   : > { %v1888_v5 = vpop.f32.mrf.mxu2  ;;  %v2049_v38 = vpop.f32.mrf.mxu3 }
 0x47a   : > { %v8115_v24 = vpop.f32.mrf.mxu1 }
 0x47c   : > { %6228 = vmatmul.msk.f32.gmra.mxu2 %vm1044_vm3, %v2259_v21  ;;  %6247 = vmatmul.msk.f32.gmra.mxu3 %vm1044_vm3, %v2424_v3 }
 0x47d   : > { %6320 = vmatmul.msk.f32.gmra.mxu1 %vm1044_vm3, %v3081_v36 }
 0x47f   : > { %v2052_v16 = vpop.f32.mrf.mxu3  ;;  %v2338_v40 = vpop.f32.mrf.mxu2 }
 0x480   : > { %v2392_v57 = vadd.f32 %v2338_v40, %v7968_v6 }
 0x482   : > { %v8129_v44 = vpop.f32.mrf.mxu1 }
 0x484   : > { %6229 = vmatmul.msk.f32.gmra.mxu2 %vm1044_vm3, %v2260_v17  ;;  %6248 = vmatmul.msk.f32.gmra.mxu3 %vm1044_vm3, %v2425_v2 }
 0x485   : > { %6321 = vmatmul.msk.f32.gmra.mxu1 %vm1044_vm3, %v3082_v20 }
 0x487   : > { %v2055_v58 = vpop.f32.mrf.mxu3  ;;  %v2341_v49 = vpop.f32.mrf.mxu2 }
 0x488   : > { %v2393_v6 = vadd.f32 %v2341_v49, %v7981_v33 }
 0x48a   : > { %v8139_v54 = vpop.f32.mrf.mxu1 }
 0x48c   : > { %6249 = vmatmul.msk.f32.gmra.mxu3 %vm1044_vm3, %v2426_v26  ;;  %6275 = vmatmul.msk.f32.vlgmr.msra.gmra.mxu2 %vm1044_vm3, %v7889_v9  ;;  %v3084_v9 = vld [vmem:[#allocation2 + $0x4a] sm:$0xff] }
 0x48d   : > { %6322 = vmatmul.msk.f32.gmra.mxu1 %vm1044_vm3, %v3083_v8 }
 0x48f   : > { %v2344_v55 = vpop.f32.mrf.mxu2  ;;  %v2505_v31 = vpop.f32.mrf.mxu3 }
 0x490   : > { %v2394_v27 = vadd.f32 %v2344_v55, %v7993_v56  ;;  %v2559_v28 = vadd.f32 %v2505_v31, %v2392_v57 }
 0x492   : > { %v8146_v5 = vpop.f32.mrf.mxu1  ;;  %v8149_v33 = vadd.f32 %v8082_v7, %v2559_v28  ;;  %v2911_v7 = vld [vmem:[#allocation2 + $0x19] sm:$0xff] }
 0x494   : > { %6250 = vmatmul.msk.f32.gmra.mxu3 %vm1044_vm3, %v2427_v42  ;;  %6276 = vmatmul.msk.f32.gmra.mxu2 %vm1044_vm3, %v7903_v18  ;;  %v3085_v18 = vld [vmem:[#allocation2 + $0x52] sm:$0xff] }
 0x495   : > { %6323 = vmatmul.msk.f32.gmra.mxu1 %vm1044_vm3, %v3084_v9 }
 0x497   : > { %v2347_v38 = vpop.f32.mrf.mxu2  ;;  %v2508_v25 = vpop.f32.mrf.mxu3 }
 0x498   : > { %v2395_v21 = vadd.f32 %v2347_v38, %v8005_v32  ;;  %v2560_v56 = vadd.f32 %v2508_v25, %v2393_v6 }
 0x49a   : > { %v8156_v3 = vpop.f32.mrf.mxu1  ;;  %v8159_v36 = vadd.f32 %v8091_v35, %v2560_v56  ;;  %v2912_v35 = vld [vmem:[#allocation2 + $0x21] sm:$0xff] }
 0x49c   : > { %6277 = vmatmul.msk.f32.gmra.mxu2 %vm1044_vm3, %v7921_v14  ;;  %6296 = vmatmul.msk.f32.vlgmr.msra.gmra.mxu3 %vm1044_vm3, %v2911_v7  ;;  %v3086_v14 = vld [vmem:[#allocation2 + $0x5a] sm:$0xff] }
 0x49d   : > { %6324 = vmatmul.msk.f32.gmra.mxu1 %vm1044_vm3, %v3085_v18 }
 0x49f   : > { %v2350_v53 = vpop.f32.mrf.mxu2  ;;  %v2511_v16 = vpop.f32.mrf.mxu3 }
 0x4a0   : > { %v2396_v40 = vadd.f32 %v2350_v53, %v8015_v46  ;;  %v2561_v32 = vadd.f32 %v2511_v16, %v2394_v27  ;;  %v2916_v53 = vld [vmem:[#allocation2 + $0x41] sm:$0xff] }
 0x4a2   : > { %v8166_v57 = vpop.f32.mrf.mxu1  ;;  %v8169_v17 = vadd.f32 %v8100_v1, %v2561_v32  ;;  %v2913_v1 = vld [vmem:[#allocation2 + $0x29] sm:$0xff] }
 0x4a4   : > { %6278 = vmatmul.msk.f32.gmra.mxu2 %vm1044_vm3, %v7940_v48  ;;  %6297 = vmatmul.msk.f32.gmra.mxu3 %vm1044_vm3, %v2912_v35  ;;  %v3087_v48 = vld [vmem:[#allocation2 + $0x62] sm:$0xff] }
 0x4a5   : > { %6325 = vmatmul.msk.f32.gmra.mxu1 %vm1044_vm3, %v3086_v14 }
 0x4a7   : > { %v2353_v2 = vpop.f32.mrf.mxu2  ;;  %v2514_v20 = vpop.f32.mrf.mxu3 }
 0x4a8   : > { %v2397_v51 = vadd.f32 %v2353_v2, %v8025_v43  ;;  %v2562_v46 = vadd.f32 %v2514_v20, %v2395_v21  ;;  %v3091_v2 = vld [vmem:[#allocation2 + $0x82] sm:$0xff] }
 0x4a9   : > { %v6398_v20 = vld [vmem:[%s9158_s3 + $0x100] sm:$0xff] }
 0x4aa   : > { %v8176_v58 = vpop.f32.mrf.mxu1  ;;  %v8179_v49 = vadd.f32 %v8105_v23, %v2562_v46  ;;  %v2914_v23 = vld [vmem:[#allocation2 + $0x31] sm:$0xff]  ;;  %3839 = vmatpush.msrb.mxu1 %v6398_v20 }
 0x4ac   : > { %6279 = vmatmul.msk.f32.gmra.mxu2 %vm1044_vm3, %v7956_v13  ;;  %6298 = vmatmul.msk.f32.gmra.mxu3 %vm1044_vm3, %v2913_v1  ;;  %v3088_v13 = vld [vmem:[#allocation2 + $0x6a] sm:$0xff] }
 0x4ad   : > { %6326 = vmatmul.msk.f32.gmra.mxu1 %vm1044_vm3, %v3087_v48 }
 0x4af   : > { %v2356_v6 = vpop.f32.mrf.mxu2  ;;  %v2517_v26 = vpop.f32.mrf.mxu3 }
 0x4b0   : > { %v2398_v8 = vadd.f32 %v2356_v6, %v8038_v62  ;;  %v2563_v43 = vadd.f32 %v2517_v26, %v2396_v40  ;;  %v3092_v6 = vld [vmem:[#allocation2 + $0x8a] sm:$0xff] }
 0x4b2   : > { %v2708_v55 = vpop.f32.mrf.mxu1  ;;  %v8187_v31 = vadd.f32 %v8110_v22, %v2563_v43  ;;  %v2915_v22 = vld [vmem:[#allocation2 + $0x39] sm:$0xff] }
 0x4b4   : > { %6280 = vmatmul.msk.f32.gmra.mxu2 %vm1044_vm3, %v7973_v11  ;;  %6299 = vmatmul.msk.f32.gmra.mxu3 %vm1044_vm3, %v2914_v23  ;;  %v3089_v11 = vld [vmem:[#allocation2 + $0x72] sm:$0xff] }
 0x4b5   : > { %6327 = vmatmul.msk.f32.gmra.mxu1 %vm1044_vm3, %v3088_v13  ;;  %v3093_v23 = vld [vmem:[#allocation2 + $0x92] sm:$0xff] }
 0x4b7   : > { %v2359_v27 = vpop.f32.mrf.mxu2  ;;  %v2520_v28 = vpop.f32.mrf.mxu3 }
 0x4b8   : > { %v2399_v42 = vadd.f32 %v2359_v27, %v8051_v4  ;;  %v2564_v9 = vadd.f32 %v2520_v28, %v2397_v51 }
 0x4ba   : > { %v2711_v62 = vpop.f32.mrf.mxu1  ;;  %v8195_v38 = vadd.f32 %v8115_v24, %v2564_v9  ;;  %v6335_v24 = vld [vmem:[%s9158_s3 + $0xd0] sm:$0xff] }
 0x4bb   : > { %3338 = vmatpush.msrb.mxu2 %v6335_v24  ;;  %v2920_v62 = vld [vmem:[#allocation2 + $0x61] sm:$0xff] }
 0x4bc   : > { %6281 = vmatmul.msk.f32.gmra.mxu2 %vm1044_vm3, %v7985_v52  ;;  %6300 = vmatmul.msk.f32.gmra.mxu3 %vm1044_vm3, %v2915_v22  ;;  %v3090_v52 = vld [vmem:[#allocation2 + $0x7a] sm:$0xff] }
 0x4bd   : > { %6328 = vmatmul.msk.f32.gmra.mxu1 %vm1044_vm3, %v3089_v11 }
 0x4bf   : > { %v2362_v25 = vpop.f32.mrf.mxu2  ;;  %v2523_v21 = vpop.f32.mrf.mxu3 }
 0x4c0   : > { %v2400_v56 = vadd.f32 %v2362_v25, %v8064_v19  ;;  %v2565_v7 = vadd.f32 %v2523_v21, %v2398_v8  ;;  %v6356_v19 = vld [vmem:[%s9158_s3 + $0xe0] sm:$0xff] }
 0x4c1   : > { %3505 = vmatpush.msrb.mxu3 %v6356_v19  ;;  %v3095_v25 = vld [vmem:[#allocation2 + $0xa2] sm:$0xff]  ;;  %v3747_v19 = vld [vmem:[#allocation2 + $0x2d] sm:$0xff] }
 0x4c2   : > { %v2714_v4 = vpop.f32.mrf.mxu1  ;;  %v8206_v18 = vadd.f32 %v8129_v44, %v2565_v7 }
 0x4c3   : > { %v2922_v4 = vld [vmem:[#allocation2 + $0x71] sm:$0xff] }
 0x4c4   : > { %6282 = vmatmul.msk.f32.gmra.mxu2 %vm1044_vm3, %v7997_v29  ;;  %6301 = vmatmul.msk.f32.gmra.mxu3 %vm1044_vm3, %v2916_v53  ;;  %v2917_v29 = vld [vmem:[#allocation2 + $0x49] sm:$0xff] }
 0x4c5   : > { %6329 = vmatmul.msk.f32.gmra.mxu1 %vm1044_vm3, %v3090_v52  ;;  %v2923_v52 = vld [vmem:[#allocation2 + $0x79] sm:$0xff] }
 0x4c7   : > { %v2365_v16 = vpop.f32.mrf.mxu2  ;;  %v2526_v40 = vpop.f32.mrf.mxu3 }
 0x4c8   : > { %v2401_v44 = vadd.f32 %v2365_v16, %v8074_v39  ;;  %v2566_v32 = vadd.f32 %v2526_v40, %v2399_v42  ;;  %v8272_v40 = vld [vmem:[#allocation2 + $0x90] sm:$0xff] }
 0x4ca   : > { %v2717_v35 = vpop.f32.mrf.mxu1  ;;  %v8217_v14 = vadd.f32 %v8139_v54, %v2566_v32  ;;  %v2924_v32 = vld [vmem:[#allocation2 + $0x81] sm:$0xff] }
 0x4cb   : > { %v3748_v35 = vld [vmem:[#allocation2 + $0x35] sm:$0xff] }
 0x4cc   : > { %6283 = vmatmul.msk.f32.gmra.mxu2 %vm1044_vm3, %v8009_v15  ;;  %6302 = vmatmul.msk.f32.gmra.mxu3 %vm1044_vm3, %v2917_v29  ;;  %v2918_v15 = vld [vmem:[#allocation2 + $0x51] sm:$0xff] }
 0x4cd   : > { %6330 = vmatmul.msk.f32.gmra.mxu1 %vm1044_vm3, %v3091_v2  ;;  %v8280_v2 = vld [vmem:[#allocation2 + $0x98] sm:$0xff] }
 0x4cf   : > { %v2368_v39 = vpop.f32.mrf.mxu2  ;;  %v2529_v51 = vpop.f32.mrf.mxu3 }
 0x4d0   : > { %v2402_v46 = vadd.f32 %v2368_v39, %v8085_v0  ;;  %v2567_v54 = vadd.f32 %v2529_v51, %v2400_v56  ;;  %v2921_v56 = vld [vmem:[#allocation2 + $0x69] sm:$0xff]  ;;  %v6420_v39 = vld [vmem:[%s9158_s3 + $0x118] sm:$0x3] }
 0x4d1   : > { %v2925_v51 = vld [vmem:[#allocation2 + $0x89] sm:$0xff]  ;;  %6421 = vmatpush.msk.msra.mxu2 %vm1148_vm2, %v6420_v39 }
 0x4d2   : > { %v2720_v1 = vpop.f32.mrf.mxu1  ;;  %v8228_v48 = vadd.f32 %v8146_v5, %v2567_v54  ;;  %v2919_v5 = vld [vmem:[#allocation2 + $0x59] sm:$0xff]  ;;  %v6441_v54 = vld [vmem:[%s9158_s3 + $0x128] sm:$0x3] }
 0x4d3   : > { %6442 = vmatpush.msk.msra.mxu3 %vm1148_vm2, %v6441_v54  ;;  %v3413_v39 = vld [vmem:[#allocation2 + $0x24] sm:$0xff] }
 0x4d4   : > { %6284 = vmatmul.msk.f32.gmra.mxu2 %vm1044_vm3, %v8019_v59  ;;  %6303 = vmatmul.msk.f32.gmra.mxu3 %vm1044_vm3, %v2918_v15 }
 0x4d5   : > { %6331 = vmatmul.msk.f32.gmra.mxu1 %vm1044_vm3, %v3092_v6 }
 0x4d7   : > { %v2371_v26 = vpop.f32.mrf.mxu2  ;;  %v2532_v8 = vpop.f32.mrf.mxu3 }
 0x4d8   : > { %v2403_v43 = vadd.f32 %v2371_v26, %v8094_v37  ;;  %v2568_v55 = vadd.f32 %v2532_v8, %v2401_v44  ;;  %v3094_v37 = vld [vmem:[#allocation2 + $0x9a] sm:$0xff]  ;;  %v2926_v8 = vld [vmem:[#allocation2 + $0x91] sm:$0xff] }
 0x4d9   : > { %v8297_v26 = vld [vmem:[#allocation2 + $0xa0] sm:$0xff] }
 0x4da   : > { %v2723_v0 = vpop.f32.mrf.mxu1  ;;  %v8236_v13 = vadd.f32 %v8156_v3, %v2568_v55  ;;  %v3750_v55 = vld [vmem:[#allocation2 + $0x45] sm:$0xff] }
 0x4db   : > { %v6483_v0 = vld [vmem:[%s9158_s3 + $0x148] sm:$0x3] }
 0x4dc   : > { %6285 = vmatmul.msk.f32.gmra.mxu2 %vm1044_vm3, %v8029_v45  ;;  %6304 = vmatmul.msk.f32.gmra.mxu3 %vm1044_vm3, %v2919_v5 }
 0x4dd   : > { %6332 = vmatmul.msk.f32.gmra.mxu1 %vm1044_vm3, %v3093_v23 }
 0x4de   : > { %6484 = vmatpush.msk.msra.mxu1 %vm1148_vm2, %v6483_v0 }
 0x4df   : > { %v2374_v59 = vpop.f32.mrf.mxu2  ;;  %v2535_v27 = vpop.f32.mrf.mxu3 }
 0x4e0   : > { %v2569_v28 = vadd.f32 %v2535_v27, %v2402_v46  ;;  %v3749_v46 = vld [vmem:[#allocation2 + $0x3d] sm:$0xff] }
 0x4e1   : > { %v2927_v59 = vld [vmem:[#allocation2 + $0x99] sm:$0xff] }
 0x4e2   : > { %v8242_v42 = vpop.f32.mrf.mxu1  ;;  %v8245_v9 = vadd.f32 %v8166_v57, %v2569_v28  ;;  %v3245_v28 = vld [vmem:[#allocation2 + $0x1b] sm:$0xff] }
 0x4e4   : > { %6286 = vmatmul.msk.f32.gmra.mxu2 %vm1044_vm3, %v8042_v63  ;;  %6305 = vmatmul.msk.f32.gmra.mxu3 %vm1044_vm3, %v2920_v62 }
 0x4e5   : > { %6333 = vmatmul.msk.f32.gmra.mxu1 %vm1044_vm3, %v3094_v37  ;;  %v3751_v37 = vld [vmem:[#allocation2 + $0x4d] sm:$0xff] }
 0x4e7   : > { %v2377_v45 = vpop.f32.mrf.mxu2  ;;  %v2538_v3 = vpop.f32.mrf.mxu3 }
 0x4e8   : > { %v2570_v22 = vadd.f32 %v2538_v3, %v2403_v43 }
 0x4ea   : > { %v8251_v11 = vpop.f32.mrf.mxu1  ;;  %v8254_v21 = vadd.f32 %v8176_v58, %v2570_v22  ;;  %v3746_v58 = vld [vmem:[#allocation2 + $0x25] sm:$0xff] }
 0x4ec   : > { %6287 = vmatmul.msk.f32.gmra.mxu2 %vm1044_vm3, %v8055_v30  ;;  %6306 = vmatmul.msk.f32.gmra.mxu3 %vm1044_vm3, %v2921_v56 }
 0x4ed   : > { %6334 = vmatmul.msk.f32.gmra.mxu1 %vm1044_vm3, %v3095_v25  ;;  %v2928_v25 = vld [vmem:[#allocation2 + $0xa1] sm:$0xff] }
 0x4ef   : > { %v2380_v63 = vpop.f32.mrf.mxu2  ;;  %v2541_v57 = vpop.f32.mrf.mxu3 }
 0x4f0   : > { %v3246_v63 = vld [vmem:[#allocation2 + $0x23] sm:$0xff]  ;;  %v3752_v57 = vld [vmem:[#allocation2 + $0x55] sm:$0xff] }
 0x4f2   : > { %v8260_v7 = vpop.f32.mrf.mxu1 }
 0x4f4   : > { %6288 = vmatmul.msk.f32.gmra.mxu2 %vm1044_vm3, %v8068_v61  ;;  %6307 = vmatmul.msk.f32.gmra.mxu3 %vm1044_vm3, %v2922_v4 }
 0x4f5   : > { %6401 = vmatmul.msk.f32.vlgmr.msrb.gmra.mxu1 %vm1044_vm3, %v3746_v58 }
 0x4f7   : > { %v2383_v24 = vpop.f32.mrf.mxu2  ;;  %v2544_v53 = vpop.f32.mrf.mxu3 }
 0x4fa   : > { %v8266_v30 = vpop.f32.mrf.mxu1 }
 0x4fc   : > { %6289 = vmatmul.msk.f32.gmra.mxu2 %vm1044_vm3, %v8078_v60  ;;  %6308 = vmatmul.msk.f32.gmra.mxu3 %vm1044_vm3, %v2923_v52 }
 0x4fd   : > { %6402 = vmatmul.msk.f32.gmra.mxu1 %vm1044_vm3, %v3747_v19  ;;  %v3412_v19 = vld [vmem:[#allocation2 + $0x1c] sm:$0xff] }
 0x4ff   : > { %v2386_v16 = vpop.f32.mrf.mxu2  ;;  %v2547_v61 = vpop.f32.mrf.mxu3 }
 0x500   : > { %v3753_v16 = vld [vmem:[#allocation2 + $0x5d] sm:$0xff] }
 0x502   : > { %v8274_v44 = vpop.f32.mrf.mxu1 }
 0x504   : > { %6290 = vmatmul.msk.f32.gmra.mxu2 %vm1044_vm3, %v8272_v40  ;;  %6309 = vmatmul.msk.f32.gmra.mxu3 %vm1044_vm3, %v2924_v32 }
 0x505   : > { %6403 = vmatmul.msk.f32.gmra.mxu1 %vm1044_vm3, %v3748_v35 }
 0x507   : > { %v2389_v60 = vpop.f32.mrf.mxu2  ;;  %v2550_v29 = vpop.f32.mrf.mxu3 }
 0x50a   : > { %v8282_v20 = vpop.f32.mrf.mxu1 }
 0x50c   : > { %6291 = vmatmul.msk.f32.gmra.mxu2 %vm1044_vm3, %v8280_v2  ;;  %6310 = vmatmul.msk.f32.gmra.mxu3 %vm1044_vm3, %v2925_v51  ;;  %v3754_v51 = vld [vmem:[#allocation2 + $0x65] sm:$0xff] }
 0x50d   : > { %6404 = vmatmul.msk.f32.gmra.mxu1 %vm1044_vm3, %v3749_v46 }
 0x50f   : > { %v2553_v1 = vpop.f32.mrf.mxu3  ;;  %v2839_v15 = vpop.f32.mrf.mxu2 }
 0x510   : > { %v2893_v6 = vadd.f32 %v2839_v15, %v8149_v33 }
 0x512   : > { %v8299_v43 = vpop.f32.mrf.mxu1 }
 0x514   : > { %6292 = vmatmul.msk.f32.gmra.mxu2 %vm1044_vm3, %v8297_v26  ;;  %6311 = vmatmul.msk.f32.gmra.mxu3 %vm1044_vm3, %v2926_v8  ;;  %v3414_v8 = vld [vmem:[#allocation2 + $0x2c] sm:$0xff] }
 0x515   : > { %6405 = vmatmul.msk.f32.gmra.mxu1 %vm1044_vm3, %v3750_v55  ;;  %v3755_v55 = vld [vmem:[#allocation2 + $0x6d] sm:$0xff] }
 0x517   : > { %v2556_v33 = vpop.f32.mrf.mxu3  ;;  %v2842_v23 = vpop.f32.mrf.mxu2 }
 0x518   : > { %v2894_v5 = vadd.f32 %v2842_v23, %v8159_v36 }
 0x51a   : > { %v8310_v27 = vpop.f32.mrf.mxu1 }
 0x51c   : > { %6312 = vmatmul.msk.f32.gmra.mxu3 %vm1044_vm3, %v2927_v59  ;;  %6338 = vmatmul.msk.f32.vlgmr.msrb.gmra.mxu2 %vm1044_vm3, %v3245_v28  ;;  %v8355_v28 = vld [vmem:[#allocation2 + $0x34] sm:$0xff] }
 0x51d   : > { %6406 = vmatmul.msk.f32.gmra.mxu1 %vm1044_vm3, %v3751_v37  ;;  %v3756_v37 = vld [vmem:[#allocation2 + $0x75] sm:$0xff] }
 0x51f   : > { %v2845_v62 = vpop.f32.mrf.mxu2  ;;  %v3006_v45 = vpop.f32.mrf.mxu3 }
 0x520   : > { %v2895_v3 = vadd.f32 %v2845_v62, %v8169_v17  ;;  %v3060_v22 = vadd.f32 %v3006_v45, %v2893_v6 }
 0x522   : > { %v8316_v56 = vpop.f32.mrf.mxu1  ;;  %v8319_v36 = vadd.f32 %v8242_v42, %v3060_v22  ;;  %v3247_v42 = vld [vmem:[#allocation2 + $0x2b] sm:$0xff] }
 0x524   : > { %6313 = vmatmul.msk.f32.gmra.mxu3 %vm1044_vm3, %v2928_v25  ;;  %6339 = vmatmul.msk.f32.gmra.mxu2 %vm1044_vm3, %v3246_v63  ;;  %v3251_v25 = vld [vmem:[#allocation2 + $0x4b] sm:$0xff]  ;;  %v8365_v63 = vld [vmem:[#allocation2 + $0x3c] sm:$0xff] }
 0x525   : > { %6407 = vmatmul.msk.f32.gmra.mxu1 %vm1044_vm3, %v3752_v57  ;;  %v3757_v57 = vld [vmem:[#allocation2 + $0x7d] sm:$0xff] }
 0x527   : > { %v2848_v4 = vpop.f32.mrf.mxu2  ;;  %v3009_v58 = vpop.f32.mrf.mxu3 }
 0x528   : > { %v2896_v24 = vadd.f32 %v2848_v4, %v8179_v49  ;;  %v3061_v17 = vadd.f32 %v3009_v58, %v2894_v5 }
 0x52a   : > { %v8325_v53 = vpop.f32.mrf.mxu1  ;;  %v8328_v52 = vadd.f32 %v8251_v11, %v3061_v17  ;;  %v3248_v11 = vld [vmem:[#allocation2 + $0x33] sm:$0xff] }
 0x52c   : > { %6340 = vmatmul.msk.f32.gmra.mxu2 %vm1044_vm3, %v3247_v42  ;;  %6359 = vmatmul.msk.f32.vlgmr.msrb.gmra.mxu3 %vm1044_vm3, %v3412_v19  ;;  %v3252_v19 = vld [vmem:[#allocation2 + $0x53] sm:$0xff] }
 0x52d   : > { %6408 = vmatmul.msk.f32.gmra.mxu1 %vm1044_vm3, %v3753_v16  ;;  %v8378_v16 = vld [vmem:[#allocation2 + $0x44] sm:$0xff] }
 0x52f   : > { %v2851_v61 = vpop.f32.mrf.mxu2  ;;  %v3012_v32 = vpop.f32.mrf.mxu3 }
 0x530   : > { %v2897_v35 = vadd.f32 %v2851_v61, %v8187_v31  ;;  %v3062_v49 = vadd.f32 %v3012_v32, %v2895_v3  ;;  %v3758_v61 = vld [vmem:[#allocation2 + $0x85] sm:$0xff] }
 0x532   : > { %v8334_v60 = vpop.f32.mrf.mxu1  ;;  %v8337_v29 = vadd.f32 %v8260_v7, %v3062_v49  ;;  %v3249_v7 = vld [vmem:[#allocation2 + $0x3b] sm:$0xff] }
 0x534   : > { %6341 = vmatmul.msk.f32.gmra.mxu2 %vm1044_vm3, %v3248_v11  ;;  %6360 = vmatmul.msk.f32.gmra.mxu3 %vm1044_vm3, %v3413_v39 }
 0x535   : > { %6409 = vmatmul.msk.f32.gmra.mxu1 %vm1044_vm3, %v3754_v51  ;;  %v3253_v51 = vld [vmem:[#allocation2 + $0x5b] sm:$0xff] }
 0x537   : > { %v2854_v46 = vpop.f32.mrf.mxu2  ;;  %v3015_v54 = vpop.f32.mrf.mxu3 }
 0x538   : > { %v2898_v1 = vadd.f32 %v2854_v46, %v8195_v38  ;;  %v3063_v31 = vadd.f32 %v3015_v54, %v2896_v24  ;;  %v8391_v46 = vld [vmem:[#allocation2 + $0x4c] sm:$0xff] }
 0x539   : > { %v3759_v54 = vld [vmem:[#allocation2 + $0x8d] sm:$0xff] }
 0x53a   : > { %v8343_v15 = vpop.f32.mrf.mxu1  ;;  %v8346_v6 = vadd.f32 %v8266_v30, %v3063_v31  ;;  %v3250_v30 = vld [vmem:[#allocation2 + $0x43] sm:$0xff] }
 0x53c   : > { %6342 = vmatmul.msk.f32.gmra.mxu2 %vm1044_vm3, %v3249_v7  ;;  %6361 = vmatmul.msk.f32.gmra.mxu3 %vm1044_vm3, %v3414_v8 }
 0x53d   : > { %6410 = vmatmul.msk.f32.gmra.mxu1 %vm1044_vm3, %v3755_v55  ;;  %v3760_v55 = vld [vmem:[#allocation2 + $0x95] sm:$0xff] }
 0x53f   : > { %v2857_v0 = vpop.f32.mrf.mxu2  ;;  %v3018_v33 = vpop.f32.mrf.mxu3 }
 0x540   : > { %v2899_v23 = vadd.f32 %v2857_v0, %v8206_v18  ;;  %v3064_v38 = vadd.f32 %v3018_v33, %v2897_v35  ;;  %v3254_v33 = vld [vmem:[#allocation2 + $0x63] sm:$0xff] }
 0x542   : > { %v3209_v5 = vpop.f32.mrf.mxu1  ;;  %v8353_v59 = vadd.f32 %v8274_v44, %v3064_v38 }
 0x544   : > { %6343 = vmatmul.msk.f32.gmra.mxu2 %vm1044_vm3, %v3250_v30  ;;  %6362 = vmatmul.msk.f32.gmra.mxu3 %vm1044_vm3, %v8355_v28 }
 0x545   : > { %6411 = vmatmul.msk.f32.gmra.mxu1 %vm1044_vm3, %v3756_v37 }
 0x547   : > { %v2860_v62 = vpop.f32.mrf.mxu2  ;;  %v3021_v45 = vpop.f32.mrf.mxu3 }
 0x548   : > { %v2900_v18 = vadd.f32 %v2860_v62, %v8217_v14  ;;  %v3065_v3 = vadd.f32 %v3021_v45, %v2898_v1  ;;  %v3761_v62 = vld [vmem:[#allocation2 + $0x9d] sm:$0xff]  ;;  %v3255_v45 = vld [vmem:[#allocation2 + $0x6b] sm:$0xff] }
 0x54a   : > { %v3212_v22 = vpop.f32.mrf.mxu1  ;;  %v8363_v44 = vadd.f32 %v8282_v20, %v3065_v3  ;;  %v6419_v20 = vld [vmem:[%s9158_s3 + $0x110] sm:$0xff]  ;;  %v8420_v3 = vpop.f32.mrf.mxu0 }
 0x54b   : > { %4006 = vmatpush.msra.mxu2 %v6419_v20 }
 0x54c   : > { %6344 = vmatmul.msk.f32.gmra.mxu2 %vm1044_vm3, %v3251_v25  ;;  %6363 = vmatmul.msk.f32.gmra.mxu3 %vm1044_vm3, %v8365_v63 }
 0x54d   : > { %6412 = vmatmul.msk.f32.gmra.mxu1 %vm1044_vm3, %v3757_v57 }
 0x54f   : > { %v2863_v4 = vpop.f32.mrf.mxu2  ;;  %v3024_v58 = vpop.f32.mrf.mxu3 }
 0x550   : > { %v2901_v14 = vadd.f32 %v2863_v4, %v8228_v48  ;;  %v3066_v24 = vadd.f32 %v3024_v58, %v2899_v23  ;;  %v6440_v48 = vld [vmem:[%s9158_s3 + $0x120] sm:$0xff]  ;;  %v8404_v23 = vld [vmem:[#allocation2 + $0x54] sm:$0xff] }
 0x551   : > { %4173 = vmatpush.msra.mxu3 %v6440_v48  ;;  %v3762_v4 = vld [vmem:[#allocation2 + $0xa5] sm:$0xff] }
 0x552   : > { %v3215_v17 = vpop.f32.mrf.mxu1  ;;  %v8376_v42 = vadd.f32 %v8299_v43, %v3066_v24  ;;  %v8427_v24 = vld [vmem:[#allocation2 + $0x64] sm:$0xff] }
 0x554   : > { %6345 = vmatmul.msk.f32.gmra.mxu2 %vm1044_vm3, %v3252_v19  ;;  %6364 = vmatmul.msk.f32.gmra.mxu3 %vm1044_vm3, %v8378_v16 }
 0x555   : > { %6413 = vmatmul.msk.f32.gmra.mxu1 %vm1044_vm3, %v3758_v61  ;;  %v8434_v61 = vpop.f32.mrf.mxu0 }
 0x557   : > { %v2866_v32 = vpop.f32.mrf.mxu2  ;;  %v3027_v43 = vpop.f32.mrf.mxu3 }
 0x558   : > { %v2902_v35 = vadd.f32 %v2866_v32, %v8236_v13  ;;  %v3067_v49 = vadd.f32 %v3027_v43, %v2900_v18  ;;  %v6482_v13 = vld [vmem:[%s9158_s3 + $0x140] sm:$0xff] }
 0x559   : > { %4507 = vmatpush.msra.mxu1 %v6482_v13  ;;  %v8414_v18 = vld [vmem:[#allocation2 + $0x5c] sm:$0xff] }
 0x55a   : > { %v3218_v11 = vpop.f32.mrf.mxu1  ;;  %v8389_v39 = vadd.f32 %v8310_v27, %v3067_v49  ;;  %v3261_v32 = vld [vmem:[#allocation2 + $0x9b] sm:$0xff]  ;;  %v8441_v49 = vld [vmem:[#allocation2 + $0x6c] sm:$0xff]  ;;  %v3262_v13 = vld [vmem:[#allocation2 + $0xa3] sm:$0xff] }
 0x55c   : > { %6346 = vmatmul.msk.f32.gmra.mxu2 %vm1044_vm3, %v3253_v51  ;;  %6365 = vmatmul.msk.f32.gmra.mxu3 %vm1044_vm3, %v8391_v46 }
 0x55d   : > { %6414 = vmatmul.msk.f32.gmra.mxu1 %vm1044_vm3, %v3759_v54 }
 0x55f   : > { %v2869_v1 = vpop.f32.mrf.mxu2  ;;  %v3030_v31 = vpop.f32.mrf.mxu3 }
 0x560   : > { %v2903_v27 = vadd.f32 %v2869_v1, %v8245_v9  ;;  %v3068_v7 = vadd.f32 %v3030_v31, %v2901_v14  ;;  %v3256_v14 = vld [vmem:[#allocation2 + $0x73] sm:$0xff]  ;;  %v8450_v1 = vpop.f32.mrf.mxu0 }
 0x561   : > { %v8452_v31 = vld [vmem:[#allocation2 + $0x74] sm:$0xff] }
 0x562   : > { %v3221_v8 = vpop.f32.mrf.mxu1  ;;  %v8402_v0 = vadd.f32 %v8316_v56, %v3068_v7 }
 0x564   : > { %6347 = vmatmul.msk.f32.gmra.mxu2 %vm1044_vm3, %v3254_v33  ;;  %6366 = vmatmul.msk.f32.gmra.mxu3 %vm1044_vm3, %v8404_v23  ;;  %v3259_v33 = vld [vmem:[#allocation2 + $0x8b] sm:$0xff] }
 0x565   : > { %6415 = vmatmul.msk.f32.gmra.mxu1 %vm1044_vm3, %v3760_v55 }
 0x567   : > { %v2872_v38 = vpop.f32.mrf.mxu2  ;;  %v3033_v5 = vpop.f32.mrf.mxu3 }
 0x568   : > { %v2904_v9 = vadd.f32 %v2872_v38, %v8254_v21  ;;  %v3069_v30 = vadd.f32 %v3033_v5, %v2902_v35  ;;  %v3257_v35 = vld [vmem:[#allocation2 + $0x7b] sm:$0xff] }
 0x569   : > { %v8461_v38 = vld [vmem:[#allocation2 + $0x7c] sm:$0xff] }
 0x56a   : > { %v3224_v37 = vpop.f32.mrf.mxu1  ;;  %v8412_v56 = vadd.f32 %v8325_v53, %v3069_v30  ;;  %v3260_v53 = vld [vmem:[#allocation2 + $0x93] sm:$0xff] }
 0x56b   : > { %6560 = vmatmul.msk.f32.gmra.mxu0 %vm1044_vm3, %v3260_v53  ;;  %v4415_v5 = vld [vmem:[#allocation2 + $0x38] sm:$0xff] }
 0x56c   : > { %6348 = vmatmul.msk.f32.gmra.mxu2 %vm1044_vm3, %v3255_v45  ;;  %6367 = vmatmul.msk.f32.gmra.mxu3 %vm1044_vm3, %v8414_v18  ;;  %v4416_v45 = vld [vmem:[#allocation2 + $0x40] sm:$0xff] }
 0x56d   : > { %6416 = vmatmul.msk.f32.gmra.mxu1 %vm1044_vm3, %v3761_v62  ;;  %v8469_v62 = vld [vmem:[#allocation2 + $0x84] sm:$0xff] }
 0x56f   : > { %v2875_v22 = vpop.f32.mrf.mxu2  ;;  %v3036_v21 = vpop.f32.mrf.mxu3 }
 0x570   : > { %v3070_v25 = vadd.f32 %v3036_v21, %v2903_v27  ;;  %v4414_v27 = vld [vmem:[#allocation2 + $0x30] sm:$0xff] }
 0x572   : > { %v8422_v57 = vpop.f32.mrf.mxu1  ;;  %v8425_v58 = vadd.f32 %v8334_v60, %v3070_v25  ;;  %v3763_v60 = vld [vmem:[#allocation2 + $0xad] sm:$0xff] }
 0x573   : > { %6561 = vmatmul.msk.f32.gmra.mxu0 %vm1044_vm3, %v3261_v32 }
 0x574   : > { %6349 = vmatmul.msk.f32.gmra.mxu2 %vm1044_vm3, %v3256_v14  ;;  %6368 = vmatmul.msk.f32.gmra.mxu3 %vm1044_vm3, %v8427_v24  ;;  %v8480_v14 = vld [vmem:[#allocation2 + $0x8c] sm:$0xff] }
 0x575   : > { %6417 = vmatmul.msk.f32.gmra.mxu1 %vm1044_vm3, %v3762_v4  ;;  %v6504_v4 = vld [vmem:[%s9158_s3 + $0x158] sm:$0x3] }
 0x576   : > { %6505 = vmatpush.msk.msrb.mxu2 %vm1148_vm2, %v6504_v4 }
 0x577   : > { %v2878_v17 = vpop.f32.mrf.mxu2  ;;  %v3039_v20 = vpop.f32.mrf.mxu3 }
 0x578   : > { %v3071_v19 = vadd.f32 %v3039_v20, %v2904_v9  ;;  %v6525_v17 = vld [vmem:[%s9158_s3 + $0x168] sm:$0x3] }
 0x579   : > { %6526 = vmatpush.msk.msrb.mxu3 %vm1148_vm2, %v6525_v17  ;;  %v4420_v17 = vld [vmem:[#allocation2 + $0x60] sm:$0xff] }
 0x57a   : > { %v8436_v48 = vpop.f32.mrf.mxu1  ;;  %v8439_v43 = vadd.f32 %v8343_v15, %v3071_v19  ;;  %v3258_v15 = vld [vmem:[#allocation2 + $0x83] sm:$0xff] }
 0x57b   : > { %6562 = vmatmul.msk.f32.gmra.mxu0 %vm1044_vm3, %v3262_v13 }
 0x57c   : > { %6350 = vmatmul.msk.f32.gmra.mxu2 %vm1044_vm3, %v3257_v35  ;;  %6369 = vmatmul.msk.f32.gmra.mxu3 %vm1044_vm3, %v8441_v49  ;;  %v8492_v35 = vld [vmem:[#allocation2 + $0x94] sm:$0xff] }
 0x57d   : > { %6418 = vmatmul.msk.f32.gmra.mxu1 %vm1044_vm3, %v3763_v60 }
 0x57f   : > { %v2881_v11 = vpop.f32.mrf.mxu2  ;;  %v3042_v51 = vpop.f32.mrf.mxu3 }
 0x580   : > { %v6567_v51 = vld [vmem:[%s9158_s3 + $0x188] sm:$0x3] }
 0x581   : > { %6568 = vmatpush.msk.msrb.mxu1 %vm1148_vm2, %v6567_v51  ;;  %v9192_v51 = vld [vmem:[#allocation8_spill] sm:$0xff] }
 0x582   : > { %v8448_v54 = vpop.f32.mrf.mxu1 }
 0x584   : > { %6351 = vmatmul.msk.f32.gmra.mxu2 %vm1044_vm3, %v3258_v15  ;;  %6370 = vmatmul.msk.f32.gmra.mxu3 %vm1044_vm3, %v8452_v31 }
 0x585   : > { %6485 = vmatmul.msk.f32.vlgmr.msra.gmra.mxu1 %vm1044_vm3, %v4414_v27 }
 0x587   : > { %v2884_v7 = vpop.f32.mrf.mxu2  ;;  %v3045_v8 = vpop.f32.mrf.mxu3 }
 0x588   : > { %v8505_v7 = vld [vmem:[#allocation2 + $0x9c] sm:$0xff] }
 0x58a   : > { %v8459_v55 = vpop.f32.mrf.mxu1 }
 0x58c   : > { %6352 = vmatmul.msk.f32.gmra.mxu2 %vm1044_vm3, %v3259_v33  ;;  %6371 = vmatmul.msk.f32.gmra.mxu3 %vm1044_vm3, %v8461_v38  ;;  %v4419_v33 = vld [vmem:[#allocation2 + $0x58] sm:$0xff] }
 0x58d   : > { %6486 = vmatmul.msk.f32.gmra.mxu1 %vm1044_vm3, %v4415_v5 }
 0x58f   : > { %v2887_v9 = vpop.f32.mrf.mxu2  ;;  %v3048_v30 = vpop.f32.mrf.mxu3 }
 0x592   : > { %v8467_v37 = vpop.f32.mrf.mxu1 }
 0x594   : > { %6353 = vmatmul.msk.f32.gmra.mxu2 %vm1044_vm3, %v3260_v53  ;;  %6372 = vmatmul.msk.f32.gmra.mxu3 %vm1044_vm3, %v8469_v62  ;;  %v4417_v53 = vld [vmem:[#allocation2 + $0x48] sm:$0xff] }
 0x595   : > { %6487 = vmatmul.msk.f32.gmra.mxu1 %vm1044_vm3, %v4416_v45 }
 0x597   : > { %v2890_v22 = vpop.f32.mrf.mxu2  ;;  %v3051_v21 = vpop.f32.mrf.mxu3 }
 0x598   : > { %v8514_v22 = vld [vmem:[#allocation2 + $0xa4] sm:$0xff] }
 0x59a   : > { %v8475_v25 = vpop.f32.mrf.mxu1 }
 0x59c   : > { %6354 = vmatmul.msk.f32.gmra.mxu2 %vm1044_vm3, %v3261_v32  ;;  %6373 = vmatmul.msk.f32.gmra.mxu3 %vm1044_vm3, %v8480_v14  ;;  %v4418_v32 = vld [vmem:[#allocation2 + $0x50] sm:$0xff] }
 0x59d   : > { %6488 = vmatmul.msk.f32.gmra.mxu1 %vm1044_vm3, %v4417_v53  ;;  %v3914_v53 = vld [vmem:[#allocation2 + $0x2e] sm:$0xff] }
 0x59f   : > { %v3054_v20 = vpop.f32.mrf.mxu3  ;;  %v3340_v19 = vpop.f32.mrf.mxu2 }
 0x5a0   : > { %v3394_v60 = vadd.f32 %v3340_v19, %v8319_v36 }
 0x5a2   : > { %v8494_v11 = vpop.f32.mrf.mxu1 }
 0x5a4   : > { %6355 = vmatmul.msk.f32.gmra.mxu2 %vm1044_vm3, %v3262_v13  ;;  %6374 = vmatmul.msk.f32.gmra.mxu3 %vm1044_vm3, %v8492_v35  ;;  %v3913_v13 = vld [vmem:[#allocation2 + $0x26] sm:$0xff] }
 0x5a5   : > { %6489 = vmatmul.msk.f32.gmra.mxu1 %vm1044_vm3, %v4418_v32 }
 0x5a7   : > { %v3057_v15 = vpop.f32.mrf.mxu3  ;;  %v3343_v36 = vpop.f32.mrf.mxu2 }
 0x5a8   : > { %v3395_v27 = vadd.f32 %v3343_v36, %v8328_v52  ;;  %v9191_v52 = vld [vmem:[#allocation9_spill] sm:$0xff] }
 0x5aa   : > { %v8507_v8 = vpop.f32.mrf.mxu1 }
 0x5ac   : > { %6375 = vmatmul.msk.f32.gmra.mxu3 %vm1044_vm3, %v8505_v7  ;;  %6422 = vmatmul.msk.f32.vlgmr.msra.gmra.mxu2 %vm1044_vm3, %v3913_v13  ;;  %v3915_v13 = vld [vmem:[#allocation2 + $0x36] sm:$0xff] }
 0x5ad   : > { %6490 = vmatmul.msk.f32.gmra.mxu1 %vm1044_vm3, %v4419_v33  ;;  %v4080_v33 = vld [vmem:[#allocation2 + $0x27] sm:$0xff] }
 0x5af   : > { %v3346_v5 = vpop.f32.mrf.mxu2  ;;  %v3507_v9 = vpop.f32.mrf.mxu3 }
 0x5b0   : > { %v3396_v30 = vadd.f32 %v3346_v5, %v8337_v29  ;;  %v3561_v45 = vadd.f32 %v3507_v9, %v3394_v60  ;;  %v4421_v5 = vld [vmem:[#allocation2 + $0x68] sm:$0xff] }
 0x5b2   : > { %v3728_v21 = vadd.f32 %v9191_v52, %v3561_v45  ;;  %v8517_v4 = vpop.f32.mrf.mxu1  ;;  %v9193_v52 = vld [vmem:[#allocation7_spill] sm:$0xff] }
 0x5b4   : > { %6376 = vmatmul.msk.f32.gmra.mxu3 %vm1044_vm3, %v8514_v22  ;;  %6423 = vmatmul.msk.f32.gmra.mxu2 %vm1044_vm3, %v3914_v53  ;;  %v8523_v20 = vadd.f32 %v8422_v57, %v3728_v21 }
 0x5b5   : > { %6491 = vmatmul.msk.f32.gmra.mxu1 %vm1044_vm3, %v4420_v17  ;;  %v3916_v17 = vld [vmem:[#allocation2 + $0x3e] sm:$0xff] }
 0x5b7   : > { %v3349_v29 = vpop.f32.mrf.mxu2  ;;  %v3510_v19 = vpop.f32.mrf.mxu3 }
 0x5b8   : > { %v3397_v60 = vadd.f32 %v3349_v29, %v8346_v6  ;;  %v3562_v32 = vadd.f32 %v3510_v19, %v3395_v27  ;;  %v4081_v29 = vld [vmem:[#allocation2 + $0x2f] sm:$0xff] }
 0x5b9   : > { %v4422_v19 = vld [vmem:[#allocation2 + $0x70] sm:$0xff] }
 0x5ba   : > { %v3729_v15 = vadd.f32 %v9192_v51, %v3562_v32  ;;  %v8528_v36 = vpop.f32.mrf.mxu1 }
 0x5bc   : > { %6424 = vmatmul.msk.f32.gmra.mxu2 %vm1044_vm3, %v3915_v13  ;;  %6443 = vmatmul.msk.f32.vlgmr.msra.gmra.mxu3 %vm1044_vm3, %v4080_v33  ;;  %v8533_v57 = vadd.f32 %v8436_v48, %v3729_v15  ;;  %v9194_v15 = vld [vmem:[#allocation10_spill] sm:$0xff] }
 0x5bd   : > { %6492 = vmatmul.msk.f32.gmra.mxu1 %vm1044_vm3, %v4421_v5  ;;  %v3917_v5 = vld [vmem:[#allocation2 + $0x46] sm:$0xff] }
 0x5bf   : > { %v3352_v9 = vpop.f32.mrf.mxu2  ;;  %v3513_v45 = vpop.f32.mrf.mxu3 }
 0x5c0   : > { %v3398_v6 = vadd.f32 %v3352_v9, %v8353_v59  ;;  %v3563_v27 = vadd.f32 %v3513_v45, %v3396_v30  ;;  %v4082_v9 = vld [vmem:[#allocation2 + $0x37] sm:$0xff] }
 0x5c1   : > { %v4423_v45 = vld [vmem:[#allocation2 + $0x78] sm:$0xff] }
 0x5c2   : > { %v3730_v21 = vadd.f32 %v9193_v52, %v3563_v27  ;;  %v8538_v53 = vpop.f32.mrf.mxu1 }
 0x5c4   : > { %6425 = vmatmul.msk.f32.gmra.mxu2 %vm1044_vm3, %v3916_v17  ;;  %6444 = vmatmul.msk.f32.gmra.mxu3 %vm1044_vm3, %v4081_v29  ;;  %v8543_v48 = vadd.f32 %v8448_v54, %v3730_v21  ;;  %v9195_v21 = vld [vmem:[#allocation11_spill] sm:$0xff] }
 0x5c5   : > { %6493 = vmatmul.msk.f32.gmra.mxu1 %vm1044_vm3, %v4422_v19  ;;  %v3918_v19 = vld [vmem:[#allocation2 + $0x4e] sm:$0xff] }
 0x5c7   : > { %v3355_v32 = vpop.f32.mrf.mxu2  ;;  %v3516_v51 = vpop.f32.mrf.mxu3 }
 0x5c8   : > { %v3399_v59 = vadd.f32 %v3355_v32, %v8363_v44  ;;  %v3564_v30 = vadd.f32 %v3516_v51, %v3397_v60  ;;  %v4083_v32 = vld [vmem:[#allocation2 + $0x3f] sm:$0xff] }
 0x5c9   : > { %v4424_v51 = vld [vmem:[#allocation2 + $0x80] sm:$0xff] }
 0x5ca   : > { %v3731_v13 = vadd.f32 %v9194_v15, %v3564_v30  ;;  %v8548_v33 = vpop.f32.mrf.mxu1 }
 0x5cc   : > { %6426 = vmatmul.msk.f32.gmra.mxu2 %vm1044_vm3, %v3917_v5  ;;  %6445 = vmatmul.msk.f32.gmra.mxu3 %vm1044_vm3, %v4082_v9  ;;  %v8553_v54 = vadd.f32 %v8459_v55, %v3731_v13  ;;  %v9196_v13 = vld [vmem:[#allocation12_spill] sm:$0xff] }
 0x5cd   : > { %6494 = vmatmul.msk.f32.gmra.mxu1 %vm1044_vm3, %v4423_v45  ;;  %v3919_v45 = vld [vmem:[#allocation2 + $0x56] sm:$0xff] }
 0x5cf   : > { %v3358_v27 = vpop.f32.mrf.mxu2  ;;  %v3519_v52 = vpop.f32.mrf.mxu3 }
 0x5d0   : > { %v3400_v44 = vadd.f32 %v3358_v27, %v8376_v42  ;;  %v3565_v60 = vadd.f32 %v3519_v52, %v3398_v6  ;;  %v4084_v27 = vld [vmem:[#allocation2 + $0x47] sm:$0xff] }
 0x5d1   : > { %v4425_v52 = vld [vmem:[#allocation2 + $0x88] sm:$0xff] }
 0x5d2   : > { %v3732_v17 = vadd.f32 %v9195_v21, %v3565_v60  ;;  %v3877_v29 = vpop.f32.mrf.mxu1 }
 0x5d4   : > { %6427 = vmatmul.msk.f32.gmra.mxu2 %vm1044_vm3, %v3918_v19  ;;  %6446 = vmatmul.msk.f32.gmra.mxu3 %vm1044_vm3, %v4083_v32  ;;  %v8561_v55 = vadd.f32 %v8467_v37, %v3732_v17  ;;  %v9197_v17 = vld [vmem:[#allocation13_spill] sm:$0xff]  ;;  %v6503_v32 = vld [vmem:[%s9158_s3 + $0x150] sm:$0xff] }
 0x5d5   : > { %6495 = vmatmul.msk.f32.gmra.mxu1 %vm1044_vm3, %v4424_v51  ;;  %v3920_v51 = vld [vmem:[#allocation2 + $0x5e] sm:$0xff]  ;;  %4674 = vmatpush.msrb.mxu2 %v6503_v32 }
 0x5d6   : > { %v4087_v32 = vld [vmem:[#allocation2 + $0x5f] sm:$0xff] }
 0x5d7   : > { %v3361_v30 = vpop.f32.mrf.mxu2  ;;  %v3522_v15 = vpop.f32.mrf.mxu3 }
 0x5d8   : > { %v3401_v42 = vadd.f32 %v3361_v30, %v8389_v39  ;;  %v3566_v6 = vadd.f32 %v3522_v15, %v3399_v59  ;;  %v4085_v30 = vld [vmem:[#allocation2 + $0x4f] sm:$0xff] }
 0x5da   : > { %v3733_v5 = vadd.f32 %v9196_v13, %v3566_v6  ;;  %v3880_v9 = vpop.f32.mrf.mxu1 }
 0x5dc   : > { %6428 = vmatmul.msk.f32.gmra.mxu2 %vm1044_vm3, %v3919_v45  ;;  %6447 = vmatmul.msk.f32.gmra.mxu3 %vm1044_vm3, %v4084_v27  ;;  %v8569_v37 = vadd.f32 %v8475_v25, %v3733_v5  ;;  %v9198_v5 = vld [vmem:[#allocation14_spill] sm:$0xff] }
 0x5dd   : > { %6496 = vmatmul.msk.f32.gmra.mxu1 %vm1044_vm3, %v4425_v52  ;;  %v3921_v27 = vld [vmem:[#allocation2 + $0x66] sm:$0xff]  ;;  %v4086_v52 = vld [vmem:[#allocation2 + $0x57] sm:$0xff] }
 0x5df   : > { %v3364_v60 = vpop.f32.mrf.mxu2  ;;  %v3525_v21 = vpop.f32.mrf.mxu3 }
 0x5e0   : > { %v3402_v39 = vadd.f32 %v3364_v60, %v8402_v0  ;;  %v3567_v59 = vadd.f32 %v3525_v21, %v3400_v44  ;;  %v6524_v0 = vld [vmem:[%s9158_s3 + $0x160] sm:$0xff] }
 0x5e1   : > { %4841 = vmatpush.msrb.mxu3 %v6524_v0 }
 0x5e2   : > { %v3734_v29 = vadd.f32 %v9197_v17, %v3567_v59  ;;  %v3883_v19 = vpop.f32.mrf.mxu1  ;;  %v9199_v59 = vld [vmem:[#allocation15_spill] sm:$0xff] }
 0x5e3   : > { %v3922_v19 = vld [vmem:[#allocation2 + $0x6e] sm:$0xff] }
 0x5e4   : > { %6429 = vmatmul.msk.f32.gmra.mxu2 %vm1044_vm3, %v3920_v51  ;;  %6448 = vmatmul.msk.f32.gmra.mxu3 %vm1044_vm3, %v4085_v30  ;;  %v8580_v25 = vadd.f32 %v8494_v11, %v3734_v29  ;;  %v9200_v30 = vld [vmem:[#allocation16_spill] sm:$0xff] }
 0x5e5   : > { %6497 = vmatmul.msk.f32.gmra.mxu1 %vm1044_vm3, %v8272_v40 }
 0x5e7   : > { %v3367_v44 = vpop.f32.mrf.mxu2  ;;  %v3528_v15 = vpop.f32.mrf.mxu3 }
 0x5e8   : > { %v3403_v6 = vadd.f32 %v3367_v44, %v8412_v56  ;;  %v3568_v13 = vadd.f32 %v3528_v15, %v3401_v42  ;;  %v6566_v56 = vld [vmem:[%s9158_s3 + $0x180] sm:$0xff]  ;;  %v4429_v15 = vld [vmem:[#allocation2 + $0xa8] sm:$0xff] }
 0x5e9   : > { %5175 = vmatpush.msrb.mxu1 %v6566_v56  ;;  %v3924_v56 = vld [vmem:[#allocation2 + $0x7e] sm:$0xff] }
 0x5ea   : > { %v3735_v9 = vadd.f32 %v9198_v5, %v3568_v13  ;;  %v3886_v45 = vpop.f32.mrf.mxu1  ;;  %v3923_v13 = vld [vmem:[#allocation2 + $0x76] sm:$0xff]  ;;  %v4088_v5 = vld [vmem:[#allocation2 + $0x67] sm:$0xff] }
 0x5ec   : > { %6430 = vmatmul.msk.f32.gmra.mxu2 %vm1044_vm3, %v3921_v27  ;;  %6449 = vmatmul.msk.f32.gmra.mxu3 %vm1044_vm3, %v4086_v52  ;;  %v8592_v40 = vadd.f32 %v8507_v8, %v3735_v9  ;;  %v4430_v52 = vld [vmem:[#allocation2 + $0xb0] sm:$0xff] }
 0x5ed   : > { %6498 = vmatmul.msk.f32.gmra.mxu1 %vm1044_vm3, %v8280_v2 }
 0x5ef   : > { %v3370_v11 = vpop.f32.mrf.mxu2  ;;  %v3531_v42 = vpop.f32.mrf.mxu3 }
 0x5f0   : > { %v3404_v60 = vadd.f32 %v3370_v11, %v8425_v58  ;;  %v3569_v21 = vadd.f32 %v3531_v42, %v3402_v39  ;;  %v4089_v11 = vld [vmem:[#allocation2 + $0x6f] sm:$0xff] }
 0x5f2   : > { %v3736_v17 = vadd.f32 %v9199_v59, %v3569_v21  ;;  %v3889_v29 = vpop.f32.mrf.mxu1 }
 0x5f4   : > { %6431 = vmatmul.msk.f32.gmra.mxu2 %vm1044_vm3, %v3922_v19  ;;  %6450 = vmatmul.msk.f32.gmra.mxu3 %vm1044_vm3, %v4087_v32  ;;  %v8604_v2 = vadd.f32 %v8517_v4, %v3736_v17  ;;  %v4431_v19 = vld [vmem:[#allocation2 + $0xb8] sm:$0xff]  ;;  %v3925_v32 = vld [vmem:[#allocation2 + $0x86] sm:$0xff] }
 0x5f5   : > { %6499 = vmatmul.msk.f32.gmra.mxu1 %vm1044_vm3, %v8297_v26 }
 0x5f7   : > { %v3373_v8 = vpop.f32.mrf.mxu2  ;;  %v3534_v51 = vpop.f32.mrf.mxu3 }
 0x5f8   : > { %v3405_v58 = vadd.f32 %v3373_v8, %v8439_v43  ;;  %v3570_v39 = vadd.f32 %v3534_v51, %v3403_v6  ;;  %v9201_v43 = vld [vmem:[#allocation17_spill] sm:$0xff] }
 0x5f9   : > { %v4090_v8 = vld [vmem:[#allocation2 + $0x77] sm:$0xff] }
 0x5fa   : > { %v3737_v0 = vadd.f32 %v9200_v30, %v3570_v39  ;;  %v3892_v44 = vpop.f32.mrf.mxu1 }
 0x5fc   : > { %6432 = vmatmul.msk.f32.gmra.mxu2 %vm1044_vm3, %v3923_v13  ;;  %6451 = vmatmul.msk.f32.gmra.mxu3 %vm1044_vm3, %v4088_v5  ;;  %v8613_v4 = vadd.f32 %v8528_v36, %v3737_v0  ;;  %v4091_v0 = vld [vmem:[#allocation2 + $0x7f] sm:$0xff]  ;;  %v3927_v13 = vld [vmem:[#allocation2 + $0x96] sm:$0xff]  ;;  %v4092_v5 = vld [vmem:[#allocation2 + $0x87] sm:$0xff] }
 0x5fd   : > { %6500 = vmatmul.msk.f32.gmra.mxu1 %vm1044_vm3, %v4429_v15 }
 0x5ff   : > { %v3376_v26 = vpop.f32.mrf.mxu2  ;;  %v3537_v9 = vpop.f32.mrf.mxu3 }
 0x600   : > { %v3571_v45 = vadd.f32 %v3537_v9, %v3404_v60  ;;  %v9202_v60 = vld [vmem:[#allocation18_spill] sm:$0xff] }
 0x602   : > { %v3738_v6 = vadd.f32 %v9201_v43, %v3571_v45  ;;  %v8617_v27 = vpop.f32.mrf.mxu1  ;;  %v3928_v45 = vld [vmem:[#allocation2 + $0x9e] sm:$0xff]  ;;  %v4093_v43 = vld [vmem:[#allocation2 + $0x8f] sm:$0xff] }
 0x604   : > { %6433 = vmatmul.msk.f32.gmra.mxu2 %vm1044_vm3, %v3924_v56  ;;  %6452 = vmatmul.msk.f32.gmra.mxu3 %vm1044_vm3, %v4089_v11  ;;  %v8622_v42 = vadd.f32 %v8538_v53, %v3738_v6  ;;  %v3929_v56 = vld [vmem:[#allocation2 + $0xa6] sm:$0xff]  ;;  %v4094_v11 = vld [vmem:[#allocation2 + $0x97] sm:$0xff] }
 0x605   : > { %6501 = vmatmul.msk.f32.gmra.mxu1 %vm1044_vm3, %v4430_v52 }
 0x607   : > { %v3379_v36 = vpop.f32.mrf.mxu2  ;;  %v3540_v21 = vpop.f32.mrf.mxu3 }
 0x608   : > { %v3572_v59 = vadd.f32 %v3540_v21, %v3405_v58  ;;  %v3926_v58 = vld [vmem:[#allocation2 + $0x8e] sm:$0xff] }
 0x60a   : > { %v3739_v17 = vadd.f32 %v9202_v60, %v3572_v59  ;;  %v8626_v29 = vpop.f32.mrf.mxu1  ;;  %v3930_v60 = vld [vmem:[#allocation2 + $0xae] sm:$0xff] }
 0x60c   : > { %6434 = vmatmul.msk.f32.gmra.mxu2 %vm1044_vm3, %v3925_v32  ;;  %6453 = vmatmul.msk.f32.gmra.mxu3 %vm1044_vm3, %v4090_v8  ;;  %v8631_v51 = vadd.f32 %v8548_v33, %v3739_v17  ;;  %v4095_v17 = vld [vmem:[#allocation2 + $0x9f] sm:$0xff]  ;;  %v4096_v8 = vld [vmem:[#allocation2 + $0xa7] sm:$0xff] }
 0x60d   : > { %6502 = vmatmul.msk.f32.gmra.mxu1 %vm1044_vm3, %v4431_v19 }
 0x60f   : > { %v3382_v53 = vpop.f32.mrf.mxu2  ;;  %v3543_v39 = vpop.f32.mrf.mxu3 }
 0x610   : > { %v4581_v53 = vld [vmem:[#allocation2 + $0x31] sm:$0xff] }
 0x612   : > { %v8634_v30 = vpop.f32.mrf.mxu1 }
 0x614   : > { %6435 = vmatmul.msk.f32.gmra.mxu2 %vm1044_vm3, %v3926_v58  ;;  %6454 = vmatmul.msk.f32.gmra.mxu3 %vm1044_vm3, %v4091_v0  ;;  %v4097_v0 = vld [vmem:[#allocation2 + $0xaf] sm:$0xff] }
 0x615   : > { %6569 = vmatmul.msk.f32.vlgmr.msrb.gmra.mxu1 %vm1044_vm3, %v8355_v28 }
 0x617   : > { %v3385_v44 = vpop.f32.mrf.mxu2  ;;  %v3546_v15 = vpop.f32.mrf.mxu3 }
 0x61a   : > { %v8640_v33 = vpop.f32.mrf.mxu1 }
 0x61c   : > { %6436 = vmatmul.msk.f32.gmra.mxu2 %vm1044_vm3, %v3927_v13  ;;  %6455 = vmatmul.msk.f32.gmra.mxu3 %vm1044_vm3, %v4092_v5 }
 0x61d   : > { %6570 = vmatmul.msk.f32.gmra.mxu1 %vm1044_vm3, %v8365_v63 }
 0x61f   : > { %v3388_v26 = vpop.f32.mrf.mxu2  ;;  %v3549_v9 = vpop.f32.mrf.mxu3 }
 0x622   : > { %v8646_v6 = vpop.f32.mrf.mxu1 }
 0x624   : > { %6437 = vmatmul.msk.f32.gmra.mxu2 %vm1044_vm3, %v3928_v45  ;;  %6456 = vmatmul.msk.f32.gmra.mxu3 %vm1044_vm3, %v4093_v43  ;;  %v4583_v45 = vld [vmem:[#allocation2 + $0x41] sm:$0xff] }
 0x625   : > { %6571 = vmatmul.msk.f32.gmra.mxu1 %vm1044_vm3, %v8378_v16 }
 0x627   : > { %v3391_v28 = vpop.f32.mrf.mxu2  ;;  %v3552_v52 = vpop.f32.mrf.mxu3 }
 0x62a   : > { %v8656_v63 = vpop.f32.mrf.mxu1 }
 0x62c   : > { %6438 = vmatmul.msk.f32.gmra.mxu2 %vm1044_vm3, %v3929_v56  ;;  %6457 = vmatmul.msk.f32.gmra.mxu3 %vm1044_vm3, %v4094_v11  ;;  %v4584_v56 = vld [vmem:[#allocation2 + $0x49] sm:$0xff]  ;;  %v4749_v11 = vld [vmem:[#allocation2 + $0x3a] sm:$0xff] }
 0x62d   : > { %6572 = vmatmul.msk.f32.gmra.mxu1 %vm1044_vm3, %v8391_v46 }
 0x62f   : > { %v3555_v36 = vpop.f32.mrf.mxu3  ;;  %v4008_v21 = vpop.f32.mrf.mxu2 }
 0x630   : > { %v4062_v59 = vadd.f32 %v4008_v21, %v8523_v20  ;;  %v8694_v36 = vpop.f32.mrf.mxu0 }
 0x632   : > { %v8663_v32 = vpop.f32.mrf.mxu1 }
 0x634   : > { %6439 = vmatmul.msk.f32.gmra.mxu2 %vm1044_vm3, %v3930_v60  ;;  %6458 = vmatmul.msk.f32.gmra.mxu3 %vm1044_vm3, %v4095_v17  ;;  %v4585_v17 = vld [vmem:[#allocation2 + $0x51] sm:$0xff] }
 0x635   : > { %6573 = vmatmul.msk.f32.gmra.mxu1 %vm1044_vm3, %v8404_v23 }
 0x637   : > { %v3558_v16 = vpop.f32.mrf.mxu3  ;;  %v4011_v19 = vpop.f32.mrf.mxu2 }
 0x638   : > { %v4063_v46 = vadd.f32 %v4011_v19, %v8533_v57  ;;  %v4582_v57 = vld [vmem:[#allocation2 + $0x39] sm:$0xff]  ;;  %v4750_v16 = vld [vmem:[#allocation2 + $0x42] sm:$0xff] }
 0x63a   : > { %v8671_v44 = vpop.f32.mrf.mxu1 }
 0x63c   : > { %6459 = vmatmul.msk.f32.gmra.mxu3 %vm1044_vm3, %v4096_v8  ;;  %6506 = vmatmul.msk.f32.vlgmr.msrb.gmra.mxu2 %vm1044_vm3, %v4581_v53 }
 0x63d   : > { %6574 = vmatmul.msk.f32.gmra.mxu1 %vm1044_vm3, %v8414_v18 }
 0x63f   : > { %v4014_v20 = vpop.f32.mrf.mxu2  ;;  %v4175_v39 = vpop.f32.mrf.mxu3 }
 0x640   : > { %v4064_v58 = vadd.f32 %v4014_v20, %v8543_v48  ;;  %v4229_v23 = vadd.f32 %v4175_v39, %v4062_v59  ;;  %v4586_v20 = vld [vmem:[#allocation2 + $0x59] sm:$0xff]  ;;  %v4751_v39 = vld [vmem:[#allocation2 + $0x4a] sm:$0xff] }
 0x642   : > { %v4396_v15 = vadd.f32 %v7858_v12, %v4229_v23  ;;  %v4748_v12 = vld [vmem:[#allocation2 + $0x32] sm:$0xff]  ;;  %v8683_v43 = vpop.f32.mrf.mxu1 }
 0x644   : > { %6460 = vmatmul.msk.f32.gmra.mxu3 %vm1044_vm3, %v4097_v0  ;;  %6507 = vmatmul.msk.f32.gmra.mxu2 %vm1044_vm3, %v4582_v57  ;;  %v8677_v13 = vadd.f32 %v8617_v27, %v4396_v15  ;;  %v4587_v57 = vld [vmem:[#allocation2 + $0x61] sm:$0xff] }
 0x645   : > { %6575 = vmatmul.msk.f32.gmra.mxu1 %vm1044_vm3, %v8427_v24 }
 0x647   : > { %v4017_v18 = vpop.f32.mrf.mxu2  ;;  %v4178_v5 = vpop.f32.mrf.mxu3 }
 0x648   : > { %v4065_v48 = vadd.f32 %v4017_v18, %v8553_v54  ;;  %v4230_v26 = vadd.f32 %v4178_v5, %v4063_v46  ;;  %v4752_v18 = vld [vmem:[#allocation2 + $0x52] sm:$0xff] }
 0x64a   : > { %v4397_v9 = vadd.f32 %v7874_v47, %v4230_v26 }
 0x64c   : > { %6508 = vmatmul.msk.f32.gmra.mxu2 %vm1044_vm3, %v4583_v45  ;;  %6527 = vmatmul.msk.f32.vlgmr.msrb.gmra.mxu3 %vm1044_vm3, %v4748_v12  ;;  %v8688_v27 = vadd.f32 %v8626_v29, %v4397_v9  ;;  %v6591_v45 = vld [vmem:[%s9160_s5 + $0x28] sm:$0xf] }
 0x64d   : > { %6576 = vmatmul.msk.f32.gmra.mxu1 %vm1044_vm3, %v8441_v49  ;;  %v8703_v49 = vpop.f32.mrf.mxu1  ;;  %v4588_v12 = vld [vmem:[#allocation2 + $0x69] sm:$0xff]  ;;  %6592 = vmatpush.msk.msra.mxu3 %vm5323_vm5, %v6591_v45 }
 0x64f   : > { %v4020_v24 = vpop.f32.mrf.mxu2  ;;  %v4181_v28 = vpop.f32.mrf.mxu3 }
 0x650   : > { %v4066_v54 = vadd.f32 %v4020_v24, %v8561_v55  ;;  %v4231_v52 = vadd.f32 %v4181_v28, %v4064_v58 }
 0x652   : > { %v4398_v47 = vadd.f32 %v7895_v10, %v4231_v52 }
 0x654   : > { %6509 = vmatmul.msk.f32.gmra.mxu2 %vm1044_vm3, %v4584_v56  ;;  %6528 = vmatmul.msk.f32.gmra.mxu3 %vm1044_vm3, %v4749_v11  ;;  %v8699_v29 = vadd.f32 %v8634_v30, %v4398_v47  ;;  %v6596_v47 = vld [vmem:[%s9160_s5 + $0x40] sm:$0xf]  ;;  %v4589_v56 = vld [vmem:[#allocation2 + $0x71] sm:$0xff] }
 0x655   : > { %6577 = vmatmul.msk.f32.gmra.mxu1 %vm1044_vm3, %v8452_v31  ;;  %v8714_v31 = vpop.f32.mrf.mxu0  ;;  %v4754_v11 = vld [vmem:[#allocation2 + $0x62] sm:$0xff]  ;;  %6597 = vmatpush.msk.msra.mxu0 %vm5323_vm5, %v6596_v47 }
 0x657   : > { %v4023_v55 = vpop.f32.mrf.mxu2  ;;  %v4184_v21 = vpop.f32.mrf.mxu3 }
 0x658   : > { %v4067_v10 = vadd.f32 %v4023_v55, %v8569_v37  ;;  %v4232_v59 = vadd.f32 %v4184_v21, %v4065_v48  ;;  %v8716_v37 = vpop.f32.mrf.mxu1 }
 0x65a   : > { %v4399_v60 = vadd.f32 %v7909_v34, %v4232_v59 }
 0x65c   : > { %6510 = vmatmul.msk.f32.gmra.mxu2 %vm1044_vm3, %v4585_v17  ;;  %6529 = vmatmul.msk.f32.gmra.mxu3 %vm1044_vm3, %v4750_v16  ;;  %v8710_v30 = vadd.f32 %v8640_v33, %v4399_v60  ;;  %v4590_v60 = vld [vmem:[#allocation2 + $0x79] sm:$0xff]  ;;  %v4755_v17 = vld [vmem:[#allocation2 + $0x6a] sm:$0xff] }
 0x65d   : > { %6578 = vmatmul.msk.f32.gmra.mxu1 %vm1044_vm3, %v8461_v38  ;;  %v8727_v23 = vpop.f32.mrf.mxu0 }
 0x65f   : > { %v4026_v19 = vpop.f32.mrf.mxu2  ;;  %v4187_v46 = vpop.f32.mrf.mxu3 }
 0x660   : > { %v4068_v34 = vadd.f32 %v4026_v19, %v8580_v25  ;;  %v4233_v8 = vadd.f32 %v4187_v46, %v4066_v54 }
 0x662   : > { %v4400_v53 = vadd.f32 %v7934_v50, %v4233_v8  ;;  %v8730_v50 = vpop.f32.mrf.mxu1  ;;  %v4756_v8 = vld [vmem:[#allocation2 + $0x72] sm:$0xff] }
 0x664   : > { %6511 = vmatmul.msk.f32.gmra.mxu2 %vm1044_vm3, %v4586_v20  ;;  %6530 = vmatmul.msk.f32.gmra.mxu3 %vm1044_vm3, %v4751_v39  ;;  %v8723_v33 = vadd.f32 %v8646_v6, %v4400_v53 }
 0x665   : > { %6579 = vmatmul.msk.f32.gmra.mxu1 %vm1044_vm3, %v8469_v62  ;;  %v5319_v62 = vld [vmem:[%s9160_s5 + $0x10] sm:$0xf]  ;;  %v4378_v26 = vpop.f32.mrf.mxu0 }
 0x666   : > { %6587 = vmatpush.msk.msra.mxu2 %vm5323_vm5, %v5319_v62  ;;  %v6590_v26 = vld [vmem:[%s9160_s5 + $0x20] sm:$0xff] }
 0x667   : > { %v4029_v38 = vpop.f32.mrf.mxu2  ;;  %v4190_v58 = vpop.f32.mrf.mxu3  ;;  %5372 = vmatpush.msra.mxu3 %v6590_v26 }
 0x668   : > { %v4069_v25 = vadd.f32 %v4029_v38, %v8592_v40  ;;  %v4234_v0 = vadd.f32 %v4190_v58, %v4067_v10  ;;  %v4592_v38 = vld [vmem:[#allocation2 + $0x89] sm:$0xff]  ;;  %v4757_v58 = vld [vmem:[#allocation2 + $0x7a] sm:$0xff] }
 0x66a   : > { %v4401_v15 = vadd.f32 %v7958_v41, %v4234_v0  ;;  %v4545_v24 = vpop.f32.mrf.mxu1 }
 0x66c   : > { %6512 = vmatmul.msk.f32.gmra.mxu2 %vm1044_vm3, %v4587_v57  ;;  %6531 = vmatmul.msk.f32.gmra.mxu3 %vm1044_vm3, %v4752_v18  ;;  %v8739_v6 = vadd.f32 %v8656_v63, %v4401_v15  ;;  %v4753_v63 = vld [vmem:[#allocation2 + $0x5a] sm:$0xff]  ;;  %v4593_v15 = vld [vmem:[#allocation2 + $0x91] sm:$0xff]  ;;  %v4758_v18 = vld [vmem:[#allocation2 + $0x82] sm:$0xff] }
 0x66d   : > { %6580 = vmatmul.msk.f32.gmra.mxu1 %vm1044_vm3, %v8480_v14 }
 0x66f   : > { %v4032_v41 = vpop.f32.mrf.mxu2  ;;  %v4193_v40 = vpop.f32.mrf.mxu3 }
 0x670   : > { %v4070_v5 = vadd.f32 %v4032_v41, %v8604_v2  ;;  %v4235_v48 = vadd.f32 %v4193_v40, %v4068_v34  ;;  %v5318_v41 = vld [vmem:[%s9160_s5 + $0x8] sm:$0xff] }
 0x671   : > { %5341 = vmatpush.msra.mxu2 %v5318_v41  ;;  %v5317_v41 = vld [vmem:[%s9160_s5] sm:$0xff] }
 0x672   : > { %v4402_v9 = vadd.f32 %v8420_v3, %v4235_v48  ;;  %v4594_v48 = vld [vmem:[#allocation2 + $0x99] sm:$0xff] }
 0x673   : > { %5342 = vmatpush.msra.mxu2 %v5317_v41 }
 0x674   : > { %6513 = vmatmul.msk.f32.gmra.mxu2 %vm1044_vm3, %v4588_v12  ;;  %6532 = vmatmul.msk.f32.gmra.mxu3 %vm1044_vm3, %v4753_v63  ;;  %v8753_v14 = vadd.f32 %v8663_v32, %v4402_v9  ;;  %v4381_v32 = vpop.f32.mrf.mxu0  ;;  %v4759_v9 = vld [vmem:[#allocation2 + $0x8a] sm:$0xff] }
 0x675   : > { %6581 = vmatmul.msk.f32.gmra.mxu1 %vm1044_vm3, %v8492_v35 }
 0x677   : > { %v4035_v3 = vpop.f32.mrf.mxu2  ;;  %v4196_v2 = vpop.f32.mrf.mxu3 }
 0x678   : > { %v4071_v28 = vadd.f32 %v4035_v3, %v8613_v4  ;;  %v4236_v54 = vadd.f32 %v4196_v2, %v4069_v25  ;;  %v4595_v3 = vld [vmem:[#allocation2 + $0xa1] sm:$0xff]  ;;  %v4760_v2 = vld [vmem:[#allocation2 + $0x92] sm:$0xff] }
 0x67a   : > { %v4403_v52 = vadd.f32 %v8434_v61, %v4236_v54  ;;  %v4548_v61 = vpop.f32.mrf.mxu1  ;;  %v4930_v54 = vld [vmem:[#allocation2 + $0xab] sm:$0xff] }
 0x67b   : > { %6563 = vmatmul.msk.f32.gmra.mxu0 %vm1044_vm3, %v4930_v54  ;;  %v4596_v61 = vld [vmem:[#allocation2 + $0xa9] sm:$0xff] }
 0x67c   : > { %6514 = vmatmul.msk.f32.gmra.mxu2 %vm1044_vm3, %v4589_v56  ;;  %6533 = vmatmul.msk.f32.gmra.mxu3 %vm1044_vm3, %v4754_v11  ;;  %v8766_v35 = vadd.f32 %v8671_v44, %v4403_v52  ;;  %v5097_v52 = vld [vmem:[#allocation2 + $0xac] sm:$0xff] }
 0x67d   : > { %6582 = vmatmul.msk.f32.gmra.mxu1 %vm1044_vm3, %v8505_v7  ;;  %v4384_v7 = vpop.f32.mrf.mxu0 }
 0x67e   : > { %v4762_v7 = vld [vmem:[#allocation2 + $0xa2] sm:$0xff] }
 0x67f   : > { %v4038_v4 = vpop.f32.mrf.mxu2  ;;  %v4199_v55 = vpop.f32.mrf.mxu3 }
 0x680   : > { %v4072_v21 = vadd.f32 %v4038_v4, %v8622_v42  ;;  %v4237_v10 = vadd.f32 %v4199_v55, %v4070_v5  ;;  %v4761_v4 = vld [vmem:[#allocation2 + $0x9a] sm:$0xff] }
 0x682   : > { %v4404_v59 = vadd.f32 %v8450_v1, %v4237_v10  ;;  %v4551_v46 = vpop.f32.mrf.mxu1  ;;  %v4591_v1 = vld [vmem:[#allocation2 + $0x81] sm:$0xff] }
 0x684   : > { %6515 = vmatmul.msk.f32.gmra.mxu2 %vm1044_vm3, %v4590_v60  ;;  %6534 = vmatmul.msk.f32.gmra.mxu3 %vm1044_vm3, %v4755_v17  ;;  %v8775_v44 = vadd.f32 %v8683_v43, %v4404_v59  ;;  %v4931_v59 = vld [vmem:[#allocation2 + $0xb3] sm:$0xff] }
 0x685   : > { %6583 = vmatmul.msk.f32.gmra.mxu1 %vm1044_vm3, %v8514_v22  ;;  %v4387_v20 = vpop.f32.mrf.mxu0  ;;  %v5098_v60 = vld [vmem:[#allocation2 + $0xb4] sm:$0xff]  ;;  %6564 = vmatmul.msk.f32.gmra.mxu0 %vm1044_vm3, %v4931_v59 }
 0x686   : > { %v4597_v17 = vld [vmem:[#allocation2 + $0xb1] sm:$0xff] }
 0x687   : > { %v4041_v16 = vpop.f32.mrf.mxu2  ;;  %v4202_v19 = vpop.f32.mrf.mxu3 }
 0x688   : > { %v4073_v42 = vadd.f32 %v4041_v16, %v8631_v51  ;;  %v8780_v34 = vadd.f32 %v4202_v19, %v4071_v28  ;;  %v6595_v28 = vld [vmem:[%s9160_s5 + $0x38] sm:$0xff] }
 0x689   : > { %5403 = vmatpush.msra.mxu0 %v6595_v28 }
 0x68a   : > { %v4554_v22 = vpop.f32.mrf.mxu1 }
 0x68c   : > { %6516 = vmatmul.msk.f32.gmra.mxu2 %vm1044_vm3, %v4591_v1  ;;  %6535 = vmatmul.msk.f32.gmra.mxu3 %vm1044_vm3, %v4756_v8  ;;  %v5099_v1 = vld [vmem:[#allocation2 + $0xbc] sm:$0xff] }
 0x68d   : > { %v4390_v57 = vpop.f32.mrf.mxu0  ;;  %6584 = vmatmul.msk.f32.gmra.mxu1 %vm1044_vm3, %v5097_v52  ;;  %v4598_v8 = vld [vmem:[#allocation2 + $0xb9] sm:$0xff] }
 0x68f   : > { %v4044_v53 = vpop.f32.mrf.mxu2  ;;  %v4205_v43 = vpop.f32.mrf.mxu3 }
 0x690   : > { %v8784_v39 = vadd.f32 %v4205_v43, %v4072_v21  ;;  %v4763_v53 = vld [vmem:[#allocation2 + $0xaa] sm:$0xff] }
 0x692   : > { %v4557_v62 = vpop.f32.mrf.mxu1 }
 0x694   : > { %6517 = vmatmul.msk.f32.gmra.mxu2 %vm1044_vm3, %v4592_v38  ;;  %6536 = vmatmul.msk.f32.gmra.mxu3 %vm1044_vm3, %v4757_v58  ;;  %v4764_v58 = vld [vmem:[#allocation2 + $0xb2] sm:$0xff] }
 0x695   : > { %v4393_v45 = vpop.f32.mrf.mxu0  ;;  %6585 = vmatmul.msk.f32.gmra.mxu1 %vm1044_vm3, %v5098_v60 }
 0x697   : > { %v4047_v51 = vpop.f32.mrf.mxu2  ;;  %v4208_v25 = vpop.f32.mrf.mxu3 }
 0x698   : > { %v8788_v0 = vadd.f32 %v4208_v25, %v4073_v42  ;;  %v4932_v42 = vld [vmem:[#allocation2 + $0xbb] sm:$0xff] }
 0x699   : > { %6565 = vmatmul.msk.f32.gmra.mxu0 %vm1044_vm3, %v4932_v42 }
 0x69a   : > { %v4560_v12 = vpop.f32.mrf.mxu1 }
 0x69c   : > { %6518 = vmatmul.msk.f32.gmra.mxu2 %vm1044_vm3, %v4593_v15  ;;  %6537 = vmatmul.msk.f32.gmra.mxu3 %vm1044_vm3, %v4758_v18 }
 0x69d   : > { %v5010_v47 = vpop.f32.mrf.mxu0  ;;  %6586 = vmatmul.msk.f32.gmra.mxu1 %vm1044_vm3, %v5099_v1 }
 0x69f   : > { %v4050_v40 = vpop.f32.mrf.mxu2  ;;  %v4211_v5 = vpop.f32.mrf.mxu3 }
 0x6a0   : > { %v4765_v40 = vld [vmem:[#allocation2 + $0xba] sm:$0xff] }
 0x6a2   : > { %v5177_v32 = vpop.f32.mrf.mxu1 }
 0x6a4   : > { %6519 = vmatmul.msk.f32.gmra.mxu2 %vm1044_vm3, %v4594_v48  ;;  %6538 = vmatmul.msk.f32.gmra.mxu3 %vm1044_vm3, %v4759_v9 }
 0x6a5   : > { %v5013_v10 = vpop.f32.mrf.mxu0 }
 0x6a7   : > { %v4053_v63 = vpop.f32.mrf.mxu2  ;;  %v4214_v24 = vpop.f32.mrf.mxu3 }
 0x6aa   : > { %v5180_v16 = vpop.f32.mrf.mxu1 }
 0x6ac   : > { %6520 = vmatmul.msk.f32.gmra.mxu2 %vm1044_vm3, %v4595_v3  ;;  %6539 = vmatmul.msk.f32.gmra.mxu3 %vm1044_vm3, %v4760_v2  ;;  %v6589_v3 = vld [vmem:[%s9160_s5 + $0x18] sm:$0xff]  ;;  %v6594_v2 = vld [vmem:[%s9160_s5 + $0x30] sm:$0xff] }
 0x6ad   : > { %v5016_v43 = vpop.f32.mrf.mxu0  ;;  %5373 = vmatpush.msra.mxu3 %v6589_v3  ;;  %5404 = vmatpush.msra.mxu0 %v6594_v2 }
 0x6af   : > { %v4056_v56 = vpop.f32.mrf.mxu2  ;;  %v4217_v11 = vpop.f32.mrf.mxu3 }
 0x6b2   : > { %v5183_v20 = vpop.f32.mrf.mxu1 }
 0x6b4   : > { %6521 = vmatmul.msk.f32.gmra.mxu2 %vm1044_vm3, %v4596_v61  ;;  %6540 = vmatmul.msk.f32.gmra.mxu3 %vm1044_vm3, %v4761_v4  ;;  %v6601_v61 = vld [vmem:[%s9160_s5 + $0x58] sm:$0xf]  ;;  %v6600_v4 = vld [vmem:[%s9160_s5 + $0x50] sm:$0xff] }
 0x6b5   : > { %v5019_v51 = vpop.f32.mrf.mxu0  ;;  %6602 = vmatpush.msk.msrb.mxu2 %vm5323_vm5, %v6601_v61  ;;  %v6619_v61 = vld [vmem:[%s9160_s5 + $0xa8] sm:$0xff] }
 0x6b7   : > { %v4059_v55 = vpop.f32.mrf.mxu2  ;;  %v4220_v21 = vpop.f32.mrf.mxu3  ;;  %5434 = vmatpush.msrb.mxu2 %v6600_v4 }
 0x6b8   : > { %v6599_v21 = vld [vmem:[%s9160_s5 + $0x48] sm:$0xff] }
 0x6b9   : > { %5435 = vmatpush.msrb.mxu2 %v6599_v21 }
 0x6ba   : > { %v5186_v25 = vpop.f32.mrf.mxu1 }
 0x6bc   : > { %6522 = vmatmul.msk.f32.gmra.mxu2 %vm1044_vm3, %v4597_v17  ;;  %6541 = vmatmul.msk.f32.gmra.mxu3 %vm1044_vm3, %v4762_v7 }
 0x6bd   : > { %v5022_v26 = vpop.f32.mrf.mxu0 }
 0x6bf   : > { %v4223_v19 = vpop.f32.mrf.mxu3  ;;  %v4676_v46 = vpop.f32.mrf.mxu2 }
 0x6c0   : > { %v4730_v15 = vadd.f32 %v4676_v46, %v8677_v13 }
 0x6c2   : > { %v5189_v13 = vpop.f32.mrf.mxu1 }
 0x6c4   : > { %6523 = vmatmul.msk.f32.gmra.mxu2 %vm1044_vm3, %v4598_v8  ;;  %6542 = vmatmul.msk.f32.gmra.mxu3 %vm1044_vm3, %v4763_v53 }
 0x6c5   : > { %v8832_v11 = vpop.f32.mrf.mxu0 }
 0x6c7   : > { %v4226_v22 = vpop.f32.mrf.mxu3  ;;  %v4679_v38 = vpop.f32.mrf.mxu2 }
 0x6c8   : > { %v4731_v9 = vadd.f32 %v4679_v38, %v8688_v27 }
 0x6ca   : > { %v8842_v55 = vpop.f32.mrf.mxu1 }
 0x6cc   : > { %6543 = vmatmul.msk.f32.gmra.mxu3 %vm1044_vm3, %v4764_v58 }
 0x6cd   : > { %v8849_v19 = vpop.f32.mrf.mxu0 }
 0x6cf   : > { %v4682_v57 = vpop.f32.mrf.mxu2  ;;  %v4843_v18 = vpop.f32.mrf.mxu3 }
 0x6d0   : > { %v4897_v62 = vadd.f32 %v4843_v18, %v4730_v15  ;;  %v4732_v27 = vadd.f32 %v4682_v57, %v8699_v29 }
 0x6d2   : > { %v5064_v5 = vadd.f32 %v5010_v47, %v4897_v62  ;;  %v8851_v42 = vpop.f32.mrf.mxu1  ;;  %v6610_v62 = vld [vmem:[%s9160_s5 + $0x80] sm:$0xff] }
 0x6d4   : > { %v5231_v48 = vadd.f32 %v5177_v32, %v5064_v5  ;;  %6544 = vmatmul.msk.f32.gmra.mxu3 %vm1044_vm3, %v4765_v40  ;;  %v6616_v5 = vld [vmem:[%s9160_s5 + $0xa0] sm:$0xf] }
 0x6d6   : > { %v5249_v45 = vmax.f32 %v5231_v48, 0.0  ;;  %v6604_v48 = vld [vmem:[%s9160_s5 + $0x60] sm:$0xff] }
 0x6d7   : > { %v4685_v12 = vpop.f32.mrf.mxu2  ;;  %v4846_v63 = vpop.f32.mrf.mxu3 }
 0x6d8   : > { %5268 = vst.msk [vmem:[#allocation3] sm:$0xff] %vm5267_vm4, %v5249_v45  ;;  %v4898_v24 = vadd.f32 %v4846_v63, %v4731_v9  ;;  %v4733_v59 = vadd.f32 %v4685_v12, %v8710_v30  ;;  %v5031_v9 = vpop.f32.mrf.mxu0 }
 0x6da   : > { %v5065_v28 = vadd.f32 %v5013_v10, %v4898_v24  ;;  %v6609_v24 = vld [vmem:[%s9160_s5 + $0x78] sm:$0xff]  ;;  %v5198_v3 = vpop.f32.mrf.mxu1 }
 0x6dc   : > { %v5232_v54 = vadd.f32 %v5180_v16, %v5065_v28 }
 0x6de   : > { %v5250_v52 = vmax.f32 %v5232_v54, 0.0 }
 0x6df   : > { %v4688_v47 = vpop.f32.mrf.mxu2  ;;  %v4849_v56 = vpop.f32.mrf.mxu3  ;;  %v5288_v38 = vld [vmem:[#allocation3] sm:$0xff] }
 0x6e0   : > { %5269 = vst.msk [vmem:[#allocation3 + $0x8] sm:$0xff] %vm5267_vm4, %v5250_v52  ;;  %v4899_v32 = vadd.f32 %v4849_v56, %v4732_v27  ;;  %v4734_v53 = vadd.f32 %v4688_v47, %v8723_v33  ;;  %v6611_v33 = vld [vmem:[%s9160_s5 + $0x88] sm:$0xf]  ;;  %v6620_v47 = vld [vmem:[%s9160_s5 + $0xb0] sm:$0xff] }
 0x6e1   : > { %6612 = vmatpush.msk.msrb.mxu0 %vm5323_vm5, %v6611_v33 }
 0x6e2   : > { %v5066_v29 = vadd.f32 %v5016_v43, %v4899_v32 }
 0x6e3   : > { %5496 = vmatpush.msrb.mxu0 %v6610_v62 }
 0x6e4   : > { %v5233_v10 = vadd.f32 %v5183_v20, %v5066_v29  ;;  %v5034_v29 = vpop.f32.mrf.mxu0 }
 0x6e5   : > { %5497 = vmatpush.msrb.mxu0 %v6609_v24  ;;  %v4405_v24 = vadd.f32 %v8694_v36, %v8780_v34  ;;  %v6639_v36 = vld [vmem:[%s9160_s5 + $0x108] sm:$0xff] }
 0x6e6   : > { %v5251_v60 = vmax.f32 %v5233_v10, 0.0 }
 0x6e7   : > { %v4691_v17 = vpop.f32.mrf.mxu2  ;;  %v4852_v7 = vpop.f32.mrf.mxu3  ;;  %v5292_v8 = vld [vmem:[#allocation3 + $0x1] sm:$0xff] }
 0x6e8   : > { %5270 = vst.msk [vmem:[#allocation3 + $0x10] sm:$0xff] %vm5267_vm4, %v5251_v60  ;;  %v4900_v16 = vadd.f32 %v4852_v7, %v4733_v59  ;;  %v5296_v57 = vmax.f32 %v5288_v38, %v5292_v8  ;;  %v4735_v2 = vadd.f32 %v4691_v17, %v8739_v6  ;;  %v6621_v6 = vld [vmem:[%s9160_s5 + $0xb8] sm:$0xf]  ;;  %v5201_v17 = vpop.f32.mrf.mxu1 }
 0x6ea   : > { %v5067_v46 = vadd.f32 %v5019_v51, %v4900_v16  ;;  %v6606_v51 = vld [vmem:[%s9160_s5 + $0x70] sm:$0xf] }
 0x6eb   : > { %6607 = vmatpush.msk.msrb.mxu3 %vm5323_vm5, %v6606_v51  ;;  %v6636_v51 = vld [vmem:[%s9160_s5 + $0x100] sm:$0xf] }
 0x6ec   : > { %v5234_v1 = vadd.f32 %v5186_v25, %v5067_v46  ;;  %v6605_v25 = vld [vmem:[%s9160_s5 + $0x68] sm:$0xff] }
 0x6ed   : > { %5465 = vmatpush.msrb.mxu3 %v6605_v25  ;;  %v6624_v25 = vld [vmem:[%s9160_s5 + $0xc0] sm:$0xff] }
 0x6ee   : > { %v5252_v43 = vmax.f32 %v5234_v1, 0.0 }
 0x6ef   : > { %v4694_v20 = vpop.f32.mrf.mxu2  ;;  %v4855_v22 = vpop.f32.mrf.mxu3  ;;  %v5300_v30 = vld [vmem:[#allocation3 + $0xc] sm:$0xff]  ;;  %5466 = vmatpush.msrb.mxu3 %v6604_v48 }
 0x6f0   : > { %v5304_v58 = vld [vmem:[#allocation3 + $0xd] sm:$0xff]  ;;  %5271 = vst.msk [vmem:[#allocation3 + $0x18] sm:$0xff] %vm5267_vm4, %v5252_v43  ;;  %v4901_v15 = vadd.f32 %v4855_v22, %v4734_v53  ;;  %v4736_v21 = vadd.f32 %v4694_v20, %v8753_v14  ;;  %v5204_v33 = vpop.f32.mrf.mxu1 }
 0x6f1   : > { %v5308_v18 = vmax.f32 %v5300_v30, %v5304_v58  ;;  %v5037_v58 = vpop.f32.mrf.mxu0  ;;  %v6629_v48 = vld [vmem:[%s9160_s5 + $0xd8] sm:$0xff] }
 0x6f2   : > { %v5068_v41 = vadd.f32 %v5022_v26, %v4901_v15  ;;  %v6615_v26 = vld [vmem:[%s9160_s5 + $0x98] sm:$0xff]  ;;  %v6630_v15 = vld [vmem:[%s9160_s5 + $0xe0] sm:$0xff] }
 0x6f3   : > { %v5312_v40 = vmax.f32 %v5296_v57, %v5308_v18 }
 0x6f4   : > { %v5235_v45 = vadd.f32 %v5189_v13, %v5068_v41  ;;  %v6614_v13 = vld [vmem:[%s9160_s5 + $0x90] sm:$0xff] }
 0x6f5   : > { %6588 = vmatmul.msk.f32.vlgmr.msra.gmra.mxu2 %vm5267_vm4, %v5312_v40  ;;  %v5352_v12 = vrot.slane %v5312_v40, 2  ;;  %v5383_v63 = vrot.slane %v5312_v40, 4  ;;  %v5414_v32 = vrot.slane %v5312_v40, 6 }
 0x6f6   : > { %6617 = vmatpush.msk.msra.mxu2 %vm5323_vm5, %v6616_v5  ;;  %v5253_v28 = vmax.f32 %v5235_v45, 0.0  ;;  %v6635_v5 = vld [vmem:[%s9160_s5 + $0xf8] sm:$0xff] }
 0x6f7   : > { %6593 = vmatmul.msk.f32.vlgmr.msra.gmra.mxu3 %vm5267_vm4, %v5352_v12  ;;  %6598 = vmatmul.msk.f32.vlgmr.msra.gmra.mxu0 %vm5267_vm4, %v5383_v63  ;;  %v4697_v54 = vpop.f32.mrf.mxu2  ;;  %v4858_v27 = vpop.f32.mrf.mxu3  ;;  %v5289_v43 = vld [vmem:[#allocation3 + $0x18] sm:$0xff]  ;;  %v6634_v12 = vld [vmem:[%s9160_s5 + $0xf0] sm:$0xff] }
 0x6f8   : > { %5527 = vmatpush.msra.mxu2 %v6615_v26  ;;  %5272 = vst.msk [vmem:[#allocation3 + $0x20] sm:$0xff] %vm5267_vm4, %v5253_v28  ;;  %v4902_v52 = vadd.f32 %v4858_v27, %v4735_v2  ;;  %6622 = vmatpush.msk.msra.mxu3 %vm5323_vm5, %v6621_v6  ;;  %v6640_v2 = vld [vmem:[%s9160_s5 + $0x110] sm:$0xff] }
 0x6f9   : > { %v5040_v34 = vpop.f32.mrf.mxu0 }
 0x6fa   : > { %5528 = vmatpush.msra.mxu2 %v6614_v13  ;;  %v5069_v56 = vadd.f32 %v8832_v11, %v4902_v52  ;;  %5558 = vmatpush.msra.mxu3 %v6620_v47  ;;  %v5207_v52 = vpop.f32.mrf.mxu1 }
 0x6fc   : > { %v5236_v4 = vadd.f32 %v8842_v55, %v5069_v56  ;;  %5559 = vmatpush.msra.mxu3 %v6619_v61  ;;  %v4737_v55 = vadd.f32 %v4697_v54, %v8766_v35  ;;  %v6631_v35 = vld [vmem:[%s9160_s5 + $0xe8] sm:$0xf]  ;;  %v4572_v54 = vadd.f32 %v8703_v49, %v4405_v24  ;;  %v4406_v61 = vadd.f32 %v8714_v31, %v8784_v39  ;;  %v6644_v39 = vld [vmem:[%s9160_s5 + $0x120] sm:$0xff] }
 0x6fd   : > { %6603 = vmatmul.msk.f32.vlgmr.msrb.gmra.mxu2 %vm5267_vm4, %v5414_v32  ;;  %v6645_v49 = vld [vmem:[%s9160_s5 + $0x128] sm:$0xff] }
 0x6fe   : > { %v5254_v10 = vmax.f32 %v5236_v4, 0.0  ;;  %6632 = vmatpush.msk.msrb.mxu2 %vm5323_vm5, %v6631_v35 }
 0x6ff   : > { %v4700_v59 = vpop.f32.mrf.mxu2  ;;  %v4861_v60 = vpop.f32.mrf.mxu3  ;;  %v5293_v46 = vld [vmem:[#allocation3 + $0x19] sm:$0xff] }
 0x700   : > { %5273 = vst.msk [vmem:[#allocation3 + $0x28] sm:$0xff] %vm5267_vm4, %v5254_v10  ;;  %v4903_v11 = vadd.f32 %v4861_v60, %v4736_v21  ;;  %v5297_v38 = vmax.f32 %v5289_v43, %v5293_v46  ;;  %5620 = vmatpush.msrb.mxu2 %v6630_v15  ;;  %v6651_v21 = vld [vmem:[%s9160_s5 + $0x148] sm:$0xf]  ;;  %v4573_v10 = vadd.f32 %v8716_v37, %v4406_v61  ;;  %v6650_v37 = vld [vmem:[%s9160_s5 + $0x140] sm:$0xff]  ;;  %v6655_v15 = vld [vmem:[%s9160_s5 + $0x158] sm:$0xff] }
 0x701   : > { %v5043_v60 = vpop.f32.mrf.mxu0 }
 0x702   : > { %v5070_v7 = vadd.f32 %v8849_v19, %v4903_v11  ;;  %v6626_v19 = vld [vmem:[%s9160_s5 + $0xd0] sm:$0xf]  ;;  %5621 = vmatpush.msrb.mxu2 %v6629_v48 }
 0x703   : > { %6627 = vmatpush.msk.msra.mxu0 %vm5323_vm5, %v6626_v19 }
 0x704   : > { %v5237_v16 = vadd.f32 %v8851_v42, %v5070_v7  ;;  %v6625_v42 = vld [vmem:[%s9160_s5 + $0xc8] sm:$0xff] }
 0x705   : > { %5589 = vmatpush.msra.mxu0 %v6625_v42 }
 0x706   : > { %v5255_v1 = vmax.f32 %v5237_v16, 0.0  ;;  %v5210_v16 = vpop.f32.mrf.mxu1 }
 0x707   : > { %v4703_v8 = vpop.f32.mrf.mxu2  ;;  %v4864_v53 = vpop.f32.mrf.mxu3  ;;  %v5301_v22 = vld [vmem:[#allocation3 + $0x24] sm:$0xff]  ;;  %5590 = vmatpush.msra.mxu0 %v6624_v25 }
 0x708   : > { %v5305_v14 = vld [vmem:[#allocation3 + $0x25] sm:$0xff]  ;;  %5274 = vst.msk [vmem:[#allocation3 + $0x30] sm:$0xff] %vm5267_vm4, %v5255_v1  ;;  %v4904_v20 = vadd.f32 %v4864_v53, %v4737_v55  ;;  %v4739_v6 = vadd.f32 %v4703_v8, %v4572_v54  ;;  %v4407_v53 = vadd.f32 %v8727_v23, %v8788_v0  ;;  %v6656_v23 = vld [vmem:[%s9160_s5 + $0x160] sm:$0xf] }
 0x709   : > { %v5309_v30 = vmax.f32 %v5301_v22, %v5305_v14 }
 0x70a   : > { %v5071_v57 = vadd.f32 %v5031_v9, %v4904_v20  ;;  %v4738_v9 = vadd.f32 %v4700_v59, %v8775_v44  ;;  %v6641_v44 = vld [vmem:[%s9160_s5 + $0x118] sm:$0xf]  ;;  %v4574_v0 = vadd.f32 %v8730_v50, %v4407_v53  ;;  %v6654_v50 = vld [vmem:[%s9160_s5 + $0x150] sm:$0xff] }
 0x70b   : > { %v5313_v18 = vmax.f32 %v5297_v38, %v5309_v30  ;;  %v6649_v38 = vld [vmem:[%s9160_s5 + $0x138] sm:$0xff] }
 0x70c   : > { %v5238_v62 = vadd.f32 %v5198_v3, %v5071_v57  ;;  %v6661_v57 = vld [vmem:[%s9160_s5 + $0x178] sm:$0xf] }
 0x70d   : > { %6608 = vmatmul.msk.f32.vlgmr.msrb.gmra.mxu3 %vm5267_vm4, %v5313_v18  ;;  %v5476_v41 = vrot.slane %v5313_v18, 2  ;;  %v5507_v40 = vrot.slane %v5313_v18, 4  ;;  %v5538_v13 = vrot.slane %v5313_v18, 6  ;;  %v5046_v18 = vpop.f32.mrf.mxu0  ;;  %v5825_v53 = vld [vmem:[%s9162_s7 + $0x58] sm:$0xff] }
 0x70e   : > { %6637 = vmatpush.msk.msrb.mxu3 %vm5323_vm5, %v6636_v51  ;;  %v5256_v45 = vmax.f32 %v5238_v62, 0.0  ;;  %v5817_v18 = vld [vmem:[%s9162_s7 + $0x18] sm:$0xff] }
 0x70f   : > { %6613 = vmatmul.msk.f32.vlgmr.msrb.gmra.mxu0 %vm5267_vm4, %v5476_v41  ;;  %6618 = vmatmul.msk.f32.vlgmr.msra.gmra.mxu2 %vm5267_vm4, %v5507_v40  ;;  %v4706_v63 = vpop.f32.mrf.mxu2  ;;  %v4867_v26 = vpop.f32.mrf.mxu3  ;;  %v5290_v55 = vld [vmem:[#allocation3 + $0x30] sm:$0xff] }
 0x710   : > { %5651 = vmatpush.msrb.mxu3 %v6635_v5  ;;  %5275 = vst.msk [vmem:[#allocation3 + $0x38] sm:$0xff] %vm5267_vm4, %v5256_v45  ;;  %v4905_v3 = vadd.f32 %v4867_v26, %v4738_v9  ;;  %6642 = vmatpush.msk.msrb.mxu0 %vm5323_vm5, %v6641_v44  ;;  %v5213_v41 = vpop.f32.mrf.mxu1  ;;  %v6659_v5 = vld [vmem:[%s9160_s5 + $0x168] sm:$0xff] }
 0x711   : > { %v5815_v41 = vld [vmem:[%s9162_s7 + $0x8] sm:$0xff] }
 0x712   : > { %5652 = vmatpush.msrb.mxu3 %v6634_v12  ;;  %v5072_v28 = vadd.f32 %v5034_v29, %v4905_v3  ;;  %5682 = vmatpush.msrb.mxu0 %v6640_v2  ;;  %v6646_v29 = vld [vmem:[%s9160_s5 + $0x130] sm:$0xf] }
 0x713   : > { %6647 = vmatpush.msk.msra.mxu2 %vm5323_vm5, %v6646_v29 }
 0x714   : > { %v5239_v27 = vadd.f32 %v5201_v17, %v5072_v28  ;;  %5683 = vmatpush.msrb.mxu0 %v6639_v36  ;;  %v4740_v17 = vadd.f32 %v4706_v63, %v4573_v10 }
 0x715   : > { %6623 = vmatmul.msk.f32.vlgmr.msra.gmra.mxu3 %vm5267_vm4, %v5538_v13  ;;  %5713 = vmatpush.msra.mxu2 %v6645_v49  ;;  %v5049_v24 = vpop.f32.mrf.mxu0 }
 0x716   : > { %v5257_v47 = vmax.f32 %v5239_v27, 0.0  ;;  %6652 = vmatpush.msk.msra.mxu3 %vm5323_vm5, %v6651_v21  ;;  %v5864_v24 = vld [vmem:[%s9164_s9 + $0x60] sm:$0xff] }
 0x717   : > { %v4709_v56 = vpop.f32.mrf.mxu2  ;;  %v4870_v32 = vpop.f32.mrf.mxu3  ;;  %v5294_v11 = vld [vmem:[#allocation3 + $0x31] sm:$0xff]  ;;  %5714 = vmatpush.msra.mxu2 %v6644_v39 }
 0x718   : > { %5276 = vst.msk [vmem:[#allocation3 + $0x40] sm:$0xff] %vm5267_vm4, %v5257_v47  ;;  %v4906_v4 = vadd.f32 %v4870_v32, %v4739_v6  ;;  %v5298_v22 = vmax.f32 %v5290_v55, %v5294_v11  ;;  %5744 = vmatpush.msra.mxu3 %v6650_v37  ;;  %v4741_v51 = vadd.f32 %v4709_v56, %v4574_v0  ;;  %v5216_v3 = vpop.f32.mrf.mxu1  ;;  %v5828_v55 = vld [vmem:[%s9162_s7 + $0x70] sm:$0xff] }
 0x719   : > { %v5820_v0 = vld [vmem:[%s9162_s7 + $0x30] sm:$0xff] }
 0x71a   : > { %v5073_v31 = vadd.f32 %v5037_v58, %v4906_v4  ;;  %5745 = vmatpush.msra.mxu3 %v6649_v38 }
 0x71c   : > { %v5240_v59 = vadd.f32 %v5204_v33, %v5073_v31  ;;  %v6660_v33 = vld [vmem:[%s9160_s5 + $0x170] sm:$0xff] }
 0x71e   : > { %v5258_v7 = vmax.f32 %v5240_v59, 0.0 }
 0x71f   : > { %v4873_v46 = vpop.f32.mrf.mxu3  ;;  %v5302_v1 = vld [vmem:[#allocation3 + $0x3c] sm:$0xff]  ;;  %v4712_v20 = vpop.f32.mrf.mxu2 }
 0x720   : > { %v5306_v8 = vld [vmem:[#allocation3 + $0x3d] sm:$0xff]  ;;  %5277 = vst.msk [vmem:[#allocation3 + $0x48] sm:$0xff] %vm5267_vm4, %v5258_v7  ;;  %v4907_v43 = vadd.f32 %v4873_v46, %v4740_v17  ;;  %v5219_v47 = vpop.f32.mrf.mxu1  ;;  %v5829_v46 = vld [vmem:[%s9162_s7 + $0x78] sm:$0xff] }
 0x721   : > { %v5310_v14 = vmax.f32 %v5302_v1, %v5306_v8  ;;  %v5827_v1 = vld [vmem:[%s9162_s7 + $0x68] sm:$0xff]  ;;  %v5826_v8 = vld [vmem:[%s9162_s7 + $0x60] sm:$0xff]  ;;  %v5859_v47 = vld [vmem:[%s9164_s9 + $0x38] sm:$0xff] }
 0x722   : > { %v5074_v30 = vadd.f32 %v5040_v34, %v4907_v43  ;;  %v5824_v43 = vld [vmem:[%s9162_s7 + $0x50] sm:$0xff]  ;;  %v5822_v20 = vld [vmem:[%s9162_s7 + $0x40] sm:$0xff] }
 0x723   : > { %v5314_v19 = vmax.f32 %v5298_v22, %v5310_v14  ;;  %v5823_v22 = vld [vmem:[%s9162_s7 + $0x48] sm:$0xff]  ;;  %v5316_v14 = vld [vmem:[%s9161_s6] sm:$0x1] }
 0x724   : > { %v5241_v42 = vadd.f32 %v5207_v52, %v5074_v30  ;;  %v5052_v52 = vpop.f32.mrf.mxu0  ;;  %v5821_v30 = vld [vmem:[%s9162_s7 + $0x38] sm:$0xff] }
 0x725   : > { %6628 = vmatmul.msk.f32.vlgmr.msra.gmra.mxu0 %vm5267_vm4, %v5314_v19  ;;  %v5600_v35 = vrot.slane %v5314_v19, 2  ;;  %v5631_v58 = vrot.slane %v5314_v19, 4  ;;  %v5662_v9 = vrot.slane %v5314_v19, 6 }
 0x726   : > { %6657 = vmatpush.msk.msra.mxu0 %vm5323_vm5, %v6656_v23  ;;  %v5259_v25 = vmax.f32 %v5241_v42, 0.0 }
 0x727   : > { %6633 = vmatmul.msk.f32.vlgmr.msrb.gmra.mxu2 %vm5267_vm4, %v5600_v35  ;;  %6638 = vmatmul.msk.f32.vlgmr.msrb.gmra.mxu3 %vm5267_vm4, %v5631_v58  ;;  %v4876_v62 = vpop.f32.mrf.mxu3  ;;  %v4715_v45 = vpop.f32.mrf.mxu2  ;;  %v5291_v13 = vld [vmem:[#allocation3 + $0x48] sm:$0xff]  ;;  %v5819_v35 = vld [vmem:[%s9162_s7 + $0x28] sm:$0xff]  ;;  %v5818_v58 = vld [vmem:[%s9162_s7 + $0x20] sm:$0xff] }
 0x728   : > { %5775 = vmatpush.msra.mxu0 %v6655_v15  ;;  %6662 = vmatpush.msk.msrb.mxu2 %vm5323_vm5, %v6661_v57  ;;  %5278 = vst.msk [vmem:[#allocation3 + $0x50] sm:$0xff] %vm5267_vm4, %v5259_v25  ;;  %v4908_v40 = vadd.f32 %v4876_v62, %v4741_v51  ;;  %v5222_v21 = vpop.f32.mrf.mxu1  ;;  %v5816_v62 = vld [vmem:[%s9162_s7 + $0x10] sm:$0xff] }
 0x729   : > { %5831 = vmatpush.msrb.mxu3 %v5829_v46  ;;  %v5866_v45 = vld [vmem:[%s9164_s9 + $0x70] sm:$0xff]  ;;  %v5856_v21 = vld [vmem:[%s9164_s9 + $0x20] sm:$0xff]  ;;  %v5853_v46 = vld [vmem:[%s9164_s9 + $0x8] sm:$0xff] }
 0x72a   : > { %5776 = vmatpush.msra.mxu0 %v6654_v50  ;;  %5806 = vmatpush.msrb.mxu2 %v6660_v33  ;;  %v5075_v48 = vadd.f32 %v5043_v60, %v4908_v40 }
 0x72b   : > { %5832 = vmatpush.msrb.mxu3 %v5828_v55  ;;  %v5852_v55 = vld [vmem:[%s9164_s9] sm:$0xff] }
 0x72c   : > { %5807 = vmatpush.msrb.mxu2 %v6659_v5  ;;  %v5242_v12 = vadd.f32 %v5210_v16, %v5075_v48  ;;  %v5055_v49 = vpop.f32.mrf.mxu0  ;;  %v5814_v48 = vld [vmem:[%s9162_s7] sm:$0xff] }
 0x72d   : > { %6643 = vmatmul.msk.f32.vlgmr.msrb.gmra.mxu0 %vm5267_vm4, %v5662_v9  ;;  %5833 = vmatpush.msrb.mxu3 %v5827_v1  ;;  %v5867_v9 = vld [vmem:[%s9164_s9 + $0x78] sm:$0xff]  ;;  %v5830_v1 = vld [vmem:[%s9163_s8] sm:$0x1] }
 0x72e   : > { %v5260_v63 = vmax.f32 %v5242_v12, 0.0  ;;  %5869 = vmatpush.msrb.mxu0 %v5867_v9  ;;  %v5865_v12 = vld [vmem:[%s9164_s9 + $0x68] sm:$0xff] }
 0x72f   : > { %v4879_v26 = vpop.f32.mrf.mxu3  ;;  %v4718_v44 = vpop.f32.mrf.mxu2  ;;  %v5295_v2 = vld [vmem:[#allocation3 + $0x49] sm:$0xff]  ;;  %5834 = vmatpush.msrb.mxu3 %v5826_v8 }
 0x730   : > { %5279 = vst.msk [vmem:[#allocation3 + $0x58] sm:$0xff] %vm5267_vm4, %v5260_v63  ;;  %v5299_v54 = vmax.f32 %v5291_v13, %v5295_v2  ;;  %v5225_v60 = vpop.f32.mrf.mxu1  ;;  %5870 = vmatpush.msrb.mxu0 %v5866_v45  ;;  %v5863_v2 = vld [vmem:[%s9164_s9 + $0x58] sm:$0xff] }
 0x731   : > { %5835 = vmatpush.msrb.mxu3 %v5825_v53 }
 0x732   : > { %5871 = vmatpush.msrb.mxu0 %v5865_v12 }
 0x733   : > { %5836 = vmatpush.msrb.mxu3 %v5824_v43 }
 0x734   : > { %v5058_v10 = vpop.f32.mrf.mxu0  ;;  %5872 = vmatpush.msrb.mxu0 %v5864_v24 }
 0x735   : > { %5837 = vmatpush.msrb.mxu3 %v5823_v22  ;;  %v5855_v10 = vld [vmem:[%s9164_s9 + $0x18] sm:$0xff]  ;;  %v5889_v22 = vlaneseq }
 0x736   : > { %5873 = vmatpush.msrb.mxu0 %v5863_v2 }
 0x737   : > { %v4882_v28 = vpop.f32.mrf.mxu3  ;;  %v5303_v36 = vld [vmem:[#allocation3 + $0x54] sm:$0xff]  ;;  %v4721_v61 = vpop.f32.mrf.mxu2  ;;  %5838 = vmatpush.msrb.mxu3 %v5822_v20 }
 0x738   : > { %v5307_v34 = vld [vmem:[#allocation3 + $0x55] sm:$0xff]  ;;  %v5228_v16 = vpop.f32.mrf.mxu1 }
 0x739   : > { %v5311_v27 = vmax.f32 %v5303_v36, %v5307_v34  ;;  %5839 = vmatpush.msrb.mxu3 %v5821_v30  ;;  %v5862_v36 = vld [vmem:[%s9164_s9 + $0x50] sm:$0xff] }
 0x73a   : > { %5874 = vmatpush.msrb.mxu0 %v5862_v36  ;;  %v5854_v16 = vld [vmem:[%s9164_s9 + $0x10] sm:$0xff] }
 0x73b   : > { %v5315_v6 = vmax.f32 %v5299_v54, %v5311_v27  ;;  %5840 = vmatpush.msrb.mxu3 %v5820_v0  ;;  %v5861_v54 = vld [vmem:[%s9164_s9 + $0x48] sm:$0xff]  ;;  %v5860_v27 = vld [vmem:[%s9164_s9 + $0x40] sm:$0xff] }
 0x73c   : > { %v5061_v7 = vpop.f32.mrf.mxu0  ;;  %5875 = vmatpush.msrb.mxu0 %v5861_v54 }
 0x73d   : > { %6648 = vmatmul.msk.f32.vlgmr.msra.gmra.mxu2 %vm5267_vm4, %v5315_v6  ;;  %v5724_v56 = vrot.slane %v5315_v6, 2  ;;  %v5755_v32 = vrot.slane %v5315_v6, 4  ;;  %v5786_v29 = vrot.slane %v5315_v6, 6  ;;  %5841 = vmatpush.msrb.mxu3 %v5819_v35 }
 0x73e   : > { %5876 = vmatpush.msrb.mxu0 %v5860_v27 }
 0x73f   : > { %6653 = vmatmul.msk.f32.vlgmr.msra.gmra.mxu3 %vm5267_vm4, %v5724_v56  ;;  %6658 = vmatmul.msk.f32.vlgmr.msra.gmra.mxu0 %vm5267_vm4, %v5755_v32  ;;  %v4885_v4 = vpop.f32.mrf.mxu3  ;;  %v4724_v39 = vpop.f32.mrf.mxu2  ;;  %v5858_v56 = vld [vmem:[%s9164_s9 + $0x30] sm:$0xff] }
 0x740   : > { %5842 = vmatpush.msrb.mxu3 %v5818_v58  ;;  %5877 = vmatpush.msrb.mxu0 %v5859_v47  ;;  %v5857_v4 = vld [vmem:[%s9164_s9 + $0x28] sm:$0xff] }
 0x742   : > { %5843 = vmatpush.msrb.mxu3 %v5817_v18  ;;  %5878 = vmatpush.msrb.mxu0 %v5858_v56 }
 0x744   : > { %5844 = vmatpush.msrb.mxu3 %v5816_v62  ;;  %5879 = vmatpush.msrb.mxu0 %v5857_v4 }
 0x745   : > { %6663 = vmatmul.msk.f32.vlgmr.msrb.gmra.mxu2 %vm5267_vm4, %v5786_v29 }
 0x746   : > { %5845 = vmatpush.msrb.mxu3 %v5815_v41  ;;  %5880 = vmatpush.msrb.mxu0 %v5856_v21 }
 0x747   : > { %v4888_v31 = vpop.f32.mrf.mxu3  ;;  %v4727_v11 = vpop.f32.mrf.mxu2 }
 0x748   : > { %5846 = vmatpush.msrb.mxu3 %v5814_v48  ;;  %5881 = vmatpush.msrb.mxu0 %v5855_v10 }
 0x74a   : > { %5882 = vmatpush.msrb.mxu0 %v5854_v16 }
 0x74c   : > { %5883 = vmatpush.msrb.mxu0 %v5853_v46 }
 0x74e   : > { %5884 = vmatpush.msrb.mxu0 %v5852_v55 }
 0x74f   : > { %v4891_v59 = vpop.f32.mrf.mxu3 }
 0x757   : > { %v4894_v17 = vpop.f32.mrf.mxu3 }
 0x774   : > { %v5406_v42 = vpop.f32.mrf.mxu0 }
 0x778   : > { %v5344_v37 = vpop.f32.mrf.mxu2 }
 0x779   : > { %v5347_v38 = vadd.f32 %v5344_v37, %v5316_v14  ;;  %v5890_v14 = vand.u32 127, %v5889_v22  ;;  %v5868_v37 = vld [vmem:[%s9165_s10] sm:$0x1] }
 0x77a   : > { %v5375_v19 = vpop.f32.mrf.mxu3 }
 0x77b   : > { %v5378_v23 = vadd.f32 %v5375_v19, %v5347_v38  ;;  %vm5891_vm6 = vcmp.lt.s32.totalorder %v5890_v14, 10 }
 0x77d   : > { %v5409_v57 = vadd.f32 %v5406_v42, %v5378_v23 }
 0x780   : > { %v5437_v15 = vpop.f32.mrf.mxu2 }
 0x781   : > { %v5440_v25 = vadd.f32 %v5437_v15, %v5409_v57 }
 0x78c   : > { %v5499_v33 = vpop.f32.mrf.mxu0 }
 0x790   : > { %v5468_v51 = vpop.f32.mrf.mxu3 }
 0x791   : > { %v5471_v50 = vadd.f32 %v5468_v51, %v5440_v25 }
 0x792   : > { %v5530_v40 = vpop.f32.mrf.mxu2 }
 0x793   : > { %v5502_v5 = vadd.f32 %v5499_v33, %v5471_v50 }
 0x795   : > { %v5533_v26 = vadd.f32 %v5530_v40, %v5502_v5 }
 0x798   : > { %v5561_v63 = vpop.f32.mrf.mxu3 }
 0x799   : > { %v5564_v44 = vadd.f32 %v5561_v63, %v5533_v26 }
 0x7a2   : > { %v5592_v3 = vpop.f32.mrf.mxu0 }
 0x7a3   : > { %v5595_v13 = vadd.f32 %v5592_v3, %v5564_v44 }
 0x7aa   : > { %v5623_v28 = vpop.f32.mrf.mxu2  ;;  %v5654_v52 = vpop.f32.mrf.mxu3 }
 0x7ab   : > { %v5626_v34 = vadd.f32 %v5623_v28, %v5595_v13  ;;  %v5685_v32 = vpop.f32.mrf.mxu0 }
 0x7ad   : > { %v5657_v6 = vadd.f32 %v5654_v52, %v5626_v34 }
 0x7af   : > { %v5688_v61 = vadd.f32 %v5685_v32, %v5657_v6 }
 0x7bc   : > { %v5778_v59 = vpop.f32.mrf.mxu0 }
 0x7c0   : > { %v5716_v29 = vpop.f32.mrf.mxu2 }
 0x7c1   : > { %v5719_v49 = vadd.f32 %v5716_v29, %v5688_v61 }
 0x7c2   : > { %v5747_v31 = vpop.f32.mrf.mxu3 }
 0x7c3   : > { %v5750_v39 = vadd.f32 %v5747_v31, %v5719_v49 }
 0x7c5   : > { %v5781_v60 = vadd.f32 %v5778_v59, %v5750_v39 }
 0x7c8   : > { %v5809_v11 = vpop.f32.mrf.mxu2 }
 0x7c9   : > { %v5812_v17 = vadd.f32 %v5809_v11, %v5781_v60 }
 0x7cb   : > { %v5813_v7 = vmax.f32 %v5812_v17, 0.0 }
 0x7cd   : > { %5847 = vmatmul.f32.vlgmr.msrb.gmra.mxu3 %v5813_v7 }
 0x850   : > { %v5848_v8 = vpop.f32.mrf.mxu3 }
 0x851   : > { %v5849_v53 = vadd.f32 %v5848_v8, %v5830_v1 }
 0x853   : > { %v5851_v43 = vmax.f32 %v5849_v53, 0.0 }
 0x855   : > { %5885 = vmatmul.f32.vlgmr.msrb.gmra.mxu0 %v5851_v43 }
 0x8d2   : > { %v5886_v20 = vpop.f32.mrf.mxu0 }
 0x8d3   : > { %v5887_v38 = vadd.f32 %v5886_v20, %v5868_v37 }
 0x8d5   : > { %v5892_v30 = vsel %vm5891_vm6, %v5887_v38, -inf }
 0x8d6   : > { %v5893_v19 = vsel %vm681_vm0, %v5892_v30, -inf }
 0x8d7   : > { %5894 = vmax.xlane.f32.xlu0 %v5893_v19 }
 0x94a   : > { %v5895_v23 = vpop.xlane.xlu0 %5894 }
 0x94b   : > { %v5896_v0 = vsub.f32 %v5892_v30, %v5895_v23 }
 0x94d   : > { %v5897_v42 = vmul.f32 1.442695, %v5896_v0 }
 0x94f   : > { %6713 = vpow2.f32 %v5897_v42 }
 0x955   : > { %v6714_v35 = vpop.eup %6713 }
 0x956   : > { %v5899_v58 = vsel %vm681_vm0, %v6714_v35, 0.0 }
 0x957   : > { %5900 = vadd.xlane.f32.xlu0 %v5899_v58 }
 0x9ca   : > { %v5901_v15 = vpop.xlane.xlu0 %5900 }
 0x9cb   : > { %6715 = vrcp.f32 %v5901_v15  ;;  %v5913_v25 = vand.u32 2147483648, %v5901_v15  ;;  %v5911_v33 = vand.u32 2147483647, %v5901_v15  ;;  %vm5907_vm8 = vweird.f32 %v5901_v15 }
 0x9cd   : > { %v5914_v41 = vor.u32 1.1754944e-38, %v5913_v25  ;;  %vm5912_vm10 = vcmp.eq.f32.partialorder %v5911_v33, 8.507059e+37 }
 0x9d1   : > { %v6716_v57 = vpop.eup %6715 }
 0x9d2   : > { %v5903_v18 = vmul.f32 %v6716_v57, %v5901_v15  ;;  %vm5908_vm7 = vweird.f32 %v6716_v57 }
 0x9d3   : > { %vm5909_vm9 = vmor %vm5907_vm8, %vm5908_vm7 }
 0x9d4   : > { %v5904_v51 = vsub.f32 1.0, %v5903_v18 }
 0x9d6   : > { %v5905_v50 = vmul.f32 %v6716_v57, %v5904_v51 }
 0x9d8   : > { %v5906_v62 = vadd.f32 %v6716_v57, %v5905_v50 }
 0x9da   : > { %v5910_v40 = vsel %vm5909_vm9, %v6716_v57, %v5906_v62 }
 0x9db   : > { %v5915_v5 = vsel %vm5912_vm10, %v5914_v41, %v5910_v40 }
 0x9dc   : > { %v5916_v48 = vmul.f32 %v6714_v35, %v5915_v5 }
 0x9de   : > { %5917 = vst [vmem:[%s378_s22] sm:$0x1] %v5916_v48 }
 0x9df   : > { %6744 = shalt.err (!%p6741_p3)
}
 0x9e0   : > { %6671 = dma.vmem_to_hbm [thread:$0]  (%p6880_p5), %s5930_s24, 16, %s5932_s25, %s5919_s29  }
 0x9e1 PF: > { %p6677_p4 = scmp.ge.s32.totalorder %s6779_s20, 2  ;;  %s5943_s13 = sand.u32 1, %s6767_s17  }
 0x9e2   : > { %s5944_s22 = scalar_lea.sflag [#allocation5], %s5943_s13 }
 0x9e3   : > { %p6674_p7 = pnand %p6677_p4, %p6884_p6 }
 0x9e5   : > { %p6675_p8 = pneg %p6674_p7 }
 0x9e7   : > { %6762 = dma.done.wait (%p6675_p8), %s5944_s22, 16  }
 0x9e8   : > { %6764 = vsyncadd (%p6675_p8), %s5944_s22, 4294967280  ;;  %p21_p9 = scmp.ge.s32.totalorder %s6867_s23, 4   ;;  %s9203_s17 = smov %s6771_s18 }
 0x9e9   : > { %s9204_s18 = smov %s6775_s19  ;;  %s9205_s19 = smov %s6878_s26 }
 0x9ea   : > { %s9206_s20 = smov %s6867_s23  ;;  %23 = sbr.rel (!%p21_p9) target bundleno = 5 (0x5), region = 138 }
 0x9ef   :  { %5949 = vsyncpa [#allocation5], 1 }
 0x9f0   :  { %5951 = vsyncpa [#allocation5 + $0x1], 1 }

</bundles_post_ra>
